<compile_context>
chip_gen: v6e
topology: v6e:2x2x1
jax: 0.10.0
libtpu: 0.0.40
codegen_flags: <defaults>
</compile_context>

<pallas_src>
import functools

import jax
import jax.numpy as jnp
from jax import lax
from jax.experimental import pallas as pl
from jax.experimental.pallas import tpu as pltpu

EPS = 1e-5
LANE = 128


# ---------------------------------------------------------------------------
# hardware-aware sizing
def _tpu_vmem_capacity_bytes():
    try:
        info = pltpu.get_tpu_info()
        cap = int(getattr(info, "vmem_capacity_bytes", 0) or 0)
        if cap > 0:
            return cap
    except Exception:
        pass
    return 64 * 1024 * 1024  # conservative fallback (v7x per-TensorCore)


def _vmem_limit_bytes():
    cap = _tpu_vmem_capacity_bytes()
    return min((cap * 3) // 4, 100 * 1024 * 1024)


def _pick_block_rows(h, w, c_in_max, c_out_max, budget_bytes):
    """Largest divisor of H whose per-step working set fits the budget."""
    best = 1
    for th in range(1, h + 1):
        if h % th:
            continue
        main_b = th * w * c_in_max * 2              # bf16 main input tile
        tile_b = (th + 2) * (w + 2) * c_in_max * 2  # assembled halo tile (bf16)
        patch_b = th * w * c_in_max * 2             # transient shifted patch
        acc_b = th * w * c_out_max * 4              # f32 accumulator
        out_b = th * w * c_out_max * 2              # bf16 output tile
        total = 2 * (main_b + out_b) + tile_b + patch_b + acc_b
        if total <= budget_bytes:
            best = th
    return best


def _round_up(n, m):
    return ((n + m - 1) // m) * m


# ---------------------------------------------------------------------------
# in-kernel helpers
def _conv_body(tile, w_ref, out_ref, stats_ref):
    """3x3 conv as 9 accumulated MXU matmuls + per-tile BN partial stats.

    tile     : (TH+2, W+2, Cin)  bf16 value (zero-padded halo tile)
    w_ref    : (9, Cin, Cout)    bf16
    out_ref  : (1, TH, W, Cout)  bf16   pre-BN conv output block
    stats_ref: (1, 1, 2, Cout)   f32    [sum, sum_of_squares] of this tile
    """
    th, w, cout = out_ref.shape[1], out_ref.shape[2], out_ref.shape[3]
    cin = tile.shape[-1]
    acc = jnp.zeros((th * w, cout), jnp.float32)
    for k in range(9):
        kh, kw = divmod(k, 3)
        patch = tile[kh:kh + th, kw:kw + w, :].reshape(th * w, cin)
        acc = acc + jnp.dot(patch, w_ref[k], preferred_element_type=jnp.float32)
    out_ref[0] = acc.reshape(th, w, cout).astype(out_ref.dtype)
    ssum = jnp.sum(acc, axis=0, keepdims=True)                 # (1, Cout)
    ssq = jnp.sum(acc * acc, axis=0, keepdims=True)            # (1, Cout)
    stats_ref[0, 0] = jnp.concatenate([ssum, ssq], axis=0)     # (2, Cout)


def _assemble_halo_tile(top, main, bot):
    """Stack halo rows around the main block and add zero W-border columns."""
    body = jnp.concatenate([top, main, bot], axis=0)           # (TH+2, W, C)
    zcol = jnp.zeros((body.shape[0], 1, body.shape[2]), body.dtype)
    return jnp.concatenate([zcol, body, zcol], axis=1)         # (TH+2, W+2, C)


# ---------------------------------------------------------------------------
# kernels
def _conv1_kernel(main_ref, top_ref, bot_ref, w_ref, out_ref, stats_ref):
    """Stage 1: conv1 + per-tile BN partial stats.  Halo rows come straight
    from x; out-of-image rows are zeroed (multiply by a scalar mask)."""
    j = pl.program_id(1)
    last = pl.num_programs(1) - 1
    main = main_ref[0]                                          # (TH, W, Cin)
    top = top_ref[0] * (j > 0).astype(main.dtype)               # (1, W, Cin)
    bot = bot_ref[0] * (j < last).astype(main.dtype)
    tile = _assemble_halo_tile(top, main, bot)
    _conv_body(tile, w_ref, out_ref, stats_ref)


def _conv2_kernel(main_ref, top_ref, bot_ref, scale_ref, shift_ref, w_ref,
                  out_ref, stats_ref):
    """Stage 2 with stage-1's BN+ReLU fused in (applied to main + halo rows,
    border rows/cols zeroed AFTER the activation, matching PyTorch padding)."""
    j = pl.program_id(1)
    last = pl.num_programs(1) - 1
    scale = scale_ref[...]                                      # (1, Cmid) f32
    shift = shift_ref[...]

    def bn_relu(v):                                             # bf16 -> bf16
        y = jnp.maximum(v.astype(jnp.float32) * scale + shift, 0.0)
        return y.astype(jnp.bfloat16)

    main = bn_relu(main_ref[0])                                 # (TH, W, Cmid)
    top = bn_relu(top_ref[0]) * (j > 0).astype(jnp.bfloat16)    # (1, W, Cmid)
    bot = bn_relu(bot_ref[0]) * (j < last).astype(jnp.bfloat16)
    tile = _assemble_halo_tile(top, main, bot)
    _conv_body(tile, w_ref, out_ref, stats_ref)


def _bn_relu_kernel(raw_ref, scale_ref, shift_ref, out_ref):
    """Final pass: folded BN2 affine + ReLU, elementwise."""
    y = raw_ref[0].astype(jnp.float32) * scale_ref[...] + shift_ref[...]
    out_ref[0] = jnp.maximum(y, 0.0)


# ---------------------------------------------------------------------------
# wrapper-side passes
def _conv_pass(x, w93, th, scale=None, shift=None):
    """One gridded conv+stats pass.

    x    : (N, H, W, Cin) bf16 image in HBM (read as main block + 2 halo rows)
    w93  : (9, Cin, Cout) bf16
    Returns (raw, stats): raw (N, H, W, Cout) bf16, stats (N, nH, 2, Cout) f32.
    """
    n, h, w, cin = x.shape
    cout = w93.shape[-1]
    nh = h // th
    grid = (n, nh)

    main_spec = pl.BlockSpec((1, th, w, cin), lambda b, j: (b, j, 0, 0))
    top_spec = pl.BlockSpec(
        (1, 1, w, cin), lambda b, j: (b, jnp.maximum(j * th - 1, 0), 0, 0))
    bot_spec = pl.BlockSpec(
        (1, 1, w, cin), lambda b, j: (b, jnp.minimum((j + 1) * th, h - 1), 0, 0))
    w_spec = pl.BlockSpec(w93.shape, lambda b, j: (0, 0, 0))
    out_specs = (
        pl.BlockSpec((1, th, w, cout), lambda b, j: (b, j, 0, 0)),
        pl.BlockSpec((1, 1, 2, cout), lambda b, j: (b, j, 0, 0)),
    )
    out_shape = (
        jax.ShapeDtypeStruct((n, h, w, cout), jnp.bfloat16),
        jax.ShapeDtypeStruct((n, nh, 2, cout), jnp.float32),
    )
    cparams = pltpu.CompilerParams(
        dimension_semantics=("parallel", "parallel"),
        vmem_limit_bytes=_vmem_limit_bytes())

    if scale is None:
        return pl.pallas_call(
            _conv1_kernel, grid=grid,
            in_specs=[main_spec, top_spec, bot_spec, w_spec],
            out_specs=out_specs, out_shape=out_shape,
            compiler_params=cparams,
        )(x, x, x, w93)

    vec_spec = pl.BlockSpec(scale.shape, lambda b, j: (0, 0))
    return pl.pallas_call(
        _conv2_kernel, grid=grid,
        in_specs=[main_spec, top_spec, bot_spec, vec_spec, vec_spec, w_spec],
        out_specs=out_specs, out_shape=out_shape,
        compiler_params=cparams,
    )(x, x, x, scale, shift, w93)


def _bn_relu_pass(raw, scale, shift, th):
    n, h, w, c = raw.shape
    blk = pl.BlockSpec((1, th, w, c), lambda b, j: (b, j, 0, 0))
    vec = pl.BlockSpec(scale.shape, lambda b, j: (0, 0))
    return pl.pallas_call(
        _bn_relu_kernel, grid=(n, h // th),
        in_specs=[blk, vec, vec], out_specs=blk,
        out_shape=jax.ShapeDtypeStruct((n, h, w, c), jnp.float32),
        compiler_params=pltpu.CompilerParams(
            dimension_semantics=("parallel", "parallel"),
            vmem_limit_bytes=_vmem_limit_bytes()),
    )(raw, scale, shift)


def _finalize_stats(stats, gamma, beta, count):
    """Per-tile (sum, sumsq) -> folded BN scale/shift.  Tiny O(C) math.
    NOTE: E[x^2]-mu^2 in f32 can lose precision at very large N*H*W."""
    tot = jnp.sum(stats, axis=(0, 1))                           # (2, C)
    mu = tot[0] / count
    var = jnp.maximum(tot[1] / count - mu * mu, 0.0)
    scale = gamma * lax.rsqrt(var + EPS)
    shift = beta - mu * scale
    return (scale.reshape(1, -1).astype(jnp.float32),
            shift.reshape(1, -1).astype(jnp.float32))


def conv_block_nested_forward(x, params, block_rows=None, channels_last=False):
    """Full forward pass.

    x: (N, Cin, H, W) (or NHWC when channels_last=True) -> same layout out.
    """
    x_nhwc = x if channels_last else jnp.transpose(x, (0, 2, 3, 1))
    n, h, w, cin = x_nhwc.shape
    cmid = params["w1"].shape[-1]
    cout = params["w2"].shape[-1]
    cmid_p = _round_up(cmid, LANE)
    cout_p = _round_up(cout, LANE)

    # Pad mid/out channels to lane width; padded channels get zero weights /
    # gamma / beta so they produce exactly zero and are sliced off at the end.
    w1 = jnp.pad(params["w1"], ((0, 0), (0, 0), (0, 0), (0, cmid_p - cmid)))
    w1 = w1.reshape(9, cin, cmid_p).astype(jnp.bfloat16)
    w2 = jnp.pad(params["w2"],
                 ((0, 0), (0, 0), (0, cmid_p - cmid), (0, cout_p - cout)))
    w2 = w2.reshape(9, cmid_p, cout_p).astype(jnp.bfloat16)
    g1 = jnp.pad(params["g1"].astype(jnp.float32), (0, cmid_p - cmid))
    be1 = jnp.pad(params["be1"].astype(jnp.float32), (0, cmid_p - cmid))
    g2 = jnp.pad(params["g2"].astype(jnp.float32), (0, cout_p - cout))
    be2 = jnp.pad(params["be2"].astype(jnp.float32), (0, cout_p - cout))

    if block_rows is None:
        budget = _tpu_vmem_capacity_bytes() // 4
        block_rows = _pick_block_rows(h, w, max(cin, cmid_p),
                                      max(cmid_p, cout_p), budget)
    th = block_rows
    assert h % th == 0, (h, th)
    count = float(n * h * w)

    # ---- stage 1: conv1 + BN partial stats ---------------------------------
    # Conv bias is dropped: exactly cancelled by training-mode BN's mean
    # subtraction (b1/b2 are neither loaded nor added).
    xb = x_nhwc.astype(jnp.bfloat16)
    raw1, stats1 = _conv_pass(xb, w1, th)                 # raw1: bf16 NHWC
    scale1, shift1 = _finalize_stats(stats1, g1, be1, count)

    # ---- stage 2: BN1+ReLU fused into conv2 + BN partial stats -------------
    raw2, stats2 = _conv_pass(raw1, w2, th, scale=scale1, shift=shift1)
    scale2, shift2 = _finalize_stats(stats2, g2, be2, count)

    # ---- stage 2 pass 2: BN2 + ReLU -----------------------------------------
    y = _bn_relu_pass(raw2, scale2, shift2, th)           # (N, H, W, Cout_p) f32
    y = y[..., :cout]
    return y if channels_last else jnp.transpose(y, (0, 3, 1, 2))


# ---------------------------------------------------------------------------
# pure-JAX reference (PyTorch semantics incl. conv bias; bf16 conv operands to
# match the kernel's MXU precision, BN/ReLU math in f32).
def _ref_forward(x_nchw, params):
    x = jnp.transpose(x_nchw, (0, 2, 3, 1)).astype(jnp.float32)

    def conv(inp, w_hwio, b):
        out = lax.conv_general_dilated(
            inp.astype(jnp.bfloat16), w_hwio.astype(jnp.bfloat16),
            window_strides=(1, 1), padding=((1, 1), (1, 1)),
            dimension_numbers=("NHWC", "HWIO", "NHWC"),
            preferred_element_type=jnp.float32)
        return out + b[None, None, None, :]

    def bn_relu(y, gamma, beta):
        mu = jnp.mean(y, axis=(0, 1, 2), keepdims=True)
        var = jnp.mean((y - mu) ** 2, axis=(0, 1, 2), keepdims=True)
        yn = (y - mu) * lax.rsqrt(var + EPS) * gamma + beta
        return jnp.maximum(yn, 0.0)

    h1 = bn_relu(conv(x, params["w1"], params["b1"]), params["g1"], params["be1"])
    y = bn_relu(conv(h1, params["w2"], params["b2"]), params["g2"], params["be2"])
    return jnp.transpose(y, (0, 3, 1, 2))


if __name__ == "__main__":
    # Small shapes: batch=2, in_ch=4, mid_ch=8, out_ch=4, spatial=16x16
    N, in_ch, mid_ch, out_ch, H, W = 2, 4, 8, 4, 16, 16

    key = jax.random.PRNGKey(0)
    k_x, k_w1, k_b1, k_w2, k_b2 = jax.random.split(key, 5)

    x = jax.random.normal(k_x, (N, in_ch, H, W), dtype=jnp.float32)
    params = {
        # conv weights stored (kh, kw, Cin, Cout)
        "w1": jax.random.normal(k_w1, (3, 3, in_ch, mid_ch), jnp.float32) * 0.1,
        "b1": jax.random.normal(k_b1, (mid_ch,), jnp.float32) * 0.1,
        "g1": jnp.ones((mid_ch,), jnp.float32),    # BN gamma init (PyTorch: ones)
        "be1": jnp.zeros((mid_ch,), jnp.float32),  # BN beta init (PyTorch: zeros)
        "w2": jax.random.normal(k_w2, (3, 3, mid_ch, out_ch), jnp.float32) * 0.1,
        "b2": jax.random.normal(k_b2, (out_ch,), jnp.float32) * 0.1,
        "g2": jnp.ones((out_ch,), jnp.float32),
        "be2": jnp.zeros((out_ch,), jnp.float32),
    }

    # block_rows=8 -> grid (N=2, nH=2): exercises halo-row fetch + masking.
    fwd = jax.jit(functools.partial(conv_block_nested_forward, block_rows=8))
    out = jax.block_until_ready(fwd(x, params))
    assert out.shape == (N, out_ch, H, W), out.shape

    ref = jax.block_until_ready(_ref_forward(x, params))
    # Tolerance reflects bf16 MXU operands plus bf16 storage of the two
    # pre-BN intermediates (raw1 / raw2); residual diffs are rounding-order.
    err = float(jnp.max(jnp.abs(out - ref)))
    assert jnp.allclose(out, ref, atol=3e-2, rtol=3e-2), err

    print("KERNEL_OK")
</pallas_src>

<mosaic_0001>
module attributes {stable_mosaic.version = 11 : i64} {
  func.func @_conv1_kernel(%arg0: i32, %arg1: i32, %arg2: memref<1x8x16x4xbf16, #tpu.memory_space<vmem>>, %arg3: memref<1x1x16x4xbf16, #tpu.memory_space<vmem>>, %arg4: memref<1x1x16x4xbf16, #tpu.memory_space<vmem>>, %arg5: memref<9x4x128xbf16, #tpu.memory_space<vmem>>, %arg6: memref<1x8x16x128xbf16, #tpu.memory_space<vmem>>, %arg7: memref<1x1x2x128xf32, #tpu.memory_space<vmem>>) attributes {dimension_semantics = [#tpu.dimension_semantics<parallel>, #tpu.dimension_semantics<parallel>], iteration_bounds = array<i64: 2, 2>, scalar_prefetch = 0 : i64, scratch_operands = 0 : i64, tpu.core_type = #tpu.core_type<tc>, window_params = [{transform_indices = @transform_0, window_bounds = array<i64: 1, 8, 16, 4>}, {transform_indices = @transform_1, window_bounds = array<i64: 1, 1, 16, 4>}, {transform_indices = @transform_2, window_bounds = array<i64: 1, 1, 16, 4>}, {pipeline_mode = #tpu.pipeline_mode<synchronous>, transform_indices = @transform_3, window_bounds = array<i64: 9, 4, 128>}, {transform_indices = @transform_4, window_bounds = array<i64: 1, 8, 16, 128>}, {transform_indices = @transform_5, window_bounds = array<i64: 1, 1, 2, 128>}]} {
    %c0 = arith.constant 0 : index
    %c0_0 = arith.constant 0 : index
    %c0_1 = arith.constant 0 : index
    %c0_2 = arith.constant 0 : index
    %0 = vector.load %arg2[%c0, %c0_0, %c0_1, %c0_2] : memref<1x8x16x4xbf16, #tpu.memory_space<vmem>>, vector<1x8x16x4xbf16>
    %1 = vector.shape_cast %0 : vector<1x8x16x4xbf16> to vector<8x16x4xbf16>
    %c0_3 = arith.constant 0 : index
    %c0_4 = arith.constant 0 : index
    %c0_5 = arith.constant 0 : index
    %c0_6 = arith.constant 0 : index
    %2 = vector.load %arg3[%c0_3, %c0_4, %c0_5, %c0_6] : memref<1x1x16x4xbf16, #tpu.memory_space<vmem>>, vector<1x1x16x4xbf16>
    %3 = vector.shape_cast %2 : vector<1x1x16x4xbf16> to vector<1x16x4xbf16>
    %c0_i32 = arith.constant 0 : i32
    %4 = arith.cmpi sgt, %arg1, %c0_i32 : i32
    %5 = arith.extui %4 : i1 to i32
    %6 = arith.sitofp %5 : i32 to f32
    %7 = arith.truncf %6 : f32 to bf16
    %8 = vector.broadcast %7 : bf16 to vector<1x16x4xbf16>
    %9 = arith.mulf %3, %8 : vector<1x16x4xbf16>
    %c0_7 = arith.constant 0 : index
    %c0_8 = arith.constant 0 : index
    %c0_9 = arith.constant 0 : index
    %c0_10 = arith.constant 0 : index
    %10 = vector.load %arg4[%c0_7, %c0_8, %c0_9, %c0_10] : memref<1x1x16x4xbf16, #tpu.memory_space<vmem>>, vector<1x1x16x4xbf16>
    %11 = vector.shape_cast %10 : vector<1x1x16x4xbf16> to vector<1x16x4xbf16>
    %c1_i32 = arith.constant 1 : i32
    %12 = arith.cmpi slt, %arg1, %c1_i32 : i32
    %13 = arith.extui %12 : i1 to i32
    %14 = arith.sitofp %13 : i32 to f32
    %15 = arith.truncf %14 : f32 to bf16
    %16 = vector.broadcast %15 : bf16 to vector<1x16x4xbf16>
    %17 = arith.mulf %11, %16 : vector<1x16x4xbf16>
    %18 = tpu.concatenate %9, %1, %17 in 0 : vector<1x16x4xbf16>, vector<8x16x4xbf16>, vector<1x16x4xbf16> -> vector<10x16x4xbf16>
    %cst = arith.constant 0.000000e+00 : bf16
    %19 = vector.broadcast %cst : bf16 to vector<10x1x4xbf16>
    %20 = tpu.concatenate %19, %18, %19 in 1 : vector<10x1x4xbf16>, vector<10x16x4xbf16>, vector<10x1x4xbf16> -> vector<10x18x4xbf16>
    %cst_11 = arith.constant 0.000000e+00 : f32
    %21 = vector.broadcast %cst_11 : f32 to vector<128x128xf32>
    %22 = vector.extract_strided_slice %20 {offsets = [0, 0, 0], sizes = [8, 16, 4], strides = [1, 1, 1]} : vector<10x18x4xbf16> to vector<8x16x4xbf16>
    %23 = vector.shape_cast %22 : vector<8x16x4xbf16> to vector<128x4xbf16>
    %c0_12 = arith.constant 0 : index
    %c0_13 = arith.constant 0 : index
    %c0_14 = arith.constant 0 : index
    %24 = vector.load %arg5[%c0_12, %c0_13, %c0_14] : memref<9x4x128xbf16, #tpu.memory_space<vmem>>, vector<1x4x128xbf16>
    %25 = vector.shape_cast %24 : vector<1x4x128xbf16> to vector<4x128xbf16>
    %cst_15 = arith.constant dense<0.000000e+00> : vector<128x128xf32>
    %26 = tpu.matmul %23, %25, %cst_15 {dimension_numbers = #tpu.dot_dimension_numbers<[1], [0], [0], [1], [0, 0, 1, 1], [], []>} : vector<128x4xbf16>, vector<4x128xbf16>, vector<128x128xf32> -> vector<128x128xf32>
    %27 = arith.addf %21, %26 : vector<128x128xf32>
    %28 = vector.extract_strided_slice %20 {offsets = [0, 1, 0], sizes = [8, 16, 4], strides = [1, 1, 1]} : vector<10x18x4xbf16> to vector<8x16x4xbf16>
    %29 = vector.shape_cast %28 : vector<8x16x4xbf16> to vector<128x4xbf16>
    %c1 = arith.constant 1 : index
    %c0_16 = arith.constant 0 : index
    %c0_17 = arith.constant 0 : index
    %30 = vector.load %arg5[%c1, %c0_16, %c0_17] : memref<9x4x128xbf16, #tpu.memory_space<vmem>>, vector<1x4x128xbf16>
    %31 = vector.shape_cast %30 : vector<1x4x128xbf16> to vector<4x128xbf16>
    %cst_18 = arith.constant dense<0.000000e+00> : vector<128x128xf32>
    %32 = tpu.matmul %29, %31, %cst_18 {dimension_numbers = #tpu.dot_dimension_numbers<[1], [0], [0], [1], [0, 0, 1, 1], [], []>} : vector<128x4xbf16>, vector<4x128xbf16>, vector<128x128xf32> -> vector<128x128xf32>
    %33 = arith.addf %27, %32 : vector<128x128xf32>
    %34 = vector.extract_strided_slice %20 {offsets = [0, 2, 0], sizes = [8, 16, 4], strides = [1, 1, 1]} : vector<10x18x4xbf16> to vector<8x16x4xbf16>
    %35 = vector.shape_cast %34 : vector<8x16x4xbf16> to vector<128x4xbf16>
    %c2 = arith.constant 2 : index
    %c0_19 = arith.constant 0 : index
    %c0_20 = arith.constant 0 : index
    %36 = vector.load %arg5[%c2, %c0_19, %c0_20] : memref<9x4x128xbf16, #tpu.memory_space<vmem>>, vector<1x4x128xbf16>
    %37 = vector.shape_cast %36 : vector<1x4x128xbf16> to vector<4x128xbf16>
    %cst_21 = arith.constant dense<0.000000e+00> : vector<128x128xf32>
    %38 = tpu.matmul %35, %37, %cst_21 {dimension_numbers = #tpu.dot_dimension_numbers<[1], [0], [0], [1], [0, 0, 1, 1], [], []>} : vector<128x4xbf16>, vector<4x128xbf16>, vector<128x128xf32> -> vector<128x128xf32>
    %39 = arith.addf %33, %38 : vector<128x128xf32>
    %40 = vector.extract_strided_slice %20 {offsets = [1, 0, 0], sizes = [8, 16, 4], strides = [1, 1, 1]} : vector<10x18x4xbf16> to vector<8x16x4xbf16>
    %41 = vector.shape_cast %40 : vector<8x16x4xbf16> to vector<128x4xbf16>
    %c3 = arith.constant 3 : index
    %c0_22 = arith.constant 0 : index
    %c0_23 = arith.constant 0 : index
    %42 = vector.load %arg5[%c3, %c0_22, %c0_23] : memref<9x4x128xbf16, #tpu.memory_space<vmem>>, vector<1x4x128xbf16>
    %43 = vector.shape_cast %42 : vector<1x4x128xbf16> to vector<4x128xbf16>
    %cst_24 = arith.constant dense<0.000000e+00> : vector<128x128xf32>
    %44 = tpu.matmul %41, %43, %cst_24 {dimension_numbers = #tpu.dot_dimension_numbers<[1], [0], [0], [1], [0, 0, 1, 1], [], []>} : vector<128x4xbf16>, vector<4x128xbf16>, vector<128x128xf32> -> vector<128x128xf32>
    %45 = arith.addf %39, %44 : vector<128x128xf32>
    %46 = vector.extract_strided_slice %20 {offsets = [1, 1, 0], sizes = [8, 16, 4], strides = [1, 1, 1]} : vector<10x18x4xbf16> to vector<8x16x4xbf16>
    %47 = vector.shape_cast %46 : vector<8x16x4xbf16> to vector<128x4xbf16>
    %c4 = arith.constant 4 : index
    %c0_25 = arith.constant 0 : index
    %c0_26 = arith.constant 0 : index
    %48 = vector.load %arg5[%c4, %c0_25, %c0_26] : memref<9x4x128xbf16, #tpu.memory_space<vmem>>, vector<1x4x128xbf16>
    %49 = vector.shape_cast %48 : vector<1x4x128xbf16> to vector<4x128xbf16>
    %cst_27 = arith.constant dense<0.000000e+00> : vector<128x128xf32>
    %50 = tpu.matmul %47, %49, %cst_27 {dimension_numbers = #tpu.dot_dimension_numbers<[1], [0], [0], [1], [0, 0, 1, 1], [], []>} : vector<128x4xbf16>, vector<4x128xbf16>, vector<128x128xf32> -> vector<128x128xf32>
    %51 = arith.addf %45, %50 : vector<128x128xf32>
    %52 = vector.extract_strided_slice %20 {offsets = [1, 2, 0], sizes = [8, 16, 4], strides = [1, 1, 1]} : vector<10x18x4xbf16> to vector<8x16x4xbf16>
    %53 = vector.shape_cast %52 : vector<8x16x4xbf16> to vector<128x4xbf16>
    %c5 = arith.constant 5 : index
    %c0_28 = arith.constant 0 : index
    %c0_29 = arith.constant 0 : index
    %54 = vector.load %arg5[%c5, %c0_28, %c0_29] : memref<9x4x128xbf16, #tpu.memory_space<vmem>>, vector<1x4x128xbf16>
    %55 = vector.shape_cast %54 : vector<1x4x128xbf16> to vector<4x128xbf16>
    %cst_30 = arith.constant dense<0.000000e+00> : vector<128x128xf32>
    %56 = tpu.matmul %53, %55, %cst_30 {dimension_numbers = #tpu.dot_dimension_numbers<[1], [0], [0], [1], [0, 0, 1, 1], [], []>} : vector<128x4xbf16>, vector<4x128xbf16>, vector<128x128xf32> -> vector<128x128xf32>
    %57 = arith.addf %51, %56 : vector<128x128xf32>
    %58 = vector.extract_strided_slice %20 {offsets = [2, 0, 0], sizes = [8, 16, 4], strides = [1, 1, 1]} : vector<10x18x4xbf16> to vector<8x16x4xbf16>
    %59 = vector.shape_cast %58 : vector<8x16x4xbf16> to vector<128x4xbf16>
    %c6 = arith.constant 6 : index
    %c0_31 = arith.constant 0 : index
    %c0_32 = arith.constant 0 : index
    %60 = vector.load %arg5[%c6, %c0_31, %c0_32] : memref<9x4x128xbf16, #tpu.memory_space<vmem>>, vector<1x4x128xbf16>
    %61 = vector.shape_cast %60 : vector<1x4x128xbf16> to vector<4x128xbf16>
    %cst_33 = arith.constant dense<0.000000e+00> : vector<128x128xf32>
    %62 = tpu.matmul %59, %61, %cst_33 {dimension_numbers = #tpu.dot_dimension_numbers<[1], [0], [0], [1], [0, 0, 1, 1], [], []>} : vector<128x4xbf16>, vector<4x128xbf16>, vector<128x128xf32> -> vector<128x128xf32>
    %63 = arith.addf %57, %62 : vector<128x128xf32>
    %64 = vector.extract_strided_slice %20 {offsets = [2, 1, 0], sizes = [8, 16, 4], strides = [1, 1, 1]} : vector<10x18x4xbf16> to vector<8x16x4xbf16>
    %65 = vector.shape_cast %64 : vector<8x16x4xbf16> to vector<128x4xbf16>
    %c7 = arith.constant 7 : index
    %c0_34 = arith.constant 0 : index
    %c0_35 = arith.constant 0 : index
    %66 = vector.load %arg5[%c7, %c0_34, %c0_35] : memref<9x4x128xbf16, #tpu.memory_space<vmem>>, vector<1x4x128xbf16>
    %67 = vector.shape_cast %66 : vector<1x4x128xbf16> to vector<4x128xbf16>
    %cst_36 = arith.constant dense<0.000000e+00> : vector<128x128xf32>
    %68 = tpu.matmul %65, %67, %cst_36 {dimension_numbers = #tpu.dot_dimension_numbers<[1], [0], [0], [1], [0, 0, 1, 1], [], []>} : vector<128x4xbf16>, vector<4x128xbf16>, vector<128x128xf32> -> vector<128x128xf32>
    %69 = arith.addf %63, %68 : vector<128x128xf32>
    %70 = vector.extract_strided_slice %20 {offsets = [2, 2, 0], sizes = [8, 16, 4], strides = [1, 1, 1]} : vector<10x18x4xbf16> to vector<8x16x4xbf16>
    %71 = vector.shape_cast %70 : vector<8x16x4xbf16> to vector<128x4xbf16>
    %c8 = arith.constant 8 : index
    %c0_37 = arith.constant 0 : index
    %c0_38 = arith.constant 0 : index
    %72 = vector.load %arg5[%c8, %c0_37, %c0_38] : memref<9x4x128xbf16, #tpu.memory_space<vmem>>, vector<1x4x128xbf16>
    %73 = vector.shape_cast %72 : vector<1x4x128xbf16> to vector<4x128xbf16>
    %cst_39 = arith.constant dense<0.000000e+00> : vector<128x128xf32>
    %74 = tpu.matmul %71, %73, %cst_39 {dimension_numbers = #tpu.dot_dimension_numbers<[1], [0], [0], [1], [0, 0, 1, 1], [], []>} : vector<128x4xbf16>, vector<4x128xbf16>, vector<128x128xf32> -> vector<128x128xf32>
    %75 = arith.addf %69, %74 : vector<128x128xf32>
    %76 = vector.shape_cast %75 : vector<128x128xf32> to vector<8x16x128xf32>
    %77 = arith.truncf %76 : vector<8x16x128xf32> to vector<8x16x128xbf16>
    %c0_40 = arith.constant 0 : index
    %c0_41 = arith.constant 0 : index
    %c0_42 = arith.constant 0 : index
    %c0_43 = arith.constant 0 : index
    %78 = vector.load %arg6[%c0_40, %c0_41, %c0_42, %c0_43] : memref<1x8x16x128xbf16, #tpu.memory_space<vmem>>, vector<1x8x16x128xbf16>
    %79 = vector.shape_cast %78 : vector<1x8x16x128xbf16> to vector<8x16x128xbf16>
    %80 = vector.shape_cast %77 : vector<8x16x128xbf16> to vector<1x8x16x128xbf16>
    tpu.vector_store %arg6[%c0_40, %c0_41, %c0_42, %c0_43], %80 {strides = array<i32>} : memref<1x8x16x128xbf16, #tpu.memory_space<vmem>>, vector<1x8x16x128xbf16>,
    %cst_44 = arith.constant dense<0.000000e+00> : vector<128xf32>
    %81 = vector.multi_reduction <add>, %75, %cst_44 [0] : vector<128x128xf32> to vector<128xf32>
    %82 = vector.shape_cast %81 : vector<128xf32> to vector<1x128xf32>
    %83 = arith.mulf %75, %75 : vector<128x128xf32>
    %cst_45 = arith.constant dense<0.000000e+00> : vector<128xf32>
    %84 = vector.multi_reduction <add>, %83, %cst_45 [0] : vector<128x128xf32> to vector<128xf32>
    %85 = vector.shape_cast %84 : vector<128xf32> to vector<1x128xf32>
    %86 = tpu.concatenate %82, %85 in 0 : vector<1x128xf32>, vector<1x128xf32> -> vector<2x128xf32>
    %c0_46 = arith.constant 0 : index
    %c0_47 = arith.constant 0 : index
    %c0_48 = arith.constant 0 : index
    %c0_49 = arith.constant 0 : index
    %87 = vector.load %arg7[%c0_46, %c0_47, %c0_48, %c0_49] : memref<1x1x2x128xf32, #tpu.memory_space<vmem>>, vector<1x1x2x128xf32>
    %88 = vector.shape_cast %87 : vector<1x1x2x128xf32> to vector<2x128xf32>
    %89 = vector.shape_cast %86 : vector<2x128xf32> to vector<1x1x2x128xf32>
    tpu.vector_store %arg7[%c0_46, %c0_47, %c0_48, %c0_49], %89 {strides = array<i32>} : memref<1x1x2x128xf32, #tpu.memory_space<vmem>>, vector<1x1x2x128xf32>,
    return
  }
  func.func @transform_0(%arg0: i32, %arg1: i32) -> (i32, i32, i32, i32) {
    %c0_i32 = arith.constant 0 : i32
    %c0_i32_0 = arith.constant 0 : i32
    %c0_i32_1 = arith.constant 0 : i32
    return %arg0, %arg1, %c0_i32, %c0_i32_0 : i32, i32, i32, i32
  }
  func.func @transform_1(%arg0: i32, %arg1: i32) -> (i32, i32, i32, i32) {
    %c8_i32 = arith.constant 8 : i32
    %0 = arith.muli %arg1, %c8_i32 : i32
    %c1_i32 = arith.constant 1 : i32
    %1 = arith.subi %0, %c1_i32 : i32
    %c0_i32 = arith.constant 0 : i32
    %2 = arith.maxsi %1, %c0_i32 : i32
    %c0_i32_0 = arith.constant 0 : i32
    %c0_i32_1 = arith.constant 0 : i32
    %c0_i32_2 = arith.constant 0 : i32
    return %arg0, %2, %c0_i32_0, %c0_i32_1 : i32, i32, i32, i32
  }
  func.func @transform_2(%arg0: i32, %arg1: i32) -> (i32, i32, i32, i32) {
    %c1_i32 = arith.constant 1 : i32
    %0 = arith.addi %arg1, %c1_i32 : i32
    %c8_i32 = arith.constant 8 : i32
    %1 = arith.muli %0, %c8_i32 : i32
    %c15_i32 = arith.constant 15 : i32
    %2 = arith.minsi %1, %c15_i32 : i32
    %c0_i32 = arith.constant 0 : i32
    %c0_i32_0 = arith.constant 0 : i32
    %c0_i32_1 = arith.constant 0 : i32
    return %arg0, %2, %c0_i32, %c0_i32_0 : i32, i32, i32, i32
  }
  func.func @transform_3(%arg0: i32, %arg1: i32) -> (i32, i32, i32) {
    %c0_i32 = arith.constant 0 : i32
    %c0_i32_0 = arith.constant 0 : i32
    %c0_i32_1 = arith.constant 0 : i32
    %c0_i32_2 = arith.constant 0 : i32
    return %c0_i32, %c0_i32_0, %c0_i32_1 : i32, i32, i32
  }
  func.func @transform_4(%arg0: i32, %arg1: i32) -> (i32, i32, i32, i32) {
    %c0_i32 = arith.constant 0 : i32
    %c0_i32_0 = arith.constant 0 : i32
    %c0_i32_1 = arith.constant 0 : i32
    return %arg0, %arg1, %c0_i32, %c0_i32_0 : i32, i32, i32, i32
  }
  func.func @transform_5(%arg0: i32, %arg1: i32) -> (i32, i32, i32, i32) {
    %c0_i32 = arith.constant 0 : i32
    %c0_i32_0 = arith.constant 0 : i32
    %c0_i32_1 = arith.constant 0 : i32
    return %arg0, %arg1, %c0_i32, %c0_i32_0 : i32, i32, i32, i32
  }
}

module attributes {stable_mosaic.version = 11 : i64} {
  func.func @_conv2_kernel(%arg0: i32, %arg1: i32, %arg2: memref<1x8x16x128xbf16, #tpu.memory_space<vmem>>, %arg3: memref<1x1x16x128xbf16, #tpu.memory_space<vmem>>, %arg4: memref<1x1x16x128xbf16, #tpu.memory_space<vmem>>, %arg5: memref<1x128xf32, #tpu.memory_space<vmem>>, %arg6: memref<1x128xf32, #tpu.memory_space<vmem>>, %arg7: memref<9x128x128xbf16, #tpu.memory_space<vmem>>, %arg8: memref<1x8x16x128xbf16, #tpu.memory_space<vmem>>, %arg9: memref<1x1x2x128xf32, #tpu.memory_space<vmem>>) attributes {dimension_semantics = [#tpu.dimension_semantics<parallel>, #tpu.dimension_semantics<parallel>], iteration_bounds = array<i64: 2, 2>, scalar_prefetch = 0 : i64, scratch_operands = 0 : i64, tpu.core_type = #tpu.core_type<tc>, window_params = [{transform_indices = @transform_0, window_bounds = array<i64: 1, 8, 16, 128>}, {transform_indices = @transform_1, window_bounds = array<i64: 1, 1, 16, 128>}, {transform_indices = @transform_2, window_bounds = array<i64: 1, 1, 16, 128>}, {pipeline_mode = #tpu.pipeline_mode<synchronous>, transform_indices = @transform_3, window_bounds = array<i64: 1, 128>}, {pipeline_mode = #tpu.pipeline_mode<synchronous>, transform_indices = @transform_4, window_bounds = array<i64: 1, 128>}, {pipeline_mode = #tpu.pipeline_mode<synchronous>, transform_indices = @transform_5, window_bounds = array<i64: 9, 128, 128>}, {transform_indices = @transform_6, window_bounds = array<i64: 1, 8, 16, 128>}, {transform_indices = @transform_7, window_bounds = array<i64: 1, 1, 2, 128>}]} {
    %c0 = arith.constant 0 : index
    %c0_0 = arith.constant 0 : index
    %0 = vector.load %arg5[%c0, %c0_0] : memref<1x128xf32, #tpu.memory_space<vmem>>, vector<1x128xf32>
    %c0_1 = arith.constant 0 : index
    %c0_2 = arith.constant 0 : index
    %1 = vector.load %arg6[%c0_1, %c0_2] : memref<1x128xf32, #tpu.memory_space<vmem>>, vector<1x128xf32>
    %c0_3 = arith.constant 0 : index
    %c0_4 = arith.constant 0 : index
    %c0_5 = arith.constant 0 : index
    %c0_6 = arith.constant 0 : index
    %2 = vector.load %arg2[%c0_3, %c0_4, %c0_5, %c0_6] : memref<1x8x16x128xbf16, #tpu.memory_space<vmem>>, vector<1x8x16x128xbf16>
    %3 = vector.shape_cast %2 : vector<1x8x16x128xbf16> to vector<8x16x128xbf16>
    %4 = arith.extf %3 : vector<8x16x128xbf16> to vector<8x16x128xf32>
    %5 = vector.shape_cast %0 : vector<1x128xf32> to vector<1x1x128xf32>
    %6 = vector.broadcast %5 : vector<1x1x128xf32> to vector<8x16x128xf32>
    %7 = arith.mulf %4, %6 : vector<8x16x128xf32>
    %8 = vector.shape_cast %1 : vector<1x128xf32> to vector<1x1x128xf32>
    %9 = vector.broadcast %8 : vector<1x1x128xf32> to vector<8x16x128xf32>
    %10 = arith.addf %7, %9 : vector<8x16x128xf32>
    %cst = arith.constant 0.000000e+00 : f32
    %11 = vector.broadcast %cst : f32 to vector<8x16x128xf32>
    %12 = arith.maximumf %10, %11 : vector<8x16x128xf32>
    %13 = arith.truncf %12 : vector<8x16x128xf32> to vector<8x16x128xbf16>
    %c0_7 = arith.constant 0 : index
    %c0_8 = arith.constant 0 : index
    %c0_9 = arith.constant 0 : index
    %c0_10 = arith.constant 0 : index
    %14 = vector.load %arg3[%c0_7, %c0_8, %c0_9, %c0_10] : memref<1x1x16x128xbf16, #tpu.memory_space<vmem>>, vector<1x1x16x128xbf16>
    %15 = vector.shape_cast %14 : vector<1x1x16x128xbf16> to vector<1x16x128xbf16>
    %16 = arith.extf %15 : vector<1x16x128xbf16> to vector<1x16x128xf32>
    %17 = vector.shape_cast %0 : vector<1x128xf32> to vector<1x1x128xf32>
    %18 = vector.broadcast %17 : vector<1x1x128xf32> to vector<1x16x128xf32>
    %19 = arith.mulf %16, %18 : vector<1x16x128xf32>
    %20 = vector.shape_cast %1 : vector<1x128xf32> to vector<1x1x128xf32>
    %21 = vector.broadcast %20 : vector<1x1x128xf32> to vector<1x16x128xf32>
    %22 = arith.addf %19, %21 : vector<1x16x128xf32>
    %cst_11 = arith.constant 0.000000e+00 : f32
    %23 = vector.broadcast %cst_11 : f32 to vector<1x16x128xf32>
    %24 = arith.maximumf %22, %23 : vector<1x16x128xf32>
    %25 = arith.truncf %24 : vector<1x16x128xf32> to vector<1x16x128xbf16>
    %c0_i32 = arith.constant 0 : i32
    %26 = arith.cmpi sgt, %arg1, %c0_i32 : i32
    %27 = arith.extui %26 : i1 to i32
    %28 = arith.sitofp %27 : i32 to f32
    %29 = arith.truncf %28 : f32 to bf16
    %30 = vector.broadcast %29 : bf16 to vector<1x16x128xbf16>
    %31 = arith.mulf %25, %30 : vector<1x16x128xbf16>
    %c0_12 = arith.constant 0 : index
    %c0_13 = arith.constant 0 : index
    %c0_14 = arith.constant 0 : index
    %c0_15 = arith.constant 0 : index
    %32 = vector.load %arg4[%c0_12, %c0_13, %c0_14, %c0_15] : memref<1x1x16x128xbf16, #tpu.memory_space<vmem>>, vector<1x1x16x128xbf16>
    %33 = vector.shape_cast %32 : vector<1x1x16x128xbf16> to vector<1x16x128xbf16>
    %34 = arith.extf %33 : vector<1x16x128xbf16> to vector<1x16x128xf32>
    %35 = vector.shape_cast %0 : vector<1x128xf32> to vector<1x1x128xf32>
    %36 = vector.broadcast %35 : vector<1x1x128xf32> to vector<1x16x128xf32>
    %37 = arith.mulf %34, %36 : vector<1x16x128xf32>
    %38 = vector.shape_cast %1 : vector<1x128xf32> to vector<1x1x128xf32>
    %39 = vector.broadcast %38 : vector<1x1x128xf32> to vector<1x16x128xf32>
    %40 = arith.addf %37, %39 : vector<1x16x128xf32>
    %cst_16 = arith.constant 0.000000e+00 : f32
    %41 = vector.broadcast %cst_16 : f32 to vector<1x16x128xf32>
    %42 = arith.maximumf %40, %41 : vector<1x16x128xf32>
    %43 = arith.truncf %42 : vector<1x16x128xf32> to vector<1x16x128xbf16>
    %c1_i32 = arith.constant 1 : i32
    %44 = arith.cmpi slt, %arg1, %c1_i32 : i32
    %45 = arith.extui %44 : i1 to i32
    %46 = arith.sitofp %45 : i32 to f32
    %47 = arith.truncf %46 : f32 to bf16
    %48 = vector.broadcast %47 : bf16 to vector<1x16x128xbf16>
    %49 = arith.mulf %43, %48 : vector<1x16x128xbf16>
    %50 = tpu.concatenate %31, %13, %49 in 0 : vector<1x16x128xbf16>, vector<8x16x128xbf16>, vector<1x16x128xbf16> -> vector<10x16x128xbf16>
    %cst_17 = arith.constant 0.000000e+00 : bf16
    %51 = vector.broadcast %cst_17 : bf16 to vector<10x1x128xbf16>
    %52 = tpu.concatenate %51, %50, %51 in 1 : vector<10x1x128xbf16>, vector<10x16x128xbf16>, vector<10x1x128xbf16> -> vector<10x18x128xbf16>
    %cst_18 = arith.constant 0.000000e+00 : f32
    %53 = vector.broadcast %cst_18 : f32 to vector<128x128xf32>
    %54 = vector.extract_strided_slice %52 {offsets = [0, 0, 0], sizes = [8, 16, 128], strides = [1, 1, 1]} : vector<10x18x128xbf16> to vector<8x16x128xbf16>
    %55 = vector.shape_cast %54 : vector<8x16x128xbf16> to vector<128x128xbf16>
    %c0_19 = arith.constant 0 : index
    %c0_20 = arith.constant 0 : index
    %c0_21 = arith.constant 0 : index
    %56 = vector.load %arg7[%c0_19, %c0_20, %c0_21] : memref<9x128x128xbf16, #tpu.memory_space<vmem>>, vector<1x128x128xbf16>
    %57 = vector.shape_cast %56 : vector<1x128x128xbf16> to vector<128x128xbf16>
    %cst_22 = arith.constant dense<0.000000e+00> : vector<128x128xf32>
    %58 = tpu.matmul %55, %57, %cst_22 {dimension_numbers = #tpu.dot_dimension_numbers<[1], [0], [0], [1], [0, 0, 1, 1], [], []>} : vector<128x128xbf16>, vector<128x128xbf16>, vector<128x128xf32> -> vector<128x128xf32>
    %59 = arith.addf %53, %58 : vector<128x128xf32>
    %60 = vector.extract_strided_slice %52 {offsets = [0, 1, 0], sizes = [8, 16, 128], strides = [1, 1, 1]} : vector<10x18x128xbf16> to vector<8x16x128xbf16>
    %61 = vector.shape_cast %60 : vector<8x16x128xbf16> to vector<128x128xbf16>
    %c1 = arith.constant 1 : index
    %c0_23 = arith.constant 0 : index
    %c0_24 = arith.constant 0 : index
    %62 = vector.load %arg7[%c1, %c0_23, %c0_24] : memref<9x128x128xbf16, #tpu.memory_space<vmem>>, vector<1x128x128xbf16>
    %63 = vector.shape_cast %62 : vector<1x128x128xbf16> to vector<128x128xbf16>
    %cst_25 = arith.constant dense<0.000000e+00> : vector<128x128xf32>
    %64 = tpu.matmul %61, %63, %cst_25 {dimension_numbers = #tpu.dot_dimension_numbers<[1], [0], [0], [1], [0, 0, 1, 1], [], []>} : vector<128x128xbf16>, vector<128x128xbf16>, vector<128x128xf32> -> vector<128x128xf32>
    %65 = arith.addf %59, %64 : vector<128x128xf32>
    %66 = vector.extract_strided_slice %52 {offsets = [0, 2, 0], sizes = [8, 16, 128], strides = [1, 1, 1]} : vector<10x18x128xbf16> to vector<8x16x128xbf16>
    %67 = vector.shape_cast %66 : vector<8x16x128xbf16> to vector<128x128xbf16>
    %c2 = arith.constant 2 : index
    %c0_26 = arith.constant 0 : index
    %c0_27 = arith.constant 0 : index
    %68 = vector.load %arg7[%c2, %c0_26, %c0_27] : memref<9x128x128xbf16, #tpu.memory_space<vmem>>, vector<1x128x128xbf16>
    %69 = vector.shape_cast %68 : vector<1x128x128xbf16> to vector<128x128xbf16>
    %cst_28 = arith.constant dense<0.000000e+00> : vector<128x128xf32>
    %70 = tpu.matmul %67, %69, %cst_28 {dimension_numbers = #tpu.dot_dimension_numbers<[1], [0], [0], [1], [0, 0, 1, 1], [], []>} : vector<128x128xbf16>, vector<128x128xbf16>, vector<128x128xf32> -> vector<128x128xf32>
    %71 = arith.addf %65, %70 : vector<128x128xf32>
    %72 = vector.extract_strided_slice %52 {offsets = [1, 0, 0], sizes = [8, 16, 128], strides = [1, 1, 1]} : vector<10x18x128xbf16> to vector<8x16x128xbf16>
    %73 = vector.shape_cast %72 : vector<8x16x128xbf16> to vector<128x128xbf16>
    %c3 = arith.constant 3 : index
    %c0_29 = arith.constant 0 : index
    %c0_30 = arith.constant 0 : index
    %74 = vector.load %arg7[%c3, %c0_29, %c0_30] : memref<9x128x128xbf16, #tpu.memory_space<vmem>>, vector<1x128x128xbf16>
    %75 = vector.shape_cast %74 : vector<1x128x128xbf16> to vector<128x128xbf16>
    %cst_31 = arith.constant dense<0.000000e+00> : vector<128x128xf32>
    %76 = tpu.matmul %73, %75, %cst_31 {dimension_numbers = #tpu.dot_dimension_numbers<[1], [0], [0], [1], [0, 0, 1, 1], [], []>} : vector<128x128xbf16>, vector<128x128xbf16>, vector<128x128xf32> -> vector<128x128xf32>
    %77 = arith.addf %71, %76 : vector<128x128xf32>
    %78 = vector.extract_strided_slice %52 {offsets = [1, 1, 0], sizes = [8, 16, 128], strides = [1, 1, 1]} : vector<10x18x128xbf16> to vector<8x16x128xbf16>
    %79 = vector.shape_cast %78 : vector<8x16x128xbf16> to vector<128x128xbf16>
    %c4 = arith.constant 4 : index
    %c0_32 = arith.constant 0 : index
    %c0_33 = arith.constant 0 : index
    %80 = vector.load %arg7[%c4, %c0_32, %c0_33] : memref<9x128x128xbf16, #tpu.memory_space<vmem>>, vector<1x128x128xbf16>
    %81 = vector.shape_cast %80 : vector<1x128x128xbf16> to vector<128x128xbf16>
    %cst_34 = arith.constant dense<0.000000e+00> : vector<128x128xf32>
    %82 = tpu.matmul %79, %81, %cst_34 {dimension_numbers = #tpu.dot_dimension_numbers<[1], [0], [0], [1], [0, 0, 1, 1], [], []>} : vector<128x128xbf16>, vector<128x128xbf16>, vector<128x128xf32> -> vector<128x128xf32>
    %83 = arith.addf %77, %82 : vector<128x128xf32>
    %84 = vector.extract_strided_slice %52 {offsets = [1, 2, 0], sizes = [8, 16, 128], strides = [1, 1, 1]} : vector<10x18x128xbf16> to vector<8x16x128xbf16>
    %85 = vector.shape_cast %84 : vector<8x16x128xbf16> to vector<128x128xbf16>
    %c5 = arith.constant 5 : index
    %c0_35 = arith.constant 0 : index
    %c0_36 = arith.constant 0 : index
    %86 = vector.load %arg7[%c5, %c0_35, %c0_36] : memref<9x128x128xbf16, #tpu.memory_space<vmem>>, vector<1x128x128xbf16>
    %87 = vector.shape_cast %86 : vector<1x128x128xbf16> to vector<128x128xbf16>
    %cst_37 = arith.constant dense<0.000000e+00> : vector<128x128xf32>
    %88 = tpu.matmul %85, %87, %cst_37 {dimension_numbers = #tpu.dot_dimension_numbers<[1], [0], [0], [1], [0, 0, 1, 1], [], []>} : vector<128x128xbf16>, vector<128x128xbf16>, vector<128x128xf32> -> vector<128x128xf32>
    %89 = arith.addf %83, %88 : vector<128x128xf32>
    %90 = vector.extract_strided_slice %52 {offsets = [2, 0, 0], sizes = [8, 16, 128], strides = [1, 1, 1]} : vector<10x18x128xbf16> to vector<8x16x128xbf16>
    %91 = vector.shape_cast %90 : vector<8x16x128xbf16> to vector<128x128xbf16>
    %c6 = arith.constant 6 : index
    %c0_38 = arith.constant 0 : index
    %c0_39 = arith.constant 0 : index
    %92 = vector.load %arg7[%c6, %c0_38, %c0_39] : memref<9x128x128xbf16, #tpu.memory_space<vmem>>, vector<1x128x128xbf16>
    %93 = vector.shape_cast %92 : vector<1x128x128xbf16> to vector<128x128xbf16>
    %cst_40 = arith.constant dense<0.000000e+00> : vector<128x128xf32>
    %94 = tpu.matmul %91, %93, %cst_40 {dimension_numbers = #tpu.dot_dimension_numbers<[1], [0], [0], [1], [0, 0, 1, 1], [], []>} : vector<128x128xbf16>, vector<128x128xbf16>, vector<128x128xf32> -> vector<128x128xf32>
    %95 = arith.addf %89, %94 : vector<128x128xf32>
    %96 = vector.extract_strided_slice %52 {offsets = [2, 1, 0], sizes = [8, 16, 128], strides = [1, 1, 1]} : vector<10x18x128xbf16> to vector<8x16x128xbf16>
    %97 = vector.shape_cast %96 : vector<8x16x128xbf16> to vector<128x128xbf16>
    %c7 = arith.constant 7 : index
    %c0_41 = arith.constant 0 : index
    %c0_42 = arith.constant 0 : index
    %98 = vector.load %arg7[%c7, %c0_41, %c0_42] : memref<9x128x128xbf16, #tpu.memory_space<vmem>>, vector<1x128x128xbf16>
    %99 = vector.shape_cast %98 : vector<1x128x128xbf16> to vector<128x128xbf16>
    %cst_43 = arith.constant dense<0.000000e+00> : vector<128x128xf32>
    %100 = tpu.matmul %97, %99, %cst_43 {dimension_numbers = #tpu.dot_dimension_numbers<[1], [0], [0], [1], [0, 0, 1, 1], [], []>} : vector<128x128xbf16>, vector<128x128xbf16>, vector<128x128xf32> -> vector<128x128xf32>
    %101 = arith.addf %95, %100 : vector<128x128xf32>
    %102 = vector.extract_strided_slice %52 {offsets = [2, 2, 0], sizes = [8, 16, 128], strides = [1, 1, 1]} : vector<10x18x128xbf16> to vector<8x16x128xbf16>
    %103 = vector.shape_cast %102 : vector<8x16x128xbf16> to vector<128x128xbf16>
    %c8 = arith.constant 8 : index
    %c0_44 = arith.constant 0 : index
    %c0_45 = arith.constant 0 : index
    %104 = vector.load %arg7[%c8, %c0_44, %c0_45] : memref<9x128x128xbf16, #tpu.memory_space<vmem>>, vector<1x128x128xbf16>
    %105 = vector.shape_cast %104 : vector<1x128x128xbf16> to vector<128x128xbf16>
    %cst_46 = arith.constant dense<0.000000e+00> : vector<128x128xf32>
    %106 = tpu.matmul %103, %105, %cst_46 {dimension_numbers = #tpu.dot_dimension_numbers<[1], [0], [0], [1], [0, 0, 1, 1], [], []>} : vector<128x128xbf16>, vector<128x128xbf16>, vector<128x128xf32> -> vector<128x128xf32>
    %107 = arith.addf %101, %106 : vector<128x128xf32>
    %108 = vector.shape_cast %107 : vector<128x128xf32> to vector<8x16x128xf32>
    %109 = arith.truncf %108 : vector<8x16x128xf32> to vector<8x16x128xbf16>
    %c0_47 = arith.constant 0 : index
    %c0_48 = arith.constant 0 : index
    %c0_49 = arith.constant 0 : index
    %c0_50 = arith.constant 0 : index
    %110 = vector.load %arg8[%c0_47, %c0_48, %c0_49, %c0_50] : memref<1x8x16x128xbf16, #tpu.memory_space<vmem>>, vector<1x8x16x128xbf16>
    %111 = vector.shape_cast %110 : vector<1x8x16x128xbf16> to vector<8x16x128xbf16>
    %112 = vector.shape_cast %109 : vector<8x16x128xbf16> to vector<1x8x16x128xbf16>
    tpu.vector_store %arg8[%c0_47, %c0_48, %c0_49, %c0_50], %112 {strides = array<i32>} : memref<1x8x16x128xbf16, #tpu.memory_space<vmem>>, vector<1x8x16x128xbf16>,
    %cst_51 = arith.constant dense<0.000000e+00> : vector<128xf32>
    %113 = vector.multi_reduction <add>, %107, %cst_51 [0] : vector<128x128xf32> to vector<128xf32>
    %114 = vector.shape_cast %113 : vector<128xf32> to vector<1x128xf32>
    %115 = arith.mulf %107, %107 : vector<128x128xf32>
    %cst_52 = arith.constant dense<0.000000e+00> : vector<128xf32>
    %116 = vector.multi_reduction <add>, %115, %cst_52 [0] : vector<128x128xf32> to vector<128xf32>
    %117 = vector.shape_cast %116 : vector<128xf32> to vector<1x128xf32>
    %118 = tpu.concatenate %114, %117 in 0 : vector<1x128xf32>, vector<1x128xf32> -> vector<2x128xf32>
    %c0_53 = arith.constant 0 : index
    %c0_54 = arith.constant 0 : index
    %c0_55 = arith.constant 0 : index
    %c0_56 = arith.constant 0 : index
    %119 = vector.load %arg9[%c0_53, %c0_54, %c0_55, %c0_56] : memref<1x1x2x128xf32, #tpu.memory_space<vmem>>, vector<1x1x2x128xf32>
    %120 = vector.shape_cast %119 : vector<1x1x2x128xf32> to vector<2x128xf32>
    %121 = vector.shape_cast %118 : vector<2x128xf32> to vector<1x1x2x128xf32>
    tpu.vector_store %arg9[%c0_53, %c0_54, %c0_55, %c0_56], %121 {strides = array<i32>} : memref<1x1x2x128xf32, #tpu.memory_space<vmem>>, vector<1x1x2x128xf32>,
    return
  }
  func.func @transform_0(%arg0: i32, %arg1: i32) -> (i32, i32, i32, i32) {
    %c0_i32 = arith.constant 0 : i32
    %c0_i32_0 = arith.constant 0 : i32
    %c0_i32_1 = arith.constant 0 : i32
    return %arg0, %arg1, %c0_i32, %c0_i32_0 : i32, i32, i32, i32
  }
  func.func @transform_1(%arg0: i32, %arg1: i32) -> (i32, i32, i32, i32) {
    %c8_i32 = arith.constant 8 : i32
    %0 = arith.muli %arg1, %c8_i32 : i32
    %c1_i32 = arith.constant 1 : i32
    %1 = arith.subi %0, %c1_i32 : i32
    %c0_i32 = arith.constant 0 : i32
    %2 = arith.maxsi %1, %c0_i32 : i32
    %c0_i32_0 = arith.constant 0 : i32
    %c0_i32_1 = arith.constant 0 : i32
    %c0_i32_2 = arith.constant 0 : i32
    return %arg0, %2, %c0_i32_0, %c0_i32_1 : i32, i32, i32, i32
  }
  func.func @transform_2(%arg0: i32, %arg1: i32) -> (i32, i32, i32, i32) {
    %c1_i32 = arith.constant 1 : i32
    %0 = arith.addi %arg1, %c1_i32 : i32
    %c8_i32 = arith.constant 8 : i32
    %1 = arith.muli %0, %c8_i32 : i32
    %c15_i32 = arith.constant 15 : i32
    %2 = arith.minsi %1, %c15_i32 : i32
    %c0_i32 = arith.constant 0 : i32
    %c0_i32_0 = arith.constant 0 : i32
    %c0_i32_1 = arith.constant 0 : i32
    return %arg0, %2, %c0_i32, %c0_i32_0 : i32, i32, i32, i32
  }
  func.func @transform_3(%arg0: i32, %arg1: i32) -> (i32, i32) {
    %c0_i32 = arith.constant 0 : i32
    %c0_i32_0 = arith.constant 0 : i32
    %c0_i32_1 = arith.constant 0 : i32
    return %c0_i32, %c0_i32_0 : i32, i32
  }
  func.func @transform_4(%arg0: i32, %arg1: i32) -> (i32, i32) {
    %c0_i32 = arith.constant 0 : i32
    %c0_i32_0 = arith.constant 0 : i32
    %c0_i32_1 = arith.constant 0 : i32
    return %c0_i32, %c0_i32_0 : i32, i32
  }
  func.func @transform_5(%arg0: i32, %arg1: i32) -> (i32, i32, i32) {
    %c0_i32 = arith.constant 0 : i32
    %c0_i32_0 = arith.constant 0 : i32
    %c0_i32_1 = arith.constant 0 : i32
    %c0_i32_2 = arith.constant 0 : i32
    return %c0_i32, %c0_i32_0, %c0_i32_1 : i32, i32, i32
  }
  func.func @transform_6(%arg0: i32, %arg1: i32) -> (i32, i32, i32, i32) {
    %c0_i32 = arith.constant 0 : i32
    %c0_i32_0 = arith.constant 0 : i32
    %c0_i32_1 = arith.constant 0 : i32
    return %arg0, %arg1, %c0_i32, %c0_i32_0 : i32, i32, i32, i32
  }
  func.func @transform_7(%arg0: i32, %arg1: i32) -> (i32, i32, i32, i32) {
    %c0_i32 = arith.constant 0 : i32
    %c0_i32_0 = arith.constant 0 : i32
    %c0_i32_1 = arith.constant 0 : i32
    return %arg0, %arg1, %c0_i32, %c0_i32_0 : i32, i32, i32, i32
  }
}

module attributes {stable_mosaic.version = 11 : i64} {
  func.func @_bn_relu_kernel(%arg0: i32, %arg1: i32, %arg2: memref<1x8x16x128xbf16, #tpu.memory_space<vmem>>, %arg3: memref<1x128xf32, #tpu.memory_space<vmem>>, %arg4: memref<1x128xf32, #tpu.memory_space<vmem>>, %arg5: memref<1x8x16x128xf32, #tpu.memory_space<vmem>>) attributes {dimension_semantics = [#tpu.dimension_semantics<parallel>, #tpu.dimension_semantics<parallel>], iteration_bounds = array<i64: 2, 2>, scalar_prefetch = 0 : i64, scratch_operands = 0 : i64, tpu.core_type = #tpu.core_type<tc>, window_params = [{transform_indices = @transform_0, window_bounds = array<i64: 1, 8, 16, 128>}, {pipeline_mode = #tpu.pipeline_mode<synchronous>, transform_indices = @transform_1, window_bounds = array<i64: 1, 128>}, {pipeline_mode = #tpu.pipeline_mode<synchronous>, transform_indices = @transform_2, window_bounds = array<i64: 1, 128>}, {transform_indices = @transform_3, window_bounds = array<i64: 1, 8, 16, 128>}]} {
    %c0 = arith.constant 0 : index
    %c0_0 = arith.constant 0 : index
    %c0_1 = arith.constant 0 : index
    %c0_2 = arith.constant 0 : index
    %0 = vector.load %arg2[%c0, %c0_0, %c0_1, %c0_2] : memref<1x8x16x128xbf16, #tpu.memory_space<vmem>>, vector<1x8x16x128xbf16>
    %1 = vector.shape_cast %0 : vector<1x8x16x128xbf16> to vector<8x16x128xbf16>
    %2 = arith.extf %1 : vector<8x16x128xbf16> to vector<8x16x128xf32>
    %c0_3 = arith.constant 0 : index
    %c0_4 = arith.constant 0 : index
    %3 = vector.load %arg3[%c0_3, %c0_4] : memref<1x128xf32, #tpu.memory_space<vmem>>, vector<1x128xf32>
    %4 = vector.shape_cast %3 : vector<1x128xf32> to vector<1x1x128xf32>
    %5 = vector.broadcast %4 : vector<1x1x128xf32> to vector<8x16x128xf32>
    %6 = arith.mulf %2, %5 : vector<8x16x128xf32>
    %c0_5 = arith.constant 0 : index
    %c0_6 = arith.constant 0 : index
    %7 = vector.load %arg4[%c0_5, %c0_6] : memref<1x128xf32, #tpu.memory_space<vmem>>, vector<1x128xf32>
    %8 = vector.shape_cast %7 : vector<1x128xf32> to vector<1x1x128xf32>
    %9 = vector.broadcast %8 : vector<1x1x128xf32> to vector<8x16x128xf32>
    %10 = arith.addf %6, %9 : vector<8x16x128xf32>
    %cst = arith.constant 0.000000e+00 : f32
    %11 = vector.broadcast %cst : f32 to vector<8x16x128xf32>
    %12 = arith.maximumf %10, %11 : vector<8x16x128xf32>
    %c0_7 = arith.constant 0 : index
    %c0_8 = arith.constant 0 : index
    %c0_9 = arith.constant 0 : index
    %c0_10 = arith.constant 0 : index
    %13 = vector.load %arg5[%c0_7, %c0_8, %c0_9, %c0_10] : memref<1x8x16x128xf32, #tpu.memory_space<vmem>>, vector<1x8x16x128xf32>
    %14 = vector.shape_cast %13 : vector<1x8x16x128xf32> to vector<8x16x128xf32>
    %15 = vector.shape_cast %12 : vector<8x16x128xf32> to vector<1x8x16x128xf32>
    tpu.vector_store %arg5[%c0_7, %c0_8, %c0_9, %c0_10], %15 {strides = array<i32>} : memref<1x8x16x128xf32, #tpu.memory_space<vmem>>, vector<1x8x16x128xf32>,
    return
  }
  func.func @transform_0(%arg0: i32, %arg1: i32) -> (i32, i32, i32, i32) {
    %c0_i32 = arith.constant 0 : i32
    %c0_i32_0 = arith.constant 0 : i32
    %c0_i32_1 = arith.constant 0 : i32
    return %arg0, %arg1, %c0_i32, %c0_i32_0 : i32, i32, i32, i32
  }
  func.func @transform_1(%arg0: i32, %arg1: i32) -> (i32, i32) {
    %c0_i32 = arith.constant 0 : i32
    %c0_i32_0 = arith.constant 0 : i32
    %c0_i32_1 = arith.constant 0 : i32
    return %c0_i32, %c0_i32_0 : i32, i32
  }
  func.func @transform_2(%arg0: i32, %arg1: i32) -> (i32, i32) {
    %c0_i32 = arith.constant 0 : i32
    %c0_i32_0 = arith.constant 0 : i32
    %c0_i32_1 = arith.constant 0 : i32
    return %c0_i32, %c0_i32_0 : i32, i32
  }
  func.func @transform_3(%arg0: i32, %arg1: i32) -> (i32, i32, i32, i32) {
    %c0_i32 = arith.constant 0 : i32
    %c0_i32_0 = arith.constant 0 : i32
    %c0_i32_1 = arith.constant 0 : i32
    return %arg0, %arg1, %c0_i32, %c0_i32_0 : i32, i32, i32, i32
  }
}

</mosaic_0001>

<bundles_post_ra>
// kernel: conv_block_nested_forward.5
= control target key start
LH: loop header
LB: loop body
LE: loop exit
PB: predicated region body
PF: predicated region fallthrough
CT: control target
= control target key end

     0   :  { %s580_s12 = smov 0   ;;  %s582_s13 = smov 0   ;;  %s705_s0 = inlined_call_operand.vmem [shape: bf16[2,16,16,128], index: 0, kind: input, shape index: {}]   ;;  %s706_s1 = inlined_call_operand.vmem [shape: f32[1,128], index: 1, kind: input, shape index: {}]   ;;  %s707_s2 = inlined_call_operand.vmem [shape: f32[1,128], index: 2, kind: input, shape index: {}]   ;;  %s708_s3 = inlined_call_operand.vmem [shape: f32[2,16,16,128], index: 3, kind: output, shape index: {}]  }
   0x1   :  { %s584_s14 = smov 0   ;;  %s586_s15 = smov 0  }
   0x2   :  { %s588_s16 = smov 0  }
   0x3 LB: > { %s22_s17 = sadd.s32 1, %s550_s14  ;;  %s25_s18 = sadd.s32 1, %s554_s15  ;;  %s558_s16 = sphi %s588_s16, %s13_s16   ;;  %s554_s15 = sphi %s586_s15, %s712_s15   ;;  %s550_s14 = sphi %s584_s14, %s711_s14   ;;  %s546_s13 = sphi %s582_s13, %s710_s13   ;;  %s542_s12 = sphi %s580_s12, %s709_s12  }
   0x4   : > { %p23_p0 = scmp.ge.s32.totalorder %s22_s17, 2  ;;  %p428_p1 = scmp.ge.s32.totalorder %s558_s16, 1 }
   0x5   : > { %p159_p2 = scmp.lt.s32.totalorder %s558_s16, 5 }
   0x6   : > { %s714_s17 = smov (%p23_p0, %s22_s17), 0  ;;  %s716_s18 = smov (!%p23_p0, %s25_s18), %s554_s15 }
   0x7   : > { %p160_p3 = pnand %p428_p1, %p159_p2  ;;  %p27_p4 = scmp.ge.s32.totalorder %s716_s18, 2 }
   0x8   : > { %s429_s19 = sshll.u32 (!%p160_p3), %s542_s12, 3  ;;  %p194_p5 = scmp.lt.s32.totalorder (!%p160_p3), %s546_s13, 1 }
   0x9   : > { %s718_s18 = smov (%p27_p4, %s716_s18), 0  ;;  %163 = sbr.rel (%p160_p3) target bundleno = 40 (0x28), region = 32 }
   0xa   : > { %p196_p6 = scmp.lt.s32.totalorder (!%p160_p3), %s429_s19, 15 }
   0xe   : > { %s720_s13 = smov (!%p194_p5, %s546_s13), 1  ;;  %s722_s19 = smov (!%p196_p6, %s429_s19), 15  ;;  %v621_v0 = vld [vmem:[%s706_s1] ss:$0 sm:$0xff] }
   0xf   : > { %s431_s20 = sshll.u32 %s720_s13, 5  ;;  %s430_s21 = sshll.u32 %s722_s19, 1  ;;  %v630_v9 = vld [vmem:[%s707_s2] ss:$0 sm:$0xff] }
  0x10   : > { %s610_s22 = sadd.s32 %s431_s20, %s430_s21 }
  0x11   : > { %s432_s23 = sshll.u32 %s610_s22, 2  ;;  %s436_s4 = sshll.u32 %s610_s22, 3 }
  0x12   : > { %s616_s26 = scalar_lea.vmem %s705_s0, %s432_s23  ;;  %s648_s7 = scalar_lea.vmem %s708_s3, %s436_s4 }
  0x13   : > { %v442_v1 = vld [vmem:[%s616_s26] sm:$0xff]   ;;  %v473_v2 = vld [vmem:[%s616_s26 + $0x8] sm:$0xff]   ;;  %v474_v3 = vld [vmem:[%s616_s26 + $0x10] sm:$0xff]  }
  0x14   : > { %v443_v4 = vunpack.c.l.bf16 %v442_v1  ;;  %v444_v5 = vunpack.c.h.bf16 %v442_v1  ;;  %v447_v6 = vunpack.c.l.bf16 %v473_v2  ;;  %v448_v7 = vunpack.c.h.bf16 %v473_v2  ;;  %v475_v8 = vld [vmem:[%s616_s26 + $0x18] sm:$0xff]   ;;  %v476_v30 = vld [vmem:[%s616_s26 + $0x20] sm:$0xff]   ;;  %v477_v31 = vld [vmem:[%s616_s26 + $0x28] sm:$0xff]  }
  0x15   : > { %v451_v10 = vunpack.c.l.bf16 %v474_v3  ;;  %v452_v11 = vunpack.c.h.bf16 %v474_v3  ;;  %v455_v12 = vunpack.c.l.bf16 %v475_v8  ;;  %v456_v13 = vunpack.c.h.bf16 %v475_v8  ;;  %v478_v36 = vld [vmem:[%s616_s26 + $0x30] sm:$0xff]   ;;  %v479_v37 = vld [vmem:[%s616_s26 + $0x38] sm:$0xff]  }
  0x16   : > { %v254_v14 = vmul.f32 %v443_v4, %v621_v0  ;;  %v255_v15 = vmul.f32 %v444_v5, %v621_v0  ;;  %v256_v16 = vmul.f32 %v447_v6, %v621_v0  ;;  %v257_v17 = vmul.f32 %v448_v7, %v621_v0 }
  0x17   : > { %v258_v18 = vmul.f32 %v451_v10, %v621_v0  ;;  %v259_v19 = vmul.f32 %v452_v11, %v621_v0  ;;  %v260_v20 = vmul.f32 %v455_v12, %v621_v0  ;;  %v261_v21 = vmul.f32 %v456_v13, %v621_v0 }
  0x18   : > { %v277_v22 = vadd.f32 %v630_v9, %v254_v14  ;;  %v278_v23 = vadd.f32 %v630_v9, %v255_v15  ;;  %v279_v24 = vadd.f32 %v630_v9, %v256_v16  ;;  %v280_v25 = vadd.f32 %v630_v9, %v257_v17 }
  0x19   : > { %v281_v26 = vadd.f32 %v630_v9, %v258_v18  ;;  %v282_v27 = vadd.f32 %v630_v9, %v259_v19  ;;  %v283_v28 = vadd.f32 %v630_v9, %v260_v20  ;;  %v284_v29 = vadd.f32 %v630_v9, %v261_v21 }
  0x1a   : > { %v293_v32 = vmax.f32 %v277_v22, 0.0  ;;  %v294_v33 = vmax.f32 %v278_v23, 0.0  ;;  %v295_v34 = vmax.f32 %v279_v24, 0.0  ;;  %v296_v35 = vmax.f32 %v280_v25, 0.0 }
  0x1b   : > { %v297_v38 = vmax.f32 %v281_v26, 0.0  ;;  %v298_v39 = vmax.f32 %v282_v27, 0.0  ;;  %v299_v40 = vmax.f32 %v283_v28, 0.0  ;;  %v300_v41 = vmax.f32 %v284_v29, 0.0 }
  0x1c   : > { %309 = vst [vmem:[%s648_s7] sm:$0xff] %v293_v32  ;;  %310 = vst [vmem:[%s648_s7 + $0x8] sm:$0xff] %v294_v33  ;;  %v459_v42 = vunpack.c.l.bf16 %v476_v30  ;;  %v460_v43 = vunpack.c.h.bf16 %v476_v30  ;;  %v463_v44 = vunpack.c.l.bf16 %v477_v31  ;;  %v464_v45 = vunpack.c.h.bf16 %v477_v31 }
  0x1d   : > { %311 = vst [vmem:[%s648_s7 + $0x10] sm:$0xff] %v295_v34  ;;  %312 = vst [vmem:[%s648_s7 + $0x18] sm:$0xff] %v296_v35  ;;  %v467_v46 = vunpack.c.l.bf16 %v478_v36  ;;  %v468_v47 = vunpack.c.h.bf16 %v478_v36  ;;  %v471_v48 = vunpack.c.l.bf16 %v479_v37  ;;  %v472_v49 = vunpack.c.h.bf16 %v479_v37 }
  0x1e   : > { %313 = vst [vmem:[%s648_s7 + $0x20] sm:$0xff] %v297_v38  ;;  %314 = vst [vmem:[%s648_s7 + $0x28] sm:$0xff] %v298_v39  ;;  %v262_v50 = vmul.f32 %v459_v42, %v621_v0  ;;  %v263_v51 = vmul.f32 %v460_v43, %v621_v0  ;;  %v264_v52 = vmul.f32 %v463_v44, %v621_v0 }
  0x1f   : > { %315 = vst [vmem:[%s648_s7 + $0x30] sm:$0xff] %v299_v40  ;;  %316 = vst [vmem:[%s648_s7 + $0x38] sm:$0xff] %v300_v41  ;;  %v265_v53 = vmul.f32 %v464_v45, %v621_v0  ;;  %v266_v54 = vmul.f32 %v467_v46, %v621_v0  ;;  %v267_v55 = vmul.f32 %v468_v47, %v621_v0 }
  0x20   : > { %v268_v56 = vmul.f32 %v471_v48, %v621_v0  ;;  %v269_v57 = vmul.f32 %v472_v49, %v621_v0  ;;  %v285_v58 = vadd.f32 %v630_v9, %v262_v50  ;;  %v286_v59 = vadd.f32 %v630_v9, %v263_v51 }
  0x21   : > { %v287_v60 = vadd.f32 %v630_v9, %v264_v52  ;;  %v288_v61 = vadd.f32 %v630_v9, %v265_v53  ;;  %v289_v62 = vadd.f32 %v630_v9, %v266_v54  ;;  %v290_v63 = vadd.f32 %v630_v9, %v267_v55 }
  0x22   : > { %v291_v0 = vadd.f32 %v630_v9, %v268_v56  ;;  %v292_v1 = vadd.f32 %v630_v9, %v269_v57  ;;  %v301_v2 = vmax.f32 %v285_v58, 0.0  ;;  %v302_v3 = vmax.f32 %v286_v59, 0.0 }
  0x23   : > { %v303_v4 = vmax.f32 %v287_v60, 0.0  ;;  %v304_v5 = vmax.f32 %v288_v61, 0.0  ;;  %v305_v6 = vmax.f32 %v289_v62, 0.0  ;;  %v306_v7 = vmax.f32 %v290_v63, 0.0 }
  0x24   : > { %v307_v8 = vmax.f32 %v291_v0, 0.0  ;;  %v308_v10 = vmax.f32 %v292_v1, 0.0  ;;  %317 = vst [vmem:[%s648_s7 + $0x40] sm:$0xff] %v301_v2  ;;  %318 = vst [vmem:[%s648_s7 + $0x48] sm:$0xff] %v302_v3 }
  0x25   : > { %319 = vst [vmem:[%s648_s7 + $0x50] sm:$0xff] %v303_v4  ;;  %320 = vst [vmem:[%s648_s7 + $0x58] sm:$0xff] %v304_v5 }
  0x26   : > { %321 = vst [vmem:[%s648_s7 + $0x60] sm:$0xff] %v305_v6  ;;  %322 = vst [vmem:[%s648_s7 + $0x68] sm:$0xff] %v306_v7 }
  0x27   : > { %323 = vst [vmem:[%s648_s7 + $0x70] sm:$0xff] %v307_v8  ;;  %324 = vst [vmem:[%s648_s7 + $0x78] sm:$0xff] %v308_v10 }
  0x28 PF: > { %s13_s16 = sadd.s32 1, %s558_s16   ;;  %s709_s12 = smov %s550_s14 }
  0x29   : > { %p10_p7 = scmp.ge.s32.totalorder %s13_s16, 6   ;;  %s710_s13 = smov %s554_s15 }
  0x2a   : > { %s711_s14 = smov %s714_s17  ;;  %s712_s15 = smov %s718_s18 }
  0x2b   :  { %12 = sbr.rel (!%p10_p7) target bundleno = 3 (0x3), region = 62 }

// kernel: conv_block_nested_forward.3
= control target key start
LH: loop header
LB: loop body
LE: loop exit
PB: predicated region body
PF: predicated region fallthrough
CT: control target
= control target key end

     0   :  { %s2838_s18 = smov 0   ;;  %s2840_s19 = smov 0   ;;  %s3600_s0 = inlined_call_operand.vmem [shape: bf16[2,16,16,4], index: 0, kind: input, shape index: {}, may-alias: {0,1,2}]   ;;  %s3601_s1 = inlined_call_operand.vmem [shape: bf16[2,16,16,4], index: 1, kind: input, shape index: {}, may-alias: {0,1,2}]   ;;  %s3602_s2 = inlined_call_operand.vmem [shape: bf16[2,16,16,4], index: 2, kind: input, shape index: {}, may-alias: {0,1,2}]   ;;  %s3603_s3 = inlined_call_operand.vmem [shape: bf16[9,4,128], index: 3, kind: input, shape index: {}]   ;;  %s3604_s4 = inlined_call_operand.vmem [shape: bf16[2,16,16,128], index: 4, kind: output, shape index: {0}]   ;;  %s3605_s5 = inlined_call_operand.vmem [shape: f32[2,2,2,128], index: 5, kind: output, shape index: {1}]  }
   0x1   :  { %s2842_s20 = smov 0   ;;  %s2844_s21 = smov 0  }
   0x2   :  { %s2846_s22 = smov 0  }
   0x3 LB: > { %s25_s23 = sadd.s32 1, %s2798_s20  ;;  %s28_s24 = sadd.s32 1, %s2802_s21  ;;  %s2806_s22 = sphi %s2846_s22, %s16_s22   ;;  %s2802_s21 = sphi %s2844_s21, %s3674_s21   ;;  %s2798_s20 = sphi %s2842_s20, %s3673_s20   ;;  %s2794_s19 = sphi %s2840_s19, %s3672_s19   ;;  %s2790_s18 = sphi %s2838_s18, %s3671_s18  }
   0x4   : > { %p26_p0 = scmp.ge.s32.totalorder %s25_s23, 2  ;;  %p2258_p1 = scmp.ge.s32.totalorder %s2806_s22, 1 }
   0x5   : > { %p278_p2 = scmp.lt.s32.totalorder %s2806_s22, 5 }
   0x6   : > { %s3676_s23 = smov (%p26_p0, %s25_s23), 0  ;;  %s3678_s24 = smov (!%p26_p0, %s28_s24), %s2802_s21 }
   0x7   : > { %p279_p3 = pnand %p2258_p1, %p278_p2  ;;  %p30_p4 = scmp.ge.s32.totalorder %s3678_s24, 2 }
   0x9   : > { %s3680_s24 = smov (%p30_p4, %s3678_s24), 0  ;;  %282 = sbr.rel (%p279_p3) target bundleno = 417 (0x1a1), region = 36 }
   0xe   : > { %v2296_v0 = vld [vmem:[%s3603_s3 + $0x2] sm:$0x3]  ;;  %vm761_vm0 = vcmask 1041408   ;;  %s2874_s27 = sshll.u32 %s2790_s18, 3  ;;  %p351_p5 = scmp.lt.s32.totalorder %s2794_s19, 1  ;;  %vm613_vm1 = vcmask 1040384  }
   0xf   : > { %2711 = vmatprep.subr.msk.bf16.mxu1 %vm761_vm0, %v2296_v0  ;;  %v763_v1 = vsel %vm761_vm0, %v2296_v0, 0  ;;  %p353_p6 = scmp.lt.s32.totalorder %s2874_s27, 15  ;;  %2710 = vmatprep.subr.msk.bf16.mxu0 %vm761_vm0, %v2296_v0  ;;  %v636_v2 = vld [vmem:[%s3603_s3] sm:$0x3]  ;;  %v2888_v3 = vld [vmem:[%s3603_s3 + $0x4] sm:$0x3] }
  0x10   : > { %2709 = vmatpush3.bf16.msra.mxu1 %v763_v1  ;;  %s3682_s19 = smov (!%p351_p5, %s2794_s19), 1  ;;  %2547 = vmatpush3.bf16.msra.mxu0 %v763_v1  ;;  %s2264_s9 = sadd.s32 4294967295, %s2874_s27  ;;  %vm614_vm2 = vsmask.f32 256  ;;  %vm637_vm3 = vsmask.f32 7424 }
  0x11   : > { %s354_s7 = scalar_select %p353_p6, %s2874_s27, 15  ;;  %2712 = vmatprep.subr.msk.bf16.mxu1 %vm761_vm0, %v636_v2  ;;  %2713 = vmatprep.subr.msk.bf16.mxu0 %vm761_vm0, %v2888_v3  ;;  %vm2918_vm4 = vmand %vm613_vm1, %vm614_vm2  ;;  %vm736_vm5 = vcmask 31744   ;;  %v879_v28 = vsel %vm761_vm0, %v636_v2, 0  ;;  %v2995_v56 = vld [vmem:[%s3603_s3 + $0x6] sm:$0x3]  ;;  %vm994_vm6 = vcmask 1046528  }
  0x12   : > { %s2895_s8 = sshll.u32 %s3682_s19, 5  ;;  %p363_p7 = scmp.gt.s32.totalorder %s2264_s9, 0 }
  0x13   : > { %s2260_s10 = sshll.u32 %s354_s7, 1  ;;  %p2265_p8 = scmp.lt.s32.totalorder %s2264_s9, 15 }
  0x14   : > { %s2899_s11 = sadd.s32 %s2895_s8, %s2260_s10  ;;  %p433_p9 = scmp.gt.s32.totalorder %s2790_s18, 0 }
  0x15   : > { %s2262_s12 = sshll.u32 %s2899_s11, 2  ;;  %s2401_s17 = sadd.s32 8, %s2874_s27 }
  0x16   : > { %s2907_s15 = scalar_lea.vmem %s3600_s0, %s2262_s12  ;;  %p2954_p10 = scmp.lt.s32.totalorder %s2401_s17, 15 }
  0x17   : > { %v2760_v4 = vld [vmem:[%s2907_s15 + $0x18] sm:$0xff]   ;;  %s364_s16 = scalar_select %p363_p7, %s2264_s9, 0  ;;  %v2761_v5 = vld [vmem:[%s2907_s15 + $0x20] sm:$0xff]   ;;  %v2762_v10 = vld [vmem:[%s2907_s15 + $0x28] sm:$0xff]  }
  0x18   : > { %v552_v6 = vshrl.u32 %v2760_v4, 16  ;;  %v555_v7 = vshll.u32 %v2760_v4, 16  ;;  %v559_v8 = vshrl.u32 %v2761_v5, 16  ;;  %v562_v9 = vshll.u32 %v2761_v5, 16  ;;  %s434_s25 = scalar_select %p433_p9, 1, 0 }
  0x19   : > { %s3684_s16 = smov (!%p2265_p8, %s364_s16), 15  ;;  %v2763_v12 = vld [vmem:[%s2907_s15 + $0x30] sm:$0xff]   ;;  %v566_v15 = vshrl.u32 %v2762_v10, 16  ;;  %v569_v16 = vshll.u32 %v2762_v10, 16  ;;  %v2929_v21 = vld [vmem:[%s2907_s15] sm:$0xff]   ;;  %v2765_v46 = vld [vmem:[%s2907_s15 + $0x8] sm:$0xff]  }
  0x1a   : > { %v554_v11 = vrot.slane %v552_v6, 7  ;;  %v561_v14 = vrot.slane %v559_v8, 7  ;;  %s2270_s26 = sshll.u32 %s3684_s16, 1  ;;  %s2926_s28 = scvt.s32.f32 %s434_s25  ;;  %v573_v19 = vshrl.u32 %v2763_v12, 16  ;;  %v576_v20 = vshll.u32 %v2763_v12, 16  ;;  %v2766_v51 = vld [vmem:[%s2907_s15 + $0x10] sm:$0xff]  }
  0x1b   : > { %v568_v25 = vrot.slane %v566_v15, 7  ;;  %s2937_s29 = sadd.s32 %s2270_s26, %s2895_s8  ;;  %v531_v33 = vshrl.u32 %v2929_v21, 16  ;;  %v534_v63 = vshll.u32 %v2929_v21, 16  ;;  %v538_v0 = vshrl.u32 %v2765_v46, 16  ;;  %s3688_s17 = smov (!%p2954_p10, %s2401_s17), 15 }
  0x1c   : > { %v557_v17 = vor.u32 %v555_v7, %v554_v11  ;;  %v2924_v18 = vsel %vm2918_vm4, %v554_v11, 0  ;;  %v564_v23 = vor.u32 %v562_v9, %v561_v14  ;;  %v2934_v24 = vsel %vm2918_vm4, %v561_v14, 0  ;;  %s2272_s6 = sshll.u32 %s2937_s29, 2  ;;  %s438_s7 = sshrl.u32 %s2926_s28, 16 }
  0x1d   : > { %v694_v22 = vshll.u32 %v2924_v18, 16  ;;  %v706_v27 = vshll.u32 %v2934_v24, 16  ;;  %v575_v29 = vrot.slane %v573_v19, 7  ;;  %v571_v37 = vor.u32 %v569_v16, %v568_v25  ;;  %p437_p11 = scmp.ne.f32.partialorder %s2926_s28, %s2926_s28  ;;  %s439_s9 = sand.u32 1, %s438_s7 }
  0x1e   : > { %v2941_v26 = vsel %vm2918_vm4, 0, %v557_v17  ;;  %v2949_v32 = vsel %vm2918_vm4, 0, %v564_v23  ;;  %v2964_v39 = vsel %vm2918_vm4, %v568_v25, 0  ;;  %s440_s10 = sadd.s32 32767, %s439_s9  ;;  %s373_s25 = scalar_lea.vmem %s3601_s1, %s2272_s6  ;;  %v533_v60 = vrot.slane %v531_v33, 7 }
  0x1f   : > { %v687_v30 = vshrl.u32 %v2941_v26, 16  ;;  %v689_v31 = vshll.u32 %v2941_v26, 16  ;;  %v696_v34 = vrot.slane %v694_v22, 1  ;;  %v699_v35 = vshrl.u32 %v2949_v32, 16  ;;  %s441_s13 = sadd.s32 %s440_s10, %s2926_s28  ;;  %v431_v2 = vld [vmem:[%s373_s25] sm:$0xf] }
  0x20   : > { %v701_v36 = vshll.u32 %v2949_v32, 16  ;;  %v578_v40 = vor.u32 %v576_v20, %v575_v29  ;;  %v2970_v41 = vsel %vm2918_vm4, %v575_v29, 0  ;;  %v708_v43 = vrot.slane %v706_v27, 1  ;;  %s442_s26 = sand.u32 4294901760, %s441_s13  ;;  %p408_p12 = scmp.lt.s32.totalorder %s2790_s18, 1 }
  0x21   : > { %v691_v38 = vrot.slane %v689_v31, 1  ;;  %v2974_v44 = vsel %vm2918_vm4, 0, %v571_v37  ;;  %v718_v45 = vshll.u32 %v2964_v39, 16  ;;  %v730_v55 = vshll.u32 %v2970_v41, 16  ;;  %s3686_s26 = smov (%p437_p11, %s442_s26), 2143289344  ;;  %s3690_s17 = smov (!%p2954_p10, %s3688_s17), 15 }
  0x22   : > { %v703_v42 = vrot.slane %v701_v36, 1  ;;  %v711_v48 = vshrl.u32 %v2974_v44, 16  ;;  %v713_v49 = vshll.u32 %v2974_v44, 16  ;;  %v2983_v50 = vsel %vm2918_vm4, 0, %v578_v40  ;;  %s445_s28 = sshrl.u32 %s3686_s26, 16  ;;  %s2277_s10 = sshll.u32 %s3690_s17, 1 }
  0x23   : > { %v692_v47 = vor.u32 %v691_v38, %v687_v30  ;;  %v723_v53 = vshrl.u32 %v2983_v50, 16  ;;  %v725_v54 = vshll.u32 %v2983_v50, 16  ;;  %v720_v59 = vrot.slane %v718_v45, 1  ;;  %v432_v5 = vld [vmem:[%s373_s25 + $0x4] sm:$0xf]  ;;  %s446_s6 = sshll.u32 %s445_s28, 16  ;;  %s388_s13 = sadd.s32 %s2277_s10, %s2895_s8 }
  0x24   : > { %v704_v52 = vor.u32 %v703_v42, %v699_v35  ;;  %v715_v58 = vrot.slane %v713_v49, 1  ;;  %v545_v4 = vshrl.u32 %v2766_v51, 16  ;;  %v732_v7 = vrot.slane %v730_v55, 1  ;;  %s447_s27 = sor.u32 %s446_s6, %s445_s28  ;;  %s2279_s8 = sshll.u32 %s388_s13, 2  ;;  %v3092_v55 = vld [vmem:[%s3603_s3 + $0xa] sm:$0x3] }
  0x25   : > { %v2998_v57 = vsel %vm637_vm3, %v692_v47, %v696_v34  ;;  %v727_v62 = vrot.slane %v725_v54, 1  ;;  %v536_v8 = vor.u32 %v534_v63, %v533_v60  ;;  %v541_v9 = vshll.u32 %v2765_v46, 16  ;;  %s455_s9 = scalar_select %p408_p12, 1, 0 }
  0x26   : > { %2556 = vmatprep.mubr.msk.bf16.mxu1 %vm736_vm5, %v2998_v57  ;;  %v3006_v61 = vsel %vm637_vm3, %v704_v52, %v708_v43  ;;  %v716_v1 = vor.u32 %v715_v58, %v711_v48  ;;  %v540_v11 = vrot.slane %v538_v0, 7  ;;  %v448_v12 = vstv %s447_s27  ;;  %s390_s7 = scalar_lea.vmem %s3602_s2, %s2279_s8  ;;  %s3694_s18 = smov (!%p408_p12, %s2790_s18), 1 }
  0x27   : > { %2557 = vmatmul.mubr.msk.bf16.vlgmr.msra.gmra.mxu1 %vm736_vm5, %v3006_v61  ;;  %v728_v6 = vor.u32 %v727_v62, %v723_v53  ;;  %v450_v14 = vmul.bf16 %v448_v12, %v431_v2  ;;  %v451_v15 = vmul.bf16 %v448_v12, %v432_v5  ;;  %v547_v16 = vrot.slane %v545_v4, 7  ;;  %s3038_s14 = scvt.s32.f32 %s455_s9  ;;  %v452_v2 = vld [vmem:[%s390_s7] sm:$0xf]  ;;  %v453_v4 = vld [vmem:[%s390_s7 + $0x4] sm:$0xf]  ;;  %s2284_s11 = sshll.u32 %s3682_s19, 1 }
  0x28   : > { %2565 = vmatpush3.bf16.msra.mxu1 %v879_v28  ;;  %v3019_v10 = vsel %vm637_vm3, %v716_v1, %v720_v59  ;;  %v3035_v19 = vsel %vm2918_vm4, 0, %v536_v8  ;;  %v543_v20 = vor.u32 %v541_v9, %v540_v11  ;;  %v548_v21 = vshll.u32 %v2766_v51, 16  ;;  %v2767_v51 = vld [vmem:[%s2907_s15 + $0x38] sm:$0xff]  }
  0x29   : > { %2714 = vmatprep.subr.msk.bf16.mxu1 %vm761_vm0, %v2995_v56  ;;  %2560 = vmatprep.mubr.msk.bf16.mxu1 %vm736_vm5, %v3019_v10  ;;  %v3031_v17 = vsel %vm637_vm3, %v728_v6, %v732_v7  ;;  %v2286_v22 = vcombine.low %v450_v14, %v451_v15  ;;  %v3048_v28 = vsel %vm2918_vm4, %v533_v60, 0  ;;  %v653_v29 = vshll.u32 %v3035_v19, 16  ;;  %s459_s17 = sshrl.u32 %s3038_s14, 16  ;;  %p458_p13 = scmp.ne.f32.partialorder %s3038_s14, %s3038_s14 }
  0x2a   : > { %v3042_v23 = vsel %vm2918_vm4, 0, %v543_v20  ;;  %v3053_v30 = vsel %vm2918_vm4, %v540_v11, 0  ;;  %v550_v33 = vor.u32 %v548_v21, %v547_v16  ;;  %v651_v35 = vshrl.u32 %v3035_v19, 16  ;;  %s460_s30 = sand.u32 1, %s459_s17 }
  0x2b   : > { %v524_v25 = vshrl.u32 %v2286_v22, 16  ;;  %v527_v27 = vshll.u32 %v2286_v22, 16  ;;  %v665_v31 = vshll.u32 %v3042_v23, 16  ;;  %v658_v36 = vshll.u32 %v3048_v28, 16  ;;  %s461_s16 = sadd.s32 32767, %s460_s30 }
  0x2c   : > { %v655_v40 = vrot.slane %v653_v29, 1  ;;  %v670_v42 = vshll.u32 %v3053_v30, 16  ;;  %v663_v45 = vshrl.u32 %v3042_v23, 16  ;;  %v3070_v47 = vsel %vm2918_vm4, 0, %v550_v33  ;;  %s462_s25 = sadd.s32 %s461_s16, %s3038_s14  ;;  %v2331_v22 = vld [vmem:[%s3603_s3 + $0x8] sm:$0x3] }
  0x2d   : > { %v526_v34 = vrot.slane %v524_v25, 7  ;;  %v667_v46 = vrot.slane %v665_v31, 1  ;;  %v1167_v49 = vsel %vm761_vm0, %v2995_v56, 0  ;;  %s463_s28 = sand.u32 4294901760, %s462_s25  ;;  %v1046_v54 = vsel %vm761_vm0, %v2888_v3, 0 }
  0x2e   : > { %s3692_s28 = smov (%p458_p13, %s463_s28), 2143289344  ;;  %v656_v56 = vor.u32 %v655_v40, %v651_v35  ;;  %v660_v58 = vrot.slane %v658_v36, 1  ;;  %v3101_v59 = vsel %vm2918_vm4, %v547_v16, 0  ;;  %v677_v3 = vshll.u32 %v3070_v47, 16 }
  0x2f   : > { %2561 = vmatmul.mubr.msk.bf16.gmra.mxu1 %vm736_vm5, %v3031_v17  ;;  %v529_v37 = vor.u32 %v527_v27, %v526_v34  ;;  %v3063_v38 = vsel %vm2918_vm4, %v526_v34, 0  ;;  %v668_v63 = vor.u32 %v667_v46, %v663_v45  ;;  %v672_v0 = vrot.slane %v670_v42, 1  ;;  %s466_s15 = sshrl.u32 %s3692_s28, 16  ;;  %s3527_s28 = scalar_lea.vmem %s3604_s4, %s2262_s12 }
  0x30   : > { %v646_v43 = vshll.u32 %v3063_v38, 16  ;;  %v580_v1 = vshrl.u32 %v2767_v51, 16  ;;  %s467_s9 = sshll.u32 %s466_s15, 16  ;;  %v675_v6 = vshrl.u32 %v3070_v47, 16  ;;  %v682_v7 = vshll.u32 %v3101_v59, 16  ;;  %s411_s12 = sadd.s32 %s2284_s11, %s3694_s18 }
  0x31   : > { %v3075_v48 = vsel %vm2918_vm4, 0, %v529_v37  ;;  %v583_v8 = vshll.u32 %v2767_v51, 16  ;;  %s468_s10 = sor.u32 %s467_s9, %s466_s15  ;;  %v3111_v9 = vsel %vm637_vm3, %v656_v56, %v660_v58  ;;  %v679_v11 = vrot.slane %v677_v3, 1  ;;  %s2285_s6 = sshll.u32 %s411_s12, 1 }
  0x32   : > { %v639_v52 = vshrl.u32 %v3075_v48, 16  ;;  %v641_v53 = vshll.u32 %v3075_v48, 16  ;;  %2566 = vmatprep.mubr.msk.bf16.mxu1 %vm736_vm5, %v3075_v48  ;;  %v648_v62 = vrot.slane %v646_v43, 1  ;;  %v582_v12 = vrot.slane %v580_v1, 7  ;;  %s413_s9 = scalar_lea.vmem %s3605_s5, %s2285_s6 }
  0x33   : > { %v469_v14 = vstv %s468_s10  ;;  %v3115_v16 = vsel %vm637_vm3, %v668_v63, %v672_v0  ;;  %v996_v34 = vrot.slane %v3063_v38, 1  ;;  %v680_v35 = vor.u32 %v679_v11, %v675_v6 }
  0x34   : > { %v643_v60 = vrot.slane %v641_v53, 1  ;;  %v471_v20 = vmul.bf16 %v469_v14, %v452_v2  ;;  %v472_v21 = vmul.bf16 %v469_v14, %v453_v4  ;;  %v585_v25 = vor.u32 %v583_v8, %v582_v12 }
  0x35   : > { %v634_v27 = vsel %vm2918_vm4, %v582_v12, 0  ;;  %v684_v36 = vrot.slane %v682_v7, 1  ;;  %v995_v40 = vrot.slane %v3075_v48, 1  ;;  %v999_v0 = vrot.slane %v3048_v28, 1 }
  0x36   : > { %v644_v5 = vor.u32 %v643_v60, %v639_v52  ;;  %v1289_v29 = vshll.u32 %v634_v27, 16  ;;  %v1417_v31 = vrot.slane %v634_v27, 1  ;;  %v2295_v33 = vcombine.low %v471_v20, %v472_v21  ;;  %v2349_v20 = vld [vmem:[%s3603_s3 + $0xc] sm:$0x3] }
  0x37   : > { %2567 = vmatmul.mubr.msk.bf16.vlgmr.msra.gmra.mxu1 %vm736_vm5, %v3035_v19  ;;  %v3130_v37 = vsel %vm2918_vm4, 0, %v585_v25  ;;  %v3145_v48 = vsel %vm637_vm3, %v680_v35, %v684_v36  ;;  %v998_v1 = vrot.slane %v3035_v19, 1  ;;  %v1002_v2 = vrot.slane %v3053_v30, 1 }
  0x38   : > { %2570 = vmatprep.mubr.msk.bf16.mxu1 %vm736_vm5, %v3042_v23  ;;  %2601 = vmatpush3.bf16.msra.mxu1 %v1167_v49  ;;  %v649_v15 = vsel %vm637_vm3, %v644_v5, %v648_v62  ;;  %v1282_v42 = vshrl.u32 %v3130_v37, 16  ;;  %v1284_v38 = vshll.u32 %v3130_v37, 16  ;;  %v1416_v43 = vrot.slane %v3130_v37, 1 }
  0x39   : > { %2716 = vmatprep.subr.msk.bf16.mxu1 %vm761_vm0, %v3092_v55  ;;  %2548 = vmatprep.mubr.msk.bf16.mxu0 %vm736_vm5, %v649_v15  ;;  %v587_v45 = vshrl.u32 %v2295_v33, 16  ;;  %v590_v46 = vshll.u32 %v2295_v33, 16  ;;  %v1291_v51 = vrot.slane %v1289_v29, 1  ;;  %v1001_v5 = vrot.slane %v3042_v23, 1 }
  0x3a   : > { %2549 = vmatmul.mubr.msk.bf16.vlgmr.msra.gmra.mxu0 %vm736_vm5, %v3111_v9  ;;  %v1286_v49 = vrot.slane %v1284_v38, 1  ;;  %v3142_v52 = vsel %vm994_vm6, %v1416_v43, %v1417_v31  ;;  %v1000_v11 = vsel %vm994_vm6, %v998_v1, %v999_v0  ;;  %v1299_v12 = vsel %vm761_vm0, %v2331_v22, 0  ;;  %v2367_v38 = vld [vmem:[%s3603_s3 + $0x10] sm:$0x3] }
  0x3b   : > { %2583 = vmatpush3.bf16.msra.mxu0 %v1046_v54  ;;  %2552 = vmatprep.mubr.msk.bf16.mxu0 %vm736_vm5, %v3115_v16  ;;  %v589_v53 = vrot.slane %v587_v45, 7  ;;  %v997_v54 = vsel %vm994_vm6, %v995_v40, %v996_v34  ;;  %v3177_v14 = vsel %vm994_vm6, %v1001_v5, %v1002_v2  ;;  %v1004_v25 = vrot.slane %v3070_v47, 1 }
  0x3c   : > { %2715 = vmatprep.subr.msk.bf16.mxu0 %vm761_vm0, %v2331_v22  ;;  %v1287_v56 = vor.u32 %v1286_v49, %v1282_v42  ;;  %v1005_v22 = vrot.slane %v3101_v59, 1  ;;  %v1007_v27 = vrot.slane %v2941_v26, 1  ;;  %v1008_v29 = vrot.slane %v2924_v18, 1 }
  0x3d   : > { %v592_v58 = vor.u32 %v590_v46, %v589_v53  ;;  %v635_v3 = vsel %vm2918_vm4, %v589_v53, 0  ;;  %v1425_v59 = vsel %vm761_vm0, %v3092_v55, 0  ;;  %v1010_v18 = vrot.slane %v2949_v32, 1 }
  0x3e   : > { %v3153_v60 = vsel %vm637_vm3, %v1287_v56, %v1291_v51  ;;  %v1668_v62 = vshll.u32 %v635_v3, 16  ;;  %v1796_v63 = vrot.slane %v635_v3, 1  ;;  %v3198_v31 = vsel %vm994_vm6, %v1004_v25, %v1005_v22 }
  0x3f   : > { %2571 = vmatmul.mubr.msk.bf16.gmra.mxu1 %vm736_vm5, %v3070_v47  ;;  %v3161_v4 = vsel %vm2918_vm4, 0, %v592_v58  ;;  %v3201_v33 = vsel %vm994_vm6, %v1007_v27, %v1008_v29  ;;  %v1011_v34 = vrot.slane %v2934_v24, 1  ;;  %v1013_v35 = vrot.slane %v2974_v44, 1 }
  0x40   : > { %2574 = vmatprep.mubr.msk.bf16.mxu1 %vm736_vm5, %v2941_v26  ;;  %v1661_v6 = vshrl.u32 %v3161_v4, 16  ;;  %v1663_v7 = vshll.u32 %v3161_v4, 16  ;;  %v1795_v28 = vrot.slane %v3161_v4, 1  ;;  %v1670_v30 = vrot.slane %v1668_v62, 1 }
  0x41   : > { %v1014_v36 = vrot.slane %v2964_v39, 1  ;;  %v1012_v55 = vsel %vm994_vm6, %v1010_v18, %v1011_v34  ;;  %v1016_v40 = vrot.slane %v2983_v50, 1  ;;  %v1017_v39 = vrot.slane %v2970_v41, 1 }
  0x42   : > { %2553 = vmatmul.mubr.msk.bf16.gmra.mxu0 %vm736_vm5, %v3145_v48  ;;  %v1665_v8 = vrot.slane %v1663_v7, 1  ;;  %v3172_v13 = vsel %vm994_vm6, %v1795_v28, %v1796_v63  ;;  %v1546_v41 = vsel %vm761_vm0, %v2349_v20, 0  ;;  %v1804_v43 = vsel %vm761_vm0, %v2367_v38, 0 }
  0x43   : > { %2584 = vmatprep.mubr.msk.bf16.mxu0 %vm736_vm5, %v997_v54  ;;  %v1015_v24 = vsel %vm994_vm6, %v1013_v35, %v1014_v36  ;;  %v1018_v42 = vsel %vm994_vm6, %v1016_v40, %v1017_v39 }
  0x44   : > { %v1666_v15 = vor.u32 %v1665_v8, %v1661_v6 }
  0x46   : > { %v3184_v21 = vsel %vm637_vm3, %v1666_v15, %v1670_v30 }
  0x47   : > { %2575 = vmatmul.mubr.msk.bf16.gmra.mxu1 %vm736_vm5, %v2949_v32 }
  0x48   : > { %2578 = vmatprep.mubr.msk.bf16.mxu1 %vm736_vm5, %v2974_v44 }
  0x4a   : > { %2585 = vmatmul.mubr.msk.bf16.vlgmr.msra.gmra.mxu0 %vm736_vm5, %v1000_v11 }
  0x4b   : > { %2619 = vmatpush3.bf16.msra.mxu0 %v1299_v12  ;;  %2588 = vmatprep.mubr.msk.bf16.mxu0 %vm736_vm5, %v3177_v14 }
  0x4c   : > { %2717 = vmatprep.subr.msk.bf16.mxu0 %vm761_vm0, %v2349_v20 }
  0x4f   : > { %2579 = vmatmul.mubr.msk.bf16.gmra.mxu1 %vm736_vm5, %v2983_v50 }
  0x50   : > { %2602 = vmatprep.mubr.msk.bf16.mxu1 %vm736_vm5, %v3035_v19  ;;  %v2358_v19 = vld [vmem:[%s3603_s3 + $0xe] sm:$0x3] }
  0x52   : > { %2589 = vmatmul.mubr.msk.bf16.gmra.mxu0 %vm736_vm5, %v3198_v31 }
  0x53   : > { %2592 = vmatprep.mubr.msk.bf16.mxu0 %vm736_vm5, %v3201_v33 }
  0x57   : > { %2603 = vmatmul.mubr.msk.bf16.vlgmr.msra.gmra.mxu1 %vm736_vm5, %v3042_v23 }
  0x58   : > { %2606 = vmatprep.mubr.msk.bf16.mxu1 %vm736_vm5, %v3070_v47  ;;  %2637 = vmatpush3.bf16.msra.mxu1 %v1425_v59 }
  0x59   : > { %2718 = vmatprep.subr.msk.bf16.mxu1 %vm761_vm0, %v2358_v19 }
  0x5a   : > { %2593 = vmatmul.mubr.msk.bf16.gmra.mxu0 %vm736_vm5, %v1012_v55 }
  0x5b   : > { %2596 = vmatprep.mubr.msk.bf16.mxu0 %vm736_vm5, %v1015_v24 }
  0x5f   : > { %2607 = vmatmul.mubr.msk.bf16.gmra.mxu1 %vm736_vm5, %v2941_v26 }
  0x60   : > { %2610 = vmatprep.mubr.msk.bf16.mxu1 %vm736_vm5, %v2949_v32 }
  0x62   : > { %2597 = vmatmul.mubr.msk.bf16.gmra.mxu0 %vm736_vm5, %v1018_v42 }
  0x63   : > { %2620 = vmatprep.mubr.msk.bf16.mxu0 %vm736_vm5, %v3111_v9  ;;  %v1678_v9 = vsel %vm761_vm0, %v2358_v19, 0 }
  0x67   : > { %2611 = vmatmul.mubr.msk.bf16.gmra.mxu1 %vm736_vm5, %v2974_v44 }
  0x68   : > { %2614 = vmatprep.mubr.msk.bf16.mxu1 %vm736_vm5, %v2983_v50 }
  0x6a   : > { %2621 = vmatmul.mubr.msk.bf16.vlgmr.msra.gmra.mxu0 %vm736_vm5, %v3115_v16 }
  0x6b   : > { %2655 = vmatpush3.bf16.msra.mxu0 %v1546_v41  ;;  %2624 = vmatprep.mubr.msk.bf16.mxu0 %vm736_vm5, %v3145_v48 }
  0x6c   : > { %2719 = vmatprep.subr.msk.bf16.mxu0 %vm761_vm0, %v2367_v38 }
  0x6f   : > { %2615 = vmatmul.mubr.msk.bf16.gmra.mxu1 %vm736_vm5, %v3130_v37 }
  0x70   : > { %2638 = vmatprep.mubr.msk.bf16.mxu1 %vm736_vm5, %v1000_v11 }
  0x72   : > { %2625 = vmatmul.mubr.msk.bf16.gmra.mxu0 %vm736_vm5, %v2998_v57 }
  0x73   : > { %2628 = vmatprep.mubr.msk.bf16.mxu0 %vm736_vm5, %v3006_v61 }
  0x77   : > { %2639 = vmatmul.mubr.msk.bf16.vlgmr.msra.gmra.mxu1 %vm736_vm5, %v3177_v14 }
  0x78   : > { %2642 = vmatprep.mubr.msk.bf16.mxu1 %vm736_vm5, %v3198_v31  ;;  %2673 = vmatpush3.bf16.msra.mxu1 %v1678_v9 }
  0x7a   : > { %2629 = vmatmul.mubr.msk.bf16.gmra.mxu0 %vm736_vm5, %v3019_v10 }
  0x7b   : > { %2632 = vmatprep.mubr.msk.bf16.mxu0 %vm736_vm5, %v3031_v17 }
  0x7f   : > { %2643 = vmatmul.mubr.msk.bf16.gmra.mxu1 %vm736_vm5, %v3201_v33 }
  0x80   : > { %2646 = vmatprep.mubr.msk.bf16.mxu1 %vm736_vm5, %v1012_v55 }
  0x82   : > { %2633 = vmatmul.mubr.msk.bf16.gmra.mxu0 %vm736_vm5, %v3153_v60 }
  0x83   : > { %2656 = vmatprep.mubr.msk.bf16.mxu0 %vm736_vm5, %v3042_v23 }
  0x87   : > { %2647 = vmatmul.mubr.msk.bf16.gmra.mxu1 %vm736_vm5, %v1015_v24 }
  0x88   : > { %2650 = vmatprep.mubr.msk.bf16.mxu1 %vm736_vm5, %v1018_v42 }
  0x8a   : > { %2657 = vmatmul.mubr.msk.bf16.vlgmr.msra.gmra.mxu0 %vm736_vm5, %v3070_v47 }
  0x8b   : > { %2691 = vmatpush3.bf16.msra.mxu0 %v1804_v43  ;;  %2660 = vmatprep.mubr.msk.bf16.mxu0 %vm736_vm5, %v2941_v26 }
  0x8f   : > { %2651 = vmatmul.mubr.msk.bf16.gmra.mxu1 %vm736_vm5, %v3142_v52 }
  0x90   : > { %2674 = vmatprep.mubr.msk.bf16.mxu1 %vm736_vm5, %v3115_v16 }
  0x92   : > { %2661 = vmatmul.mubr.msk.bf16.gmra.mxu0 %vm736_vm5, %v2949_v32 }
  0x93   : > { %2664 = vmatprep.mubr.msk.bf16.mxu0 %vm736_vm5, %v2974_v44 }
  0x97   : > { %2675 = vmatmul.mubr.msk.bf16.vlgmr.msra.gmra.mxu1 %vm736_vm5, %v3145_v48 }
  0x98   : > { %2678 = vmatprep.mubr.msk.bf16.mxu1 %vm736_vm5, %v2998_v57 }
  0x9a   : > { %2665 = vmatmul.mubr.msk.bf16.gmra.mxu0 %vm736_vm5, %v2983_v50 }
  0x9b   : > { %2668 = vmatprep.mubr.msk.bf16.mxu0 %vm736_vm5, %v3130_v37 }
  0x9f   : > { %2679 = vmatmul.mubr.msk.bf16.gmra.mxu1 %vm736_vm5, %v3006_v61 }
  0xa0   : > { %2682 = vmatprep.mubr.msk.bf16.mxu1 %vm736_vm5, %v3019_v10 }
  0xa2   : > { %2669 = vmatmul.mubr.msk.bf16.gmra.mxu0 %vm736_vm5, %v3161_v4 }
  0xa3   : > { %2692 = vmatprep.mubr.msk.bf16.mxu0 %vm736_vm5, %v3177_v14 }
  0xa7   : > { %2683 = vmatmul.mubr.msk.bf16.gmra.mxu1 %vm736_vm5, %v3031_v17 }
  0xa8   : > { %2686 = vmatprep.mubr.msk.bf16.mxu1 %vm736_vm5, %v3153_v60 }
  0xaa   : > { %2693 = vmatmul.mubr.msk.bf16.vlgmr.msra.gmra.mxu0 %vm736_vm5, %v3198_v31 }
  0xab   : > { %2696 = vmatprep.mubr.msk.bf16.mxu0 %vm736_vm5, %v3201_v33 }
  0xaf   : > { %2687 = vmatmul.mubr.msk.bf16.gmra.mxu1 %vm736_vm5, %v3184_v21 }
  0xb2   : > { %2697 = vmatmul.mubr.msk.bf16.gmra.mxu0 %vm736_vm5, %v1012_v55 }
  0xb3   : > { %2700 = vmatprep.mubr.msk.bf16.mxu0 %vm736_vm5, %v1015_v24 }
  0xba   : > { %2701 = vmatmul.mubr.msk.bf16.gmra.mxu0 %vm736_vm5, %v1018_v42 }
  0xbb   : > { %2704 = vmatprep.mubr.msk.bf16.mxu0 %vm736_vm5, %v3142_v52 }
  0xc2   : > { %2705 = vmatmul.mubr.msk.bf16.gmra.mxu0 %vm736_vm5, %v3172_v13 }
  0xe7   : > { %v2558_v26 = vpop.f32.mrf.mxu1 }
  0xe9   : > { %v831_v32 = vpop.f32.mrf.mxu1 }
  0xeb   : > { %v2559_v44 = vpop.f32.mrf.mxu1 }
  0xed   : > { %v834_v50 = vpop.f32.mrf.mxu1 }
  0xef   : > { %v2562_v57 = vpop.f32.mrf.mxu1 }
  0xf1   : > { %v847_v61 = vpop.f32.mrf.mxu1 }
  0xf3   : > { %v2563_v10 = vpop.f32.mrf.mxu1 }
  0xf5   : > { %v850_v17 = vpop.f32.mrf.mxu1 }
  0xf7   : > { %v2568_v23 = vpop.f32.mrf.mxu1 }
  0xf9   : > { %v915_v47 = vpop.f32.mrf.mxu1 }
  0xfa   : > { %v2550_v45 = vpop.f32.mrf.mxu0 }
  0xfb   : > { %v2569_v16 = vpop.f32.mrf.mxu1  ;;  %v924_v46 = vadd.f32 %v2568_v23, %v2550_v45 }
  0xfc   : > { %v799_v49 = vpop.f32.mrf.mxu0 }
  0xfd   : > { %v918_v37 = vpop.f32.mrf.mxu1  ;;  %v916_v52 = vadd.f32 %v915_v47, %v799_v49 }
  0xfe   : > { %v2551_v48 = vpop.f32.mrf.mxu0 }
  0xff   : > { %v2572_v51 = vpop.f32.mrf.mxu1  ;;  %v927_v54 = vadd.f32 %v2569_v16, %v2551_v48 }
 0x100   : > { %v802_v56 = vpop.f32.mrf.mxu0 }
 0x101   : > { %v931_v53 = vpop.f32.mrf.mxu1  ;;  %v919_v3 = vadd.f32 %v918_v37, %v802_v56 }
 0x102   : > { %v2554_v60 = vpop.f32.mrf.mxu0 }
 0x103   : > { %v2573_v58 = vpop.f32.mrf.mxu1  ;;  %v940_v63 = vadd.f32 %v2572_v51, %v2554_v60 }
 0x104   : > { %v815_v0 = vpop.f32.mrf.mxu0 }
 0x105   : > { %v934_v62 = vpop.f32.mrf.mxu1  ;;  %v932_v2 = vadd.f32 %v931_v53, %v815_v0 }
 0x106   : > { %v2555_v5 = vpop.f32.mrf.mxu0 }
 0x107   : > { %v2576_v1 = vpop.f32.mrf.mxu1  ;;  %v943_v7 = vadd.f32 %v2573_v58, %v2555_v5 }
 0x108   : > { %v956_v4 = vadd.f32 %v2576_v1, %v2558_v26  ;;  %v818_v8 = vpop.f32.mrf.mxu0 }
 0x109   : > { %v947_v6 = vpop.f32.mrf.mxu1  ;;  %v935_v13 = vadd.f32 %v934_v62, %v818_v8 }
 0x10a   : > { %v948_v28 = vadd.f32 %v947_v6, %v831_v32  ;;  %v2586_v12 = vpop.f32.mrf.mxu0 }
 0x10b   : > { %v2577_v30 = vpop.f32.mrf.mxu1  ;;  %v3319_v15 = vadd.f32 %v2586_v12, %v924_v46 }
 0x10c   : > { %v959_v11 = vadd.f32 %v2577_v30, %v2559_v44  ;;  %v1082_v21 = vpop.f32.mrf.mxu0 }
 0x10d   : > { %v950_v14 = vpop.f32.mrf.mxu1  ;;  %v3321_v22 = vadd.f32 %v1082_v21, %v916_v52 }
 0x10e   : > { %v951_v20 = vadd.f32 %v950_v14, %v834_v50  ;;  %v2587_v29 = vpop.f32.mrf.mxu0 }
 0x10f   : > { %v2580_v25 = vpop.f32.mrf.mxu1  ;;  %v3323_v33 = vadd.f32 %v2587_v29, %v927_v54 }
 0x110   : > { %v972_v27 = vadd.f32 %v2580_v25, %v2562_v57  ;;  %v1085_v18 = vpop.f32.mrf.mxu0 }
 0x111   : > { %v963_v31 = vpop.f32.mrf.mxu1  ;;  %v3325_v19 = vadd.f32 %v1085_v18, %v919_v3 }
 0x112   : > { %v964_v59 = vadd.f32 %v963_v31, %v847_v61  ;;  %v2590_v36 = vpop.f32.mrf.mxu0 }
 0x113   : > { %v2581_v34 = vpop.f32.mrf.mxu1  ;;  %v3327_v24 = vadd.f32 %v2590_v36, %v940_v63 }
 0x114   : > { %v975_v35 = vadd.f32 %v2581_v34, %v2563_v10  ;;  %v1098_v39 = vpop.f32.mrf.mxu0 }
 0x115   : > { %v966_v55 = vpop.f32.mrf.mxu1  ;;  %v3331_v41 = vadd.f32 %v1098_v39, %v932_v2 }
 0x116   : > { %v967_v40 = vadd.f32 %v966_v55, %v850_v17  ;;  %v2591_v38 = vpop.f32.mrf.mxu0 }
 0x117   : > { %v3329_v42 = vpop.f32.mrf.mxu1  ;;  %v3335_v43 = vadd.f32 %v2591_v38, %v943_v7 }
 0x118   : > { %v1101_v26 = vpop.f32.mrf.mxu0 }
 0x119   : > { %v3333_v9 = vpop.f32.mrf.mxu1  ;;  %v3339_v44 = vadd.f32 %v1101_v26, %v935_v13 }
 0x11a   : > { %v2594_v50 = vpop.f32.mrf.mxu0 }
 0x11b   : > { %v3337_v32 = vpop.f32.mrf.mxu1  ;;  %v3343_v61 = vadd.f32 %v2594_v50, %v956_v4 }
 0x11c   : > { %v1114_v10 = vpop.f32.mrf.mxu0 }
 0x11d   : > { %v3341_v57 = vpop.f32.mrf.mxu1  ;;  %v3347_v23 = vadd.f32 %v1114_v10, %v948_v28 }
 0x11e   : > { %v2595_v47 = vpop.f32.mrf.mxu0 }
 0x11f   : > { %v3345_v17 = vpop.f32.mrf.mxu1  ;;  %v3351_v37 = vadd.f32 %v2595_v47, %v959_v11 }
 0x120   : > { %v1117_v45 = vpop.f32.mrf.mxu0 }
 0x121   : > { %v3349_v16 = vpop.f32.mrf.mxu1  ;;  %v3355_v49 = vadd.f32 %v1117_v45, %v951_v20 }
 0x122   : > { %v2598_v51 = vpop.f32.mrf.mxu0 }
 0x123   : > { %v3353_v46 = vpop.f32.mrf.mxu1  ;;  %v3359_v48 = vadd.f32 %v2598_v51, %v972_v27 }
 0x124   : > { %v1130_v53 = vpop.f32.mrf.mxu0 }
 0x125   : > { %v3357_v52 = vpop.f32.mrf.mxu1  ;;  %v3363_v56 = vadd.f32 %v1130_v53, %v964_v59 }
 0x126   : > { %v2599_v58 = vpop.f32.mrf.mxu0 }
 0x127   : > { %v3361_v54 = vpop.f32.mrf.mxu1  ;;  %v3367_v60 = vadd.f32 %v2599_v58, %v975_v35 }
 0x128   : > { %v1133_v62 = vpop.f32.mrf.mxu0 }
 0x129   : > { %v3365_v3 = vpop.f32.mrf.mxu1  ;;  %v3371_v0 = vadd.f32 %v1133_v62, %v967_v40 }
 0x12a   : > { %v3373_v1 = vpop.f32.mrf.mxu0 }
 0x12b   : > { %v3369_v63 = vpop.f32.mrf.mxu1 }
 0x12c   : > { %v3377_v4 = vpop.f32.mrf.mxu0 }
 0x12d   : > { %v3375_v2 = vpop.f32.mrf.mxu1 }
 0x12e   : > { %v2623_v6 = vpop.f32.mrf.mxu0 }
 0x12f   : > { %v3379_v5 = vpop.f32.mrf.mxu1 }
 0x130   : > { %v3383_v28 = vpop.f32.mrf.mxu0 }
 0x131   : > { %v3381_v7 = vpop.f32.mrf.mxu1 }
 0x132   : > { %v3387_v30 = vpop.f32.mrf.mxu0 }
 0x133   : > { %v3385_v8 = vpop.f32.mrf.mxu1 }
 0x134   : > { %v3391_v11 = vpop.f32.mrf.mxu0 }
 0x135   : > { %v3389_v13 = vpop.f32.mrf.mxu1 }
 0x136   : > { %v3393_v14 = vpop.f32.mrf.mxu0 }
 0x137   : > { %v2640_v12 = vpop.f32.mrf.mxu1 }
 0x138   : > { %v3395_v21 = vpop.f32.mrf.mxu0 }
 0x139   : > { %v1461_v20 = vpop.f32.mrf.mxu1  ;;  %3609 = vst [vmem:[#allocation2_spill] sm:$0xff] %v3395_v21 }
 0x13a   : > { %v3397_v27 = vpop.f32.mrf.mxu0 }
 0x13b   : > { %v2641_v25 = vpop.f32.mrf.mxu1  ;;  %3610 = vst [vmem:[#allocation3_spill] sm:$0xff] %v3397_v27 }
 0x13c   : > { %v3401_v31 = vpop.f32.mrf.mxu0 }
 0x13d   : > { %v3399_v29 = vpop.f32.mrf.mxu1  ;;  %3611 = vst [vmem:[#allocation4_spill] sm:$0xff] %v3401_v31 }
 0x13e   : > { %v3405_v18 = vpop.f32.mrf.mxu0 }
 0x13f   : > { %v3403_v59 = vpop.f32.mrf.mxu1  ;;  %3612 = vst [vmem:[#allocation5_spill] sm:$0xff] %v3405_v18 }
 0x140   : > { %v3409_v35 = vpop.f32.mrf.mxu0 }
 0x141   : > { %v3407_v34 = vpop.f32.mrf.mxu1  ;;  %3613 = vst [vmem:[#allocation6_spill] sm:$0xff] %v3409_v35 }
 0x142   : > { %v3413_v55 = vpop.f32.mrf.mxu0 }
 0x143   : > { %v3411_v36 = vpop.f32.mrf.mxu1  ;;  %3614 = vst [vmem:[#allocation7_spill] sm:$0xff] %v3413_v55 }
 0x144   : > { %v3417_v39 = vpop.f32.mrf.mxu0 }
 0x145   : > { %v3415_v40 = vpop.f32.mrf.mxu1  ;;  %3616 = vst [vmem:[#allocation9_spill] sm:$0xff] %v3417_v39 }
 0x146   : > { %3615 = vst [vmem:[#allocation8_spill] sm:$0xff] %v3415_v40  ;;  %v3421_v26 = vpop.f32.mrf.mxu0 }
 0x147   : > { %v3419_v38 = vpop.f32.mrf.mxu1  ;;  %3618 = vst [vmem:[#allocation11_spill] sm:$0xff] %v3421_v26 }
 0x148   : > { %3617 = vst [vmem:[#allocation10_spill] sm:$0xff] %v3419_v38  ;;  %v3425_v10 = vpop.f32.mrf.mxu0 }
 0x149   : > { %v3423_v50 = vpop.f32.mrf.mxu1  ;;  %3620 = vst [vmem:[#allocation13_spill] sm:$0xff] %v3425_v10 }
 0x14a   : > { %3619 = vst [vmem:[#allocation12_spill] sm:$0xff] %v3423_v50  ;;  %v2658_v45 = vpop.f32.mrf.mxu0 }
 0x14b   : > { %v3427_v47 = vpop.f32.mrf.mxu1 }
 0x14c   : > { %3621 = vst [vmem:[#allocation14_spill] sm:$0xff] %v3427_v47  ;;  %v1582_v53 = vpop.f32.mrf.mxu0 }
 0x14d   : > { %v3429_v51 = vpop.f32.mrf.mxu1 }
 0x14e   : > { %3622 = vst [vmem:[#allocation15_spill] sm:$0xff] %v3429_v51  ;;  %v2659_v62 = vpop.f32.mrf.mxu0 }
 0x14f   : > { %v3431_v58 = vpop.f32.mrf.mxu1 }
 0x150   : > { %3623 = vst [vmem:[#allocation16_spill] sm:$0xff] %v3431_v58  ;;  %v1585_v39 = vpop.f32.mrf.mxu0 }
 0x151   : > { %v3433_v55 = vpop.f32.mrf.mxu1 }
 0x152   : > { %3624 = vst [vmem:[#allocation17_spill] sm:$0xff] %v3433_v55  ;;  %v3437_v38 = vpop.f32.mrf.mxu0 }
 0x153   : > { %v3435_v35 = vpop.f32.mrf.mxu1  ;;  %3626 = vst [vmem:[#allocation19_spill] sm:$0xff] %v3437_v38 }
 0x154   : > { %3625 = vst [vmem:[#allocation18_spill] sm:$0xff] %v3435_v35  ;;  %v3441_v50 = vpop.f32.mrf.mxu0 }
 0x155   : > { %v3439_v26 = vpop.f32.mrf.mxu1  ;;  %3628 = vst [vmem:[#allocation21_spill] sm:$0xff] %v3441_v50 }
 0x156   : > { %3627 = vst [vmem:[#allocation20_spill] sm:$0xff] %v3439_v26  ;;  %v3443_v47 = vpop.f32.mrf.mxu0 }
 0x157   : > { %v2676_v10 = vpop.f32.mrf.mxu1  ;;  %3629 = vst [vmem:[#allocation22_spill] sm:$0xff] %v3443_v47 }
 0x158   : > { %v3445_v51 = vpop.f32.mrf.mxu0 }
 0x159   : > { %v1714_v40 = vpop.f32.mrf.mxu1  ;;  %3630 = vst [vmem:[#allocation23_spill] sm:$0xff] %v3445_v51 }
 0x15a   : > { %v3447_v58 = vpop.f32.mrf.mxu0 }
 0x15b   : > { %v2677_v18 = vpop.f32.mrf.mxu1  ;;  %3631 = vst [vmem:[#allocation24_spill] sm:$0xff] %v3447_v58  ;;  %v1268_v58 = vadd.f32 %v3329_v42, %v3319_v15  ;;  %v1270_v15 = vadd.f32 %v3349_v16, %v3331_v41  ;;  %v1274_v41 = vadd.f32 %v3365_v3, %v3347_v23  ;;  %v3506_v23 = vadd.f32 %v3381_v7, %v3363_v56 }
 0x15c   : > { %v3449_v55 = vpop.f32.mrf.mxu0 }
 0x15d   : > { %v1717_v31 = vpop.f32.mrf.mxu1  ;;  %3632 = vst [vmem:[#allocation25_spill] sm:$0xff] %v3449_v55  ;;  %v1266_v55 = vadd.f32 %v3333_v9, %v3321_v22  ;;  %v1273_v22 = vadd.f32 %v3353_v46, %v3335_v43  ;;  %v1277_v43 = vadd.f32 %v3369_v63, %v3351_v37 }
 0x15e   : > { %v3453_v35 = vpop.f32.mrf.mxu0 }
 0x15f   : > { %v3451_v27 = vpop.f32.mrf.mxu1  ;;  %3634 = vst [vmem:[#allocation27_spill] sm:$0xff] %v3453_v35  ;;  %v1269_v35 = vadd.f32 %v3337_v32, %v3323_v33 }
 0x160   : > { %3633 = vst [vmem:[#allocation26_spill] sm:$0xff] %v3451_v27  ;;  %v3457_v26 = vpop.f32.mrf.mxu0 }
 0x161   : > { %v3455_v38 = vpop.f32.mrf.mxu1  ;;  %3635 = vst [vmem:[#allocation28_spill] sm:$0xff] %v3457_v26  ;;  %v1267_v26 = vadd.f32 %v3341_v57, %v3325_v19 }
 0x162   : > { %v3461_v47 = vpop.f32.mrf.mxu0 }
 0x163   : > { %v3459_v21 = vpop.f32.mrf.mxu1  ;;  %3637 = vst [vmem:[#allocation30_spill] sm:$0xff] %v3461_v47  ;;  %v1400_v47 = vadd.f32 %v3373_v1, %v1268_v58  ;;  %v1399_v19 = vadd.f32 %v3383_v28, %v1267_v26  ;;  %v1271_v1 = vadd.f32 %v3357_v52, %v3339_v44  ;;  %v1402_v28 = vadd.f32 %v3391_v11, %v1270_v15  ;;  %v3645_v26 = vld [vmem:[#allocation22_spill] sm:$0xff] }
 0x164   : > { %3636 = vst [vmem:[#allocation29_spill] sm:$0xff] %v3459_v21  ;;  %v3463_v50 = vpop.f32.mrf.mxu0  ;;  %v1401_v21 = vadd.f32 %v2623_v6, %v1269_v35  ;;  %v1275_v44 = vadd.f32 %v3375_v2, %v3355_v49  ;;  %v1281_v49 = vadd.f32 %v3385_v8, %v3367_v60 }
 0x165   : > { %3638 = vst [vmem:[#allocation31_spill] sm:$0xff] %v3463_v50  ;;  %v3465_v51 = vpop.f32.mrf.mxu1  ;;  %v1398_v50 = vadd.f32 %v3377_v4, %v1266_v55  ;;  %v1526_v9 = vadd.f32 %v2640_v12, %v1400_v47  ;;  %v1525_v16 = vadd.f32 %v3399_v29, %v1399_v19  ;;  %v3643_v55 = vld [vmem:[#allocation4_spill] sm:$0xff] }
 0x166   : > { %3639 = vst [vmem:[#allocation32_spill] sm:$0xff] %v3465_v51  ;;  %v3473_v27 = vpop.f32.mrf.mxu0  ;;  %v1272_v51 = vadd.f32 %v3345_v17, %v3327_v24  ;;  %v1527_v57 = vadd.f32 %v2641_v25, %v1401_v21  ;;  %v1276_v24 = vadd.f32 %v3361_v54, %v3343_v61  ;;  %v1280_v61 = vadd.f32 %v3379_v5, %v3359_v48 }
 0x167   : > { %v3487_v42 = vpop.f32.mrf.mxu1  ;;  %v1524_v32 = vadd.f32 %v1461_v20, %v1398_v50  ;;  %v1647_v46 = vadd.f32 %v2658_v45, %v1526_v9  ;;  %v1646_v54 = vadd.f32 %v1585_v39, %v1525_v16  ;;  %v1405_v20 = vadd.f32 %v3393_v14, %v1273_v22  ;;  %v3647_v22 = vld [vmem:[#allocation8_spill] sm:$0xff]  ;;  %v3648_v9 = vld [vmem:[#allocation26_spill] sm:$0xff] }
 0x168   : > { %v3485_v33 = vpop.f32.mrf.mxu0  ;;  %v1648_v6 = vadd.f32 %v2659_v62, %v1527_v57  ;;  %v1404_v11 = vadd.f32 %v3387_v30, %v1272_v51  ;;  %v1528_v48 = vadd.f32 %v3407_v34, %v1402_v28  ;;  %v3517_v25 = vadd.f32 %v3389_v13, %v3371_v0  ;;  %v3642_v0 = vld [vmem:[#allocation3_spill] sm:$0xff]  ;;  %v3646_v62 = vld [vmem:[#allocation5_spill] sm:$0xff] }
 0x169   : > { %v1645_v4 = vadd.f32 %v1582_v53, %v1524_v32  ;;  %v3508_v37 = vpop.f32.mrf.mxu1  ;;  %v1779_v3 = vadd.f32 %v2676_v10, %v1647_v46  ;;  %v1778_v56 = vadd.f32 %v1717_v31, %v1646_v54  ;;  %v1531_v30 = vadd.f32 %v3411_v36, %v1405_v20  ;;  %v3641_v31 = vld [vmem:[#allocation2_spill] sm:$0xff]  ;;  %v3651_v28 = vld [vmem:[#allocation7_spill] sm:$0xff] }
 0x16a   : > { %v2694_v17 = vpop.f32.mrf.mxu0  ;;  %v1780_v12 = vadd.f32 %v2677_v18, %v1648_v6  ;;  %v1530_v29 = vadd.f32 %v3403_v59, %v1404_v11  ;;  %v3640_v18 = vld [vmem:[#allocation21_spill] sm:$0xff]  ;;  %v1403_v34 = vadd.f32 %v3641_v31, %v1271_v1  ;;  %v1408_v13 = vadd.f32 %v3642_v0, %v1276_v24  ;;  %v3652_v54 = vld [vmem:[#allocation23_spill] sm:$0xff] }
 0x16b   : > { %v1777_v63 = vadd.f32 %v1714_v40, %v1645_v4  ;;  %v1905_v5 = vadd.f32 %v2694_v17, %v1779_v3  ;;  %v1649_v14 = vadd.f32 %v3640_v18, %v1528_v48  ;;  %v3529_v8 = vpop.f32.mrf.mxu1  ;;  %v1406_v36 = vadd.f32 %v3643_v55, %v1274_v41  ;;  %v3644_v40 = vld [vmem:[#allocation19_spill] sm:$0xff]  ;;  %v3649_v57 = vld [vmem:[#allocation29_spill] sm:$0xff]  ;;  %v3650_v4 = vld [vmem:[#allocation6_spill] sm:$0xff] }
 0x16c   : > { %v1840_v52 = vpop.f32.mrf.mxu0  ;;  %v1651_v39 = vadd.f32 %v3644_v40, %v1530_v29  ;;  %v1652_v50 = vadd.f32 %v3645_v26, %v1531_v30  ;;  %v1409_v15 = vadd.f32 %v3646_v62, %v1277_v43  ;;  %v1529_v19 = vadd.f32 %v3647_v22, %v1403_v34  ;;  %v3655_v30 = vld [vmem:[#allocation14_spill] sm:$0xff]  ;;  %v3659_v40 = vld [vmem:[#allocation25_spill] sm:$0xff]  ;;  %v3660_v26 = vld [vmem:[#allocation15_spill] sm:$0xff] }
 0x16d   : > { %v1903_v7 = vadd.f32 %v1840_v52, %v1777_v63  ;;  %v1781_v10 = vadd.f32 %v3455_v38, %v1649_v14  ;;  %v1749_v41 = vpop.f32.mrf.mxu1  ;;  %v2022_v17 = vmul.f32 %v1905_v5, %v1905_v5  ;;  %v1407_v6 = vadd.f32 %v3650_v4, %v1275_v44  ;;  %v3656_v18 = vld [vmem:[#allocation32_spill] sm:$0xff] }
 0x16e   : > { %v2695_v2 = vpop.f32.mrf.mxu0  ;;  %v1783_v32 = vadd.f32 %v3648_v9, %v1651_v39  ;;  %v1784_v1 = vadd.f32 %v3649_v57, %v1652_v50  ;;  %v1412_v52 = vadd.f32 %v3651_v28, %v1280_v61  ;;  %v1650_v3 = vadd.f32 %v3652_v54, %v1529_v19  ;;  %v3663_v19 = vld [vmem:[#allocation13_spill] sm:$0xff] }
 0x16f   : > { %v1906_v21 = vadd.f32 %v2695_v2, %v1780_v12  ;;  %v2020_v45 = vmul.f32 %v1903_v7, %v1903_v7  ;;  %v3653_v2 = vld [vmem:[#allocation10_spill] sm:$0xff]  ;;  %v1533_v50 = vadd.f32 %v3660_v26, %v1407_v6  ;;  %v1411_v9 = vadd.f32 %v3663_v19, %v3517_v25 }
 0x170   : > { %v1843_v60 = vpop.f32.mrf.mxu0  ;;  %v1782_v14 = vadd.f32 %v3656_v18, %v1650_v3 }
 0x171   : > { %v2426_v35 = vpack.c.bf16 %v1906_v21, %v1905_v5  ;;  %v1904_v59 = vadd.f32 %v1843_v60, %v1778_v56  ;;  %v2023_v43 = vmul.f32 %v1906_v21, %v1906_v21  ;;  %v1534_v56 = vadd.f32 %v3653_v2, %v1408_v13  ;;  %v2688_v60 = vpop.f32.mrf.mxu1 }
 0x172   : > { %v2698_v47 = vpop.f32.mrf.mxu0 }
 0x173   : > { %2458 = vst [vmem:[%s3527_s28 + $0x8] sm:$0xff] %v2426_v35   ;;  %v2421_v51 = vpack.c.bf16 %v1904_v59, %v1903_v7  ;;  %v1999_v53 = vadd.f32 %v1904_v59, %v1903_v7  ;;  %v2021_v58 = vmul.f32 %v1904_v59, %v1904_v59  ;;  %v1909_v11 = vadd.f32 %v2698_v47, %v1783_v32  ;;  %v3654_v7 = vld [vmem:[#allocation12_spill] sm:$0xff]  ;;  %v3657_v35 = vld [vmem:[#allocation9_spill] sm:$0xff]  ;;  %v1762_v22 = vpop.f32.mrf.mxu1 }
 0x174   : > { %v1856_v24 = vpop.f32.mrf.mxu0  ;;  %v1532_v29 = vadd.f32 %v3654_v7, %v1406_v36  ;;  %v1410_v59 = vadd.f32 %v3657_v35, %v3506_v23  ;;  %v3664_v32 = vld [vmem:[#allocation28_spill] sm:$0xff] }
 0x175   : > { %2422 = vst [vmem:[%s3527_s28] sm:$0xff] %v2421_v51   ;;  %v2000_v16 = vadd.f32 %v1999_v53, %v1905_v5  ;;  %v2036_v38 = vadd.f32 %v2021_v58, %v2020_v45  ;;  %v1907_v46 = vadd.f32 %v1856_v24, %v1781_v10  ;;  %v1535_v5 = vadd.f32 %v3655_v30, %v1409_v15  ;;  %v3661_v10 = vld [vmem:[#allocation24_spill] sm:$0xff]  ;;  %v3662_v45 = vld [vmem:[#allocation27_spill] sm:$0xff] }
 0x176   : > { %v2699_v63 = vpop.f32.mrf.mxu0  ;;  %v1653_v13 = vadd.f32 %v3659_v40, %v1532_v29  ;;  %v1655_v47 = vadd.f32 %v3661_v10, %v1534_v56  ;;  %v1654_v57 = vadd.f32 %v3664_v32, %v1533_v50  ;;  %v3668_v7 = vld [vmem:[#allocation20_spill] sm:$0xff] }
 0x177   : > { %v2037_v12 = vadd.f32 %v2036_v38, %v2022_v17  ;;  %v2001_v20 = vadd.f32 %v2000_v16, %v1906_v21  ;;  %v1910_v48 = vadd.f32 %v2699_v63, %v1784_v1  ;;  %v2024_v31 = vmul.f32 %v1907_v46, %v1907_v46  ;;  %v3658_v21 = vld [vmem:[#allocation11_spill] sm:$0xff] }
 0x178   : > { %v1859_v44 = vpop.f32.mrf.mxu0  ;;  %v1413_v55 = vadd.f32 %v3658_v21, %v1281_v49  ;;  %v1656_v51 = vadd.f32 %v3662_v45, %v1535_v5  ;;  %v1785_v58 = vadd.f32 %v3508_v37, %v1653_v13  ;;  %v1787_v1 = vadd.f32 %v3487_v42, %v1655_v47  ;;  %v2689_v42 = vpop.f32.mrf.mxu1  ;;  %v3669_v5 = vld [vmem:[#allocation31_spill] sm:$0xff] }
 0x179   : > { %v2002_v61 = vadd.f32 %v2001_v20, %v1907_v46  ;;  %v2038_v34 = vadd.f32 %v2037_v12, %v2023_v43  ;;  %v2436_v0 = vpack.c.bf16 %v1910_v48, %v1909_v11  ;;  %v1908_v39 = vadd.f32 %v1859_v44, %v1782_v14  ;;  %v3666_v43 = vld [vmem:[#allocation17_spill] sm:$0xff] }
 0x17a   : > { %v2702_v36 = vpop.f32.mrf.mxu0  ;;  %v1788_v24 = vadd.f32 %v3529_v8, %v1656_v51  ;;  %v2026_v17 = vmul.f32 %v1909_v11, %v1909_v11  ;;  %v1786_v28 = vadd.f32 %v1749_v41, %v1654_v57  ;;  %v1536_v63 = vadd.f32 %v3666_v43, %v1410_v59  ;;  %v3667_v8 = vld [vmem:[#allocation18_spill] sm:$0xff]  ;;  %v1765_v21 = vpop.f32.mrf.mxu1 }
 0x17b   : > { %v2039_v53 = vadd.f32 %v2038_v34, %v2024_v31  ;;  %2460 = vst [vmem:[%s3527_s28 + $0x18] sm:$0xff] %v2436_v0   ;;  %v2431_v62 = vpack.c.bf16 %v1908_v39, %v1907_v46  ;;  %v2003_v15 = vadd.f32 %v2002_v61, %v1908_v39  ;;  %v2025_v23 = vmul.f32 %v1908_v39, %v1908_v39  ;;  %v3665_v46 = vld [vmem:[#allocation16_spill] sm:$0xff]  ;;  %v3670_v61 = vld [vmem:[#allocation30_spill] sm:$0xff] }
 0x17c   : > { %v1872_v49 = vpop.f32.mrf.mxu0  ;;  %v1538_v6 = vadd.f32 %v3665_v46, %v1412_v52  ;;  %v1913_v54 = vadd.f32 %v2702_v36, %v1787_v1  ;;  %v2027_v25 = vmul.f32 %v1910_v48, %v1910_v48  ;;  %v1539_v56 = vadd.f32 %v3667_v8, %v1413_v55 }
 0x17d   : > { %2459 = vst [vmem:[%s3527_s28 + $0x10] sm:$0xff] %v2431_v62   ;;  %v2004_v16 = vadd.f32 %v2003_v15, %v1909_v11  ;;  %v2040_v38 = vadd.f32 %v2039_v53, %v2025_v23  ;;  %v1911_v4 = vadd.f32 %v1872_v49, %v1785_v58  ;;  %v1537_v11 = vadd.f32 %v3668_v7, %v1411_v9 }
 0x17e   : > { %v2703_v37 = vpop.f32.mrf.mxu0  ;;  %v1657_v18 = vadd.f32 %v3669_v5, %v1536_v63  ;;  %v1659_v31 = vadd.f32 %v3670_v61, %v1538_v6  ;;  %v1660_v34 = vadd.f32 %v3473_v27, %v1539_v56  ;;  %v2030_v26 = vmul.f32 %v1913_v54, %v1913_v54 }
 0x17f   : > { %v1914_v3 = vadd.f32 %v2703_v37, %v1788_v24  ;;  %v2041_v12 = vadd.f32 %v2040_v38, %v2026_v17  ;;  %v2005_v20 = vadd.f32 %v2004_v16, %v1910_v48  ;;  %v2028_v41 = vmul.f32 %v1911_v4, %v1911_v4 }
 0x180   : > { %v1875_v2 = vpop.f32.mrf.mxu0  ;;  %v1789_v35 = vadd.f32 %v1762_v22, %v1657_v18  ;;  %v1658_v13 = vadd.f32 %v3485_v33, %v1537_v11  ;;  %v1791_v39 = vadd.f32 %v2688_v60, %v1659_v31  ;;  %v1792_v36 = vadd.f32 %v2689_v42, %v1660_v34 }
 0x181   : > { %v2446_v29 = vpack.c.bf16 %v1914_v3, %v1913_v54  ;;  %v1912_v30 = vadd.f32 %v1875_v2, %v1786_v28  ;;  %v2006_v52 = vadd.f32 %v2005_v20, %v1911_v4  ;;  %v2042_v14 = vadd.f32 %v2041_v12, %v2027_v25 }
 0x182   : > { %v2706_v44 = vpop.f32.mrf.mxu0  ;;  %v1790_v27 = vadd.f32 %v1765_v21, %v1658_v13  ;;  %v2031_v58 = vmul.f32 %v1914_v3, %v1914_v3 }
 0x183   : > { %2462 = vst [vmem:[%s3527_s28 + $0x28] sm:$0xff] %v2446_v29   ;;  %v2441_v48 = vpack.c.bf16 %v1912_v30, %v1911_v4  ;;  %v2029_v0 = vmul.f32 %v1912_v30, %v1912_v30  ;;  %v2043_v59 = vadd.f32 %v2042_v14, %v2028_v41  ;;  %v2007_v55 = vadd.f32 %v2006_v52, %v1912_v30 }
 0x184   : > { %v1888_v40 = vpop.f32.mrf.mxu0  ;;  %v1917_v51 = vadd.f32 %v2706_v44, %v1791_v39 }
 0x185   : > { %2461 = vst [vmem:[%s3527_s28 + $0x20] sm:$0xff] %v2441_v48   ;;  %v2008_v50 = vadd.f32 %v2007_v55, %v1913_v54  ;;  %v2044_v10 = vadd.f32 %v2043_v59, %v2029_v0  ;;  %v1915_v47 = vadd.f32 %v1888_v40, %v1789_v35 }
 0x186   : > { %v2707_v45 = vpop.f32.mrf.mxu0  ;;  %v2034_v24 = vmul.f32 %v1917_v51, %v1917_v51 }
 0x187   : > { %v1918_v53 = vadd.f32 %v2707_v45, %v1792_v36  ;;  %v2045_v62 = vadd.f32 %v2044_v10, %v2030_v26  ;;  %v2009_v15 = vadd.f32 %v2008_v50, %v1914_v3  ;;  %v2032_v60 = vmul.f32 %v1915_v47, %v1915_v47 }
 0x188   : > { %v1891_v23 = vpop.f32.mrf.mxu0 }
 0x189   : > { %v2456_v22 = vpack.c.bf16 %v1918_v53, %v1917_v51  ;;  %v1916_v49 = vadd.f32 %v1891_v23, %v1790_v27  ;;  %v2010_v33 = vadd.f32 %v2009_v15, %v1915_v47  ;;  %v2046_v19 = vadd.f32 %v2045_v62, %v2031_v58 }
 0x18a   : > { %v2035_v38 = vmul.f32 %v1918_v53, %v1918_v53 }
 0x18b   : > { %2464 = vst [vmem:[%s3527_s28 + $0x38] sm:$0xff] %v2456_v22   ;;  %v2451_v9 = vpack.c.bf16 %v1916_v49, %v1915_v47  ;;  %v2033_v32 = vmul.f32 %v1916_v49, %v1916_v49  ;;  %v2047_v57 = vadd.f32 %v2046_v19, %v2032_v60  ;;  %v2011_v1 = vadd.f32 %v2010_v33, %v1916_v49 }
 0x18d   : > { %2463 = vst [vmem:[%s3527_s28 + $0x30] sm:$0xff] %v2451_v9   ;;  %v2012_v17 = vadd.f32 %v2011_v1, %v1917_v51  ;;  %v2048_v16 = vadd.f32 %v2047_v57, %v2033_v32 }
 0x18f   : > { %v2013_v4 = vadd.f32 %v2012_v17, %v1918_v53  ;;  %v2049_v37 = vadd.f32 %v2048_v16, %v2034_v24 }
 0x191   : > { %v2014_v46 = vrot.slane %v2013_v4, 4  ;;  %v2050_v6 = vadd.f32 %v2049_v37, %v2035_v38 }
 0x193   : > { %v2015_v28 = vadd.f32 %v2014_v46, %v2013_v4  ;;  %v2051_v54 = vrot.slane %v2050_v6, 4 }
 0x195   : > { %v2016_v3 = vrot.slane %v2015_v28, 2  ;;  %v2052_v43 = vadd.f32 %v2051_v54, %v2050_v6 }
 0x197   : > { %v2017_v63 = vadd.f32 %v2016_v3, %v2015_v28  ;;  %v2053_v25 = vrot.slane %v2052_v43, 2 }
 0x199   : > { %v2018_v12 = vrot.slane %v2017_v63, 1  ;;  %v2054_v20 = vadd.f32 %v2053_v25, %v2052_v43 }
 0x19b   : > { %v2055_v42 = vrot.slane %v2054_v20, 1  ;;  %v2019_v2 = vadd.f32 %v2018_v12, %v2017_v63 }
 0x19d   : > { %v2056_v8 = vadd.f32 %v2055_v42, %v2054_v20 }
 0x19f   : > { %v2058_v56 = vsel %vm613_vm1, %v2019_v2, %v2056_v8 }
 0x1a0   : > { %2059 = vst [vmem:[%s413_s9] sm:$0x3] %v2058_v56 }
 0x1a1 PF: > { %s16_s22 = sadd.s32 1, %s2806_s22   ;;  %s3671_s18 = smov %s2798_s20 }
 0x1a2   : > { %p13_p0 = scmp.ge.s32.totalorder %s16_s22, 6   ;;  %s3672_s19 = smov %s2802_s21 }
 0x1a3   : > { %s3673_s20 = smov %s3676_s23  ;;  %s3674_s21 = smov %s3680_s24 }
 0x1a4   :  { %15 = sbr.rel (!%p13_p0) target bundleno = 3 (0x3), region = 92 }

// kernel: conv_block_nested_forward.4
= control target key start
LH: loop header
LB: loop body
LE: loop exit
PB: predicated region body
PF: predicated region fallthrough
CT: control target
= control target key end

     0   :  { %s3848_s24 = smov 0   ;;  %s3850_s25 = smov 0   ;;  %s4663_s0 = inlined_call_operand.vmem [shape: bf16[2,16,16,128], index: 0, kind: input, shape index: {}, may-alias: {0,1,2}]   ;;  %s4664_s1 = inlined_call_operand.vmem [shape: bf16[2,16,16,128], index: 1, kind: input, shape index: {}, may-alias: {0,1,2}]   ;;  %s4665_s2 = inlined_call_operand.vmem [shape: bf16[2,16,16,128], index: 2, kind: input, shape index: {}, may-alias: {0,1,2}]   ;;  %s4666_s3 = inlined_call_operand.vmem [shape: f32[1,128], index: 3, kind: input, shape index: {}]   ;;  %s4667_s4 = inlined_call_operand.vmem [shape: f32[1,128], index: 4, kind: input, shape index: {}]   ;;  %s4668_s5 = inlined_call_operand.vmem [shape: bf16[9,128,128], index: 5, kind: input, shape index: {}]   ;;  %s4669_s6 = inlined_call_operand.vmem [shape: bf16[2,16,16,128], index: 6, kind: output, shape index: {0}]   ;;  %s4670_s7 = inlined_call_operand.vmem [shape: f32[2,2,2,128], index: 7, kind: output, shape index: {1}]  }
   0x1   :  { %s3852_s26 = smov 0   ;;  %s3854_s27 = smov 0  }
   0x2   :  { %s3856_s28 = smov 0  }
   0x3 LB: > { %s27_s29 = sadd.s32 1, %s3798_s26  ;;  %s30_s30 = sadd.s32 1, %s3802_s27  ;;  %s3806_s28 = sphi %s3856_s28, %s18_s28   ;;  %s3802_s27 = sphi %s3854_s27, %s4689_s27   ;;  %s3798_s26 = sphi %s3852_s26, %s4688_s26   ;;  %s3794_s25 = sphi %s3850_s25, %s4687_s25   ;;  %s3790_s24 = sphi %s3848_s24, %s4686_s24  }
   0x4   : > { %p28_p0 = scmp.ge.s32.totalorder %s27_s29, 2  ;;  %p2842_p1 = scmp.ge.s32.totalorder %s3806_s28, 1 }
   0x5   : > { %p328_p2 = scmp.lt.s32.totalorder %s3806_s28, 5 }
   0x6   : > { %s4691_s29 = smov (%p28_p0, %s27_s29), 0  ;;  %s4693_s30 = smov (!%p28_p0, %s30_s30), %s3802_s27 }
   0x7   : > { %p329_p3 = pnand %p2842_p1, %p328_p2  ;;  %p32_p4 = scmp.ge.s32.totalorder %s4693_s30, 2 }
   0x9   : > { %s4695_s30 = smov (%p32_p4, %s4693_s30), 0  ;;  %332 = sbr.rel (%p329_p3) target bundleno = 432 (0x1b0), region = 44 }
   0xe   : > { %v3696_v0 = vld [vmem:[%s4668_s5 + $0x38] sm:$0xff]   ;;  %s3884_s10 = sshll.u32 %s3790_s24, 3  ;;  %p405_p5 = scmp.lt.s32.totalorder %s3794_s25, 1  ;;  %v3698_v2 = vld [vmem:[%s4668_s5 + $0x30] sm:$0xff]   ;;  %v3700_v4 = vld [vmem:[%s4668_s5 + $0x28] sm:$0xff]   ;;  %vm719_vm0 = vcmask 1040384  }
   0xf   : > { %v3697_v1 = vld [vmem:[%s4668_s5 + $0x78] sm:$0xff]   ;;  %3384 = vmatprep.subr.bf16.mxu1 %v3696_v0  ;;  %p407_p6 = scmp.lt.s32.totalorder %s3884_s10, 15  ;;  %v3699_v3 = vld [vmem:[%s4668_s5 + $0x70] sm:$0xff]   ;;  %v3701_v5 = vld [vmem:[%s4668_s5 + $0x68] sm:$0xff]   ;;  %s2848_s9 = sadd.s32 4294967295, %s3884_s10  ;;  %vm1186_vm4 = vcmask 1046528  }
  0x10   : > { %3385 = vmatpush3.bf16.msra.mxu1 %v3696_v0  ;;  %3352 = vmatprep.subr.bf16.mxu0 %v3697_v1  ;;  %s4697_s25 = smov (!%p405_p5, %s3794_s25), 1  ;;  %v3702_v6 = vld [vmem:[%s4668_s5 + $0x20] sm:$0xff]   ;;  %p417_p7 = scmp.gt.s32.totalorder %s2848_s9, 0  ;;  %v3704_v8 = vld [vmem:[%s4668_s5 + $0x18] sm:$0xff]   ;;  %v3706_v10 = vld [vmem:[%s4668_s5 + $0x10] sm:$0xff]  }
  0x11   : > { %3386 = vmatprep.subr.bf16.mxu1 %v3698_v2  ;;  %3353 = vmatpush3.bf16.msra.mxu0 %v3697_v1  ;;  %s408_s19 = scalar_select %p407_p6, %s3884_s10, 15  ;;  %v3703_v7 = vld [vmem:[%s4668_s5 + $0x60] sm:$0xff]   ;;  %v3705_v9 = vld [vmem:[%s4668_s5 + $0x58] sm:$0xff]   ;;  %v3707_v11 = vld [vmem:[%s4668_s5 + $0x50] sm:$0xff]   ;;  %vm720_vm1 = vsmask.f32 256 }
  0x12   : > { %3354 = vmatprep.subr.bf16.mxu0 %v3699_v3  ;;  %s3906_s23 = sshll.u32 %s4697_s25, 5  ;;  %p2849_p8 = scmp.lt.s32.totalorder %s2848_s9, 15  ;;  %v3947_v13 = vld [vmem:[%s4666_s3] ss:$0 sm:$0xff]  ;;  %v3708_v16 = vld [vmem:[%s4668_s5 + $0x8] sm:$0xff]   ;;  %v3991_v47 = vld [vmem:[%s4668_s5 + $0xf8] sm:$0xff]  }
  0x13   : > { %s2844_s22 = sshll.u32 %s408_s19, 1  ;;  %s4699_s9 = smov (!%p417_p7, %s2848_s9), 0  ;;  %v3955_v17 = vld [vmem:[%s4667_s4] ss:$0 sm:$0xff]  ;;  %v3709_v23 = vld [vmem:[%s4668_s5 + $0x48] sm:$0xff]   ;;  %v3997_v49 = vld [vmem:[%s4668_s5 + $0xb8] sm:$0xff]  }
  0x14   : > { %3387 = vmatpush3.bf16.msra.mxu1 %v3698_v2  ;;  %s3909_s8 = sadd.s32 %s3906_s23, %s2844_s22  ;;  %s4701_s9 = smov (!%p2849_p8, %s4699_s9), 15  ;;  %v3710_v34 = vld [vmem:[%s4668_s5] sm:$0xff]   ;;  %vm4011_vm2 = vmand %vm719_vm0, %vm720_vm1  ;;  %vm758_vm3 = vsmask.f32 7424  ;;  %v3756_v0 = vld [vmem:[%s4668_s5 + $0x1c8] sm:$0xff]  }
  0x15   : > { %3388 = vmatprep.subr.bf16.mxu1 %v3700_v4  ;;  %3355 = vmatpush3.bf16.msra.mxu0 %v3699_v3  ;;  %s4671_s15 = sshll.u32 %s3909_s8, 2  ;;  %s2854_s11 = sshll.u32 %s4701_s9, 1  ;;  %v3711_v39 = vld [vmem:[%s4668_s5 + $0x40] sm:$0xff]  }
  0x16   : > { %3356 = vmatprep.subr.bf16.mxu0 %v3701_v5  ;;  %s3930_s22 = scalar_lea.vmem %s4663_s0, %s4671_s15  ;;  %p582_p9 = scmp.gt.s32.totalorder %s3790_s24, 0 }
  0x17   : > { %s425_s14 = sadd.s32 %s2854_s11, %s3906_s23  ;;  %v3115_v12 = vld [vmem:[%s3930_s22] sm:$0xff]   ;;  %v3194_v24 = vld [vmem:[%s3930_s22 + $0x8] sm:$0xff]   ;;  %v3195_v25 = vld [vmem:[%s3930_s22 + $0x10] sm:$0xff]   ;;  %p462_p11 = scmp.lt.s32.totalorder %s3790_s24, 1 }
  0x18   : > { %3389 = vmatpush3.bf16.msra.mxu1 %v3700_v4  ;;  %s2856_s18 = sshll.u32 %s425_s14, 2  ;;  %v3116_v14 = vunpack.c.l.bf16 %v3115_v12  ;;  %v3117_v15 = vunpack.c.h.bf16 %v3115_v12  ;;  %v3120_v30 = vunpack.c.l.bf16 %v3194_v24  ;;  %v3121_v31 = vunpack.c.h.bf16 %v3194_v24  ;;  %v3196_v48 = vld [vmem:[%s3930_s22 + $0x18] sm:$0xff]   ;;  %v4007_v57 = vld [vmem:[%s3930_s22 + $0x20] sm:$0xff]  }
  0x19   : > { %3390 = vmatprep.subr.bf16.mxu1 %v3702_v6  ;;  %3357 = vmatpush3.bf16.msra.mxu0 %v3701_v5  ;;  %s427_s9 = scalar_lea.vmem %s4664_s1, %s2856_s18  ;;  %v3124_v32 = vunpack.c.l.bf16 %v3195_v25  ;;  %v3125_v33 = vunpack.c.h.bf16 %v3195_v25  ;;  %v3128_v56 = vunpack.c.l.bf16 %v3196_v48  ;;  %v3129_v3 = vunpack.c.h.bf16 %v3196_v48 }
  0x1a   : > { %3358 = vmatprep.subr.bf16.mxu0 %v3703_v7  ;;  %v3147_v18 = vld [vmem:[%s427_s9] sm:$0xff]   ;;  %s583_s16 = scalar_select %p582_p9, 1, 0  ;;  %v509_v21 = vmul.f32 %v3116_v14, %v3947_v13  ;;  %v510_v22 = vmul.f32 %v3117_v15, %v3947_v13  ;;  %v511_v40 = vmul.f32 %v3120_v30, %v3947_v13  ;;  %v512_v41 = vmul.f32 %v3121_v31, %v3947_v13 }
  0x1b   : > { %v3148_v19 = vunpack.c.l.bf16 %v3147_v18  ;;  %v3149_v20 = vunpack.c.h.bf16 %v3147_v18  ;;  %v513_v42 = vmul.f32 %v3124_v32, %v3947_v13  ;;  %v514_v43 = vmul.f32 %v3125_v33, %v3947_v13  ;;  %s463_s15 = scalar_select %p462_p11, %s3790_s24, 1 }
  0x1c   : > { %3391 = vmatpush3.bf16.msra.mxu1 %v3702_v6  ;;  %s3964_s18 = scvt.s32.f32 %s583_s16  ;;  %v531_v28 = vadd.f32 %v3955_v17, %v509_v21  ;;  %v532_v29 = vadd.f32 %v3955_v17, %v510_v22  ;;  %v533_v50 = vadd.f32 %v3955_v17, %v511_v40  ;;  %v534_v51 = vadd.f32 %v3955_v17, %v512_v41 }
  0x1d   : > { %3392 = vmatprep.subr.bf16.mxu1 %v3704_v8  ;;  %3359 = vmatpush3.bf16.msra.mxu0 %v3703_v7  ;;  %v575_v26 = vmul.f32 %v3148_v19, %v3947_v13  ;;  %v576_v27 = vmul.f32 %v3149_v20, %v3947_v13  ;;  %v535_v52 = vadd.f32 %v3955_v17, %v513_v42 }
  0x1e   : > { %3360 = vmatprep.subr.bf16.mxu0 %v3705_v9  ;;  %s587_s19 = sshrl.u32 %s3964_s18, 16  ;;  %p586_p10 = scmp.ne.f32.partialorder %s3964_s18, %s3964_s18  ;;  %v547_v37 = vmax.f32 %v531_v28, 0.0  ;;  %v548_v38 = vmax.f32 %v532_v29, 0.0  ;;  %v536_v53 = vadd.f32 %v3955_v17, %v514_v43  ;;  %v549_v58 = vmax.f32 %v533_v50, 0.0 }
  0x1f   : > { %v577_v35 = vadd.f32 %v3955_v17, %v575_v26  ;;  %v578_v36 = vadd.f32 %v3955_v17, %v576_v27  ;;  %s588_s21 = sand.u32 1, %s587_s19  ;;  %v550_v59 = vmax.f32 %v534_v51, 0.0  ;;  %v551_v60 = vmax.f32 %v535_v52, 0.0  ;;  %v3198_v52 = vld [vmem:[%s3930_s22 + $0x28] sm:$0xff]   ;;  %s4680_s19 = sshll.u32 %s3909_s8, 2 }
  0x20   : > { %3393 = vmatpush3.bf16.msra.mxu1 %v3704_v8  ;;  %s589_s11 = sadd.s32 32767, %s588_s21  ;;  %v563_v46 = vpack.c.bf16 %v548_v38, %v547_v37  ;;  %v552_v61 = vmax.f32 %v536_v53, 0.0  ;;  %v515_v6 = vmul.f32 %v3128_v56, %v3947_v13  ;;  %v516_v20 = vmul.f32 %v3129_v3, %v3947_v13 }
  0x21   : > { %3394 = vmatprep.subr.bf16.mxu1 %v3706_v10  ;;  %3361 = vmatpush3.bf16.msra.mxu0 %v3705_v9  ;;  %v579_v44 = vmax.f32 %v577_v35, 0.0  ;;  %v580_v45 = vmax.f32 %v578_v36, 0.0  ;;  %s590_s14 = sadd.s32 %s589_s11, %s3964_s18  ;;  %v564_v1 = vpack.c.bf16 %v550_v59, %v549_v58  ;;  %s2868_s11 = sshll.u32 %s4697_s25, 1  ;;  %v3133_v36 = vunpack.c.h.bf16 %v4007_v57 }
  0x22   : > { %3362 = vmatprep.subr.bf16.mxu0 %v3707_v11  ;;  %s591_s17 = sand.u32 4294901760, %s590_s14  ;;  %v637_v54 = vshrl.u32 %v563_v46, 16  ;;  %v640_v55 = vshll.u32 %v563_v46, 16  ;;  %v565_v2 = vpack.c.bf16 %v552_v61, %v551_v60  ;;  %v537_v28 = vadd.f32 %v3955_v17, %v515_v6  ;;  %s4101_s20 = sadd.s32 %s2868_s11, %s463_s15 }
  0x23   : > { %s4703_s17 = smov (%p586_p10, %s591_s17), 2143289344  ;;  %v581_v62 = vpack.c.bf16 %v580_v45, %v579_v44  ;;  %v644_v9 = vshrl.u32 %v564_v1, 16  ;;  %v647_v14 = vshll.u32 %v564_v1, 16  ;;  %v538_v41 = vadd.f32 %v3955_v17, %v516_v20  ;;  %v3715_v20 = vld [vmem:[%s4668_s5 + $0xb0] sm:$0xff]   ;;  %s2869_s8 = sshll.u32 %s4101_s20, 1 }
  0x24   : > { %3395 = vmatpush3.bf16.msra.mxu1 %v3706_v10  ;;  %s594_s9 = sshrl.u32 %s4703_s17, 16  ;;  %v639_v63 = vrot.slane %v637_v54, 7  ;;  %v3132_v10 = vunpack.c.l.bf16 %v4007_v57  ;;  %v651_v15 = vshrl.u32 %v565_v2, 16  ;;  %v654_v24 = vshll.u32 %v565_v2, 16  ;;  %v3716_v2 = vld [vmem:[%s4668_s5 + $0xe8] sm:$0xff]  }
  0x25   : > { %3396 = vmatprep.subr.bf16.mxu1 %v3708_v16  ;;  %3363 = vmatpush3.bf16.msra.mxu0 %v3707_v11  ;;  %s595_s21 = sshll.u32 %s594_s9, 16  ;;  %v646_v19 = vrot.slane %v644_v9, 7  ;;  %v553_v45 = vmax.f32 %v537_v28, 0.0  ;;  %v554_v58 = vmax.f32 %v538_v41, 0.0  ;;  %v518_v60 = vmul.f32 %v3133_v36, %v3947_v13 }
  0x26   : > { %3364 = vmatprep.subr.bf16.mxu0 %v3709_v23  ;;  %s596_s18 = sor.u32 %s595_s21, %s594_s9  ;;  %v642_v4 = vor.u32 %v640_v55, %v639_v63  ;;  %v4018_v5 = vsel %vm4011_vm2, %v639_v63, 0  ;;  %v517_v59 = vmul.f32 %v3132_v10, %v3947_v13  ;;  %v3136_v63 = vunpack.c.l.bf16 %v3198_v52  ;;  %s3097_s9 = sadd.s32 8, %s3884_s10 }
  0x27   : > { %v597_v7 = vstv %s596_s18  ;;  %v779_v8 = vshll.u32 %v4018_v5, 16  ;;  %v649_v26 = vor.u32 %v647_v14, %v646_v19  ;;  %v4033_v27 = vsel %vm4011_vm2, %v646_v19, 0  ;;  %p4185_p12 = scmp.lt.s32.totalorder %s3097_s9, 15 }
  0x28   : > { %3397 = vmatpush3.bf16.msra.mxu1 %v3708_v16  ;;  %v599_v11 = vmul.bf16 %v597_v7, %v581_v62  ;;  %v4026_v12 = vsel %vm4011_vm2, 0, %v642_v4  ;;  %v791_v35 = vshll.u32 %v4033_v27, 16  ;;  %v3137_v1 = vunpack.c.h.bf16 %v3198_v52 }
  0x29   : > { %3398 = vmatprep.subr.bf16.mxu1 %v3710_v34  ;;  %3365 = vmatpush3.bf16.msra.mxu0 %v3709_v23  ;;  %v772_v16 = vshrl.u32 %v4026_v12, 16  ;;  %v774_v18 = vshll.u32 %v4026_v12, 16  ;;  %v653_v23 = vrot.slane %v651_v15, 7  ;;  %v781_v30 = vrot.slane %v779_v8, 1  ;;  %s4705_s9 = smov (!%p4185_p12, %s3097_s9), 15 }
  0x2a   : > { %3366 = vmatprep.subr.bf16.mxu0 %v3711_v39  ;;  %v630_v21 = vshrl.u32 %v599_v11, 16  ;;  %v633_v22 = vshll.u32 %v599_v11, 16  ;;  %v793_v56 = vrot.slane %v791_v35, 1  ;;  %v566_v4 = vpack.c.bf16 %v554_v58, %v553_v45  ;;  %v3199_v11 = vld [vmem:[%s3930_s22 + $0x30] sm:$0xff]   ;;  %s4707_s9 = smov (!%p4185_p12, %s4705_s9), 15 }
  0x2b   : > { %v776_v25 = vrot.slane %v774_v18, 1  ;;  %v656_v31 = vor.u32 %v654_v24, %v653_v23  ;;  %v4038_v32 = vsel %vm4011_vm2, %v653_v23, 0  ;;  %v539_v6 = vadd.f32 %v3955_v17, %v517_v59  ;;  %v3718_v24 = vld [vmem:[%s4668_s5 + $0xe0] sm:$0xff]   ;;  %s2861_s12 = sshll.u32 %s4707_s9, 1 }
  0x2c   : > { %3399 = vmatpush3.bf16.msra.mxu1 %v3710_v34  ;;  %v632_v29 = vrot.slane %v630_v21, 7  ;;  %v4043_v34 = vsel %vm4011_vm2, 0, %v649_v26  ;;  %v803_v44 = vshll.u32 %v4038_v32, 16  ;;  %v519_v9 = vmul.f32 %v3136_v63, %v3947_v13  ;;  %v3719_v63 = vld [vmem:[%s4668_s5 + $0xa0] sm:$0xff]  }
  0x2d   : > { %3448 = vmatprep.subr.bf16.mxu1 %v3991_v47  ;;  %3367 = vmatpush3.bf16.msra.mxu0 %v3711_v39  ;;  %v777_v33 = vor.u32 %v776_v25, %v772_v16  ;;  %v3714_v39 = vld [vmem:[%s4668_s5 + $0xf0] sm:$0xff]   ;;  %v4056_v40 = vsel %vm4011_vm2, 0, %v656_v31  ;;  %v786_v43 = vshll.u32 %v4043_v34, 16  ;;  %v784_v50 = vshrl.u32 %v4043_v34, 16 }
  0x2e   : > { %3416 = vmatprep.subr.bf16.mxu0 %v3997_v49  ;;  %v635_v37 = vor.u32 %v633_v22, %v632_v29  ;;  %v4049_v38 = vsel %vm4011_vm2, %v632_v29, 0  ;;  %v798_v51 = vshll.u32 %v4056_v40, 16  ;;  %v796_v57 = vshrl.u32 %v4056_v40, 16 }
  0x2f   : > { %v767_v42 = vshll.u32 %v4049_v38, 16  ;;  %v4068_v48 = vsel %vm758_vm3, %v777_v33, %v781_v30  ;;  %v788_v55 = vrot.slane %v786_v43, 1  ;;  %v520_v10 = vmul.f32 %v3137_v1, %v3947_v13 }
  0x30   : > { %v4065_v46 = vsel %vm4011_vm2, 0, %v635_v37  ;;  %v800_v3 = vrot.slane %v798_v51, 1  ;;  %v805_v14 = vrot.slane %v803_v44, 1  ;;  %v658_v15 = vshrl.u32 %v566_v4, 16  ;;  %v3720_v51 = vld [vmem:[%s4668_s5 + $0xd8] sm:$0xff]  }
  0x31   : > { %3400 = vmatprep.mubr.bf16.mxu1 %v4065_v46  ;;  %v760_v53 = vshrl.u32 %v4065_v46, 16  ;;  %v762_v54 = vshll.u32 %v4065_v46, 16  ;;  %v769_v62 = vrot.slane %v767_v42, 1  ;;  %v789_v8 = vor.u32 %v788_v55, %v784_v50  ;;  %v3717_v42 = vld [vmem:[%s4668_s5 + $0xa8] sm:$0xff]  }
  0x32   : > { %3401 = vmatmul.mubr.bf16.vlgmr.msra.gmra.mxu1 %v4026_v12  ;;  %v661_v16 = vshll.u32 %v566_v4, 16  ;;  %v555_v18 = vmax.f32 %v539_v6, 0.0  ;;  %v541_v22 = vadd.f32 %v3955_v17, %v519_v9  ;;  %v542_v23 = vadd.f32 %v3955_v17, %v520_v10  ;;  %v3722_v4 = vld [vmem:[%s4668_s5 + $0xd0] sm:$0xff]   ;;  %v3721_v10 = vld [vmem:[%s4668_s5 + $0x98] sm:$0xff]  }
  0x33   : > { %3449 = vmatpush3.bf16.msra.mxu1 %v3991_v47  ;;  %v764_v61 = vrot.slane %v762_v54, 1  ;;  %3404 = vmatprep.mubr.bf16.mxu1 %v4043_v34  ;;  %v540_v47 = vadd.f32 %v3955_v17, %v518_v60  ;;  %v801_v25 = vor.u32 %v800_v3, %v796_v57  ;;  %v660_v26 = vrot.slane %v658_v15, 7 }
  0x34   : > { %3450 = vmatprep.subr.bf16.mxu1 %v3714_v39  ;;  %v3140_v28 = vunpack.c.l.bf16 %v3199_v11  ;;  %v3141_v29 = vunpack.c.h.bf16 %v3199_v11  ;;  %v4108_v30 = vsel %vm758_vm3, %v789_v8, %v793_v56  ;;  %v557_v33 = vmax.f32 %v541_v22, 0.0 }
  0x35   : > { %v765_v7 = vor.u32 %v764_v61, %v760_v53  ;;  %v556_v21 = vmax.f32 %v540_v47, 0.0  ;;  %v558_v35 = vmax.f32 %v542_v23, 0.0  ;;  %v663_v36 = vor.u32 %v661_v16, %v660_v26 }
  0x36   : > { %v4114_v37 = vsel %vm4011_vm2, %v660_v26, 0  ;;  %v522_v41 = vmul.f32 %v3141_v29, %v3947_v13  ;;  %v4133_v54 = vsel %vm758_vm3, %v801_v25, %v805_v14 }
  0x37   : > { %v770_v19 = vsel %vm758_vm3, %v765_v7, %v769_v62  ;;  %3451 = vmatpush3.bf16.msra.mxu1 %v3714_v39  ;;  %v567_v31 = vpack.c.bf16 %v556_v21, %v555_v18  ;;  %v521_v39 = vmul.f32 %v3140_v28, %v3947_v13  ;;  %v568_v45 = vpack.c.bf16 %v558_v35, %v557_v33  ;;  %v3723_v33 = vld [vmem:[%s4668_s5 + $0x90] sm:$0xff]  }
  0x38   : > { %3368 = vmatprep.mubr.bf16.mxu0 %v770_v19  ;;  %3452 = vmatprep.subr.bf16.mxu1 %v3716_v2  ;;  %v4125_v50 = vsel %vm4011_vm2, 0, %v663_v36  ;;  %v544_v53 = vadd.f32 %v3955_v17, %v522_v41 }
  0x39   : > { %3369 = vmatmul.mubr.bf16.vlgmr.msra.gmra.mxu0 %v4068_v48  ;;  %v665_v43 = vshrl.u32 %v567_v31, 16  ;;  %v668_v44 = vshll.u32 %v567_v31, 16  ;;  %v543_v52 = vadd.f32 %v3955_v17, %v521_v39  ;;  %v808_v56 = vshrl.u32 %v4125_v50, 16 }
  0x3a   : > { %3417 = vmatpush3.bf16.msra.mxu0 %v3997_v49  ;;  %3405 = vmatmul.mubr.bf16.gmra.mxu1 %v4056_v40  ;;  %v815_v49 = vshll.u32 %v4114_v37, 16  ;;  %v810_v57 = vshll.u32 %v4125_v50, 16  ;;  %v672_v58 = vshrl.u32 %v568_v45, 16  ;;  %v675_v59 = vshll.u32 %v568_v45, 16 }
  0x3b   : > { %3418 = vmatprep.subr.bf16.mxu0 %v3715_v20  ;;  %3453 = vmatpush3.bf16.msra.mxu1 %v3716_v2  ;;  %v667_v55 = vrot.slane %v665_v43, 7  ;;  %v559_v60 = vmax.f32 %v543_v52, 0.0  ;;  %v560_v61 = vmax.f32 %v544_v53, 0.0 }
  0x3c   : > { %3372 = vmatprep.mubr.bf16.mxu0 %v4108_v30  ;;  %3454 = vmatprep.subr.bf16.mxu1 %v3718_v24  ;;  %v812_v1 = vrot.slane %v810_v57, 1  ;;  %v817_v2 = vrot.slane %v815_v49, 1  ;;  %v674_v47 = vrot.slane %v672_v58, 7  ;;  %v3725_v57 = vld [vmem:[%s4668_s5 + $0x88] sm:$0xff]  }
  0x3d   : > { %3408 = vmatprep.mubr.bf16.mxu1 %v4125_v50  ;;  %v670_v62 = vor.u32 %v668_v44, %v667_v55  ;;  %v4143_v3 = vsel %vm4011_vm2, %v667_v55, 0  ;;  %v569_v7 = vpack.c.bf16 %v560_v61, %v559_v60  ;;  %v3726_v44 = vld [vmem:[%s4668_s5 + $0xc0] sm:$0xff]   ;;  %v3728_v61 = vld [vmem:[%s4668_s5 + $0x178] sm:$0xff]  }
  0x3e   : > { %3419 = vmatpush3.bf16.msra.mxu0 %v3715_v20  ;;  %v827_v6 = vshll.u32 %v4143_v3, 16  ;;  %v813_v9 = vor.u32 %v812_v1, %v808_v56  ;;  %v677_v15 = vor.u32 %v675_v59, %v674_v47  ;;  %v3724_v20 = vld [vmem:[%s4668_s5 + $0xc8] sm:$0xff]   ;;  %v4169_v21 = vsel %vm4011_vm2, %v674_v47, 0  ;;  %v3727_v47 = vld [vmem:[%s4668_s5 + $0x80] sm:$0xff]  }
  0x3f   : > { %3420 = vmatprep.subr.bf16.mxu0 %v3717_v42  ;;  %3455 = vmatpush3.bf16.msra.mxu1 %v3718_v24  ;;  %v4152_v8 = vsel %vm4011_vm2, 0, %v670_v62  ;;  %v679_v18 = vshrl.u32 %v569_v7, 16  ;;  %v682_v19 = vshll.u32 %v569_v7, 16  ;;  %v839_v25 = vshll.u32 %v4169_v21, 16 }
  0x40   : > { %3456 = vmatprep.subr.bf16.mxu1 %v3720_v51  ;;  %v820_v11 = vshrl.u32 %v4152_v8, 16  ;;  %v822_v14 = vshll.u32 %v4152_v8, 16  ;;  %v4162_v16 = vsel %vm758_vm3, %v813_v9, %v817_v2  ;;  %v829_v23 = vrot.slane %v827_v6, 1 }
  0x41   : > { %3373 = vmatmul.mubr.bf16.gmra.mxu0 %v4133_v54  ;;  %v4174_v24 = vsel %vm4011_vm2, 0, %v677_v15  ;;  %v681_v26 = vrot.slane %v679_v18, 7  ;;  %v841_v39 = vrot.slane %v839_v25, 1  ;;  %v1188_v1 = vrot.slane %v4049_v38, 1  ;;  %v3730_v38 = vld [vmem:[%s4668_s5 + $0x170] sm:$0xff]   ;;  %v3734_v25 = vld [vmem:[%s4668_s5 + $0x160] sm:$0xff]  }
  0x42   : > { %3421 = vmatpush3.bf16.msra.mxu0 %v3717_v42  ;;  %3409 = vmatmul.mubr.bf16.gmra.mxu1 %v4152_v8  ;;  %v824_v22 = vrot.slane %v822_v14, 1  ;;  %v832_v28 = vshrl.u32 %v4174_v24, 16  ;;  %v834_v29 = vshll.u32 %v4174_v24, 16  ;;  %v3200_v42 = vld [vmem:[%s3930_s22 + $0x38] sm:$0xff]   ;;  %v1191_v9 = vrot.slane %v4018_v5, 1  ;;  %v3732_v5 = vld [vmem:[%s4668_s5 + $0x168] sm:$0xff]   ;;  %s442_s22 = sadd.s32 %s2861_s12, %s3906_s23 }
  0x43   : > { %3422 = vmatprep.subr.bf16.mxu0 %v3719_v63  ;;  %3457 = vmatpush3.bf16.msra.mxu1 %v3720_v51  ;;  %v684_v35 = vor.u32 %v682_v19, %v681_v26  ;;  %v4191_v41 = vsel %vm4011_vm2, %v681_v26, 0  ;;  %v3144_v55 = vunpack.c.l.bf16 %v3200_v42  ;;  %v3145_v58 = vunpack.c.h.bf16 %v3200_v42  ;;  %s2863_s10 = sshll.u32 %s442_s22, 2 }
  0x44   : > { %3376 = vmatprep.mubr.bf16.mxu0 %v4162_v16  ;;  %3458 = vmatprep.subr.bf16.mxu1 %v3722_v4  ;;  %v825_v31 = vor.u32 %v824_v22, %v820_v11  ;;  %v836_v36 = vrot.slane %v834_v29, 1  ;;  %v851_v49 = vshll.u32 %v4191_v41, 16  ;;  %v3729_v11 = vld [vmem:[%s4668_s5 + $0x138] sm:$0xff]   ;;  %v1190_v14 = vrot.slane %v4026_v12, 1  ;;  %v3731_v22 = vld [vmem:[%s4668_s5 + $0x130] sm:$0xff]   ;;  %v3733_v29 = vld [vmem:[%s4668_s5 + $0x128] sm:$0xff]   ;;  %s444_s12 = scalar_lea.vmem %s4665_s2, %s2863_s10 }
  0x45   : > { %3412 = vmatprep.mubr.bf16.mxu1 %v4174_v24  ;;  %v4204_v45 = vsel %vm4011_vm2, 0, %v684_v35  ;;  %v523_v62 = vmul.f32 %v3144_v55, %v3947_v13  ;;  %v524_v2 = vmul.f32 %v3145_v58, %v3947_v13  ;;  %v1193_v19 = vrot.slane %v4043_v34, 1  ;;  %s612_s22 = scalar_select %p462_p11, 1, 0 }
  0x46   : > { %3423 = vmatpush3.bf16.msra.mxu0 %v3719_v63  ;;  %v4195_v43 = vsel %vm758_vm3, %v825_v31, %v829_v23  ;;  %v837_v51 = vor.u32 %v836_v36, %v832_v28  ;;  %v844_v52 = vshrl.u32 %v4204_v45, 16  ;;  %v846_v53 = vshll.u32 %v4204_v45, 16 }
  0x47   : > { %3424 = vmatprep.subr.bf16.mxu0 %v3721_v10  ;;  %3459 = vmatpush3.bf16.msra.mxu1 %v3722_v4  ;;  %v853_v60 = vrot.slane %v851_v49, 1  ;;  %v1187_v63 = vrot.slane %v4065_v46, 1  ;;  %v545_v6 = vadd.f32 %v3955_v17, %v523_v62  ;;  %v546_v7 = vadd.f32 %v3955_v17, %v524_v2  ;;  %v3738_v49 = vld [vmem:[%s4668_s5 + $0x150] sm:$0xff]   ;;  %s4305_s15 = scvt.s32.f32 %s612_s22 }
  0x48   : > { %3460 = vmatprep.subr.bf16.mxu1 %v3724_v20  ;;  %v4210_v56 = vsel %vm758_vm3, %v837_v51, %v841_v39  ;;  %v848_v59 = vrot.slane %v846_v53, 1  ;;  %v1196_v26 = vrot.slane %v4056_v40, 1  ;;  %v1197_v28 = vrot.slane %v4038_v32, 1  ;;  %v3735_v39 = vld [vmem:[%s4668_s5 + $0x120] sm:$0xff]  }
  0x49   : > { %3377 = vmatmul.mubr.bf16.gmra.mxu0 %v4195_v43  ;;  %v561_v15 = vmax.f32 %v545_v6, 0.0  ;;  %v562_v18 = vmax.f32 %v546_v7, 0.0  ;;  %v1199_v35 = vrot.slane %v4125_v50, 1  ;;  %v1200_v36 = vrot.slane %v4114_v37, 1  ;;  %v3151_v37 = vld [vmem:[%s444_s12] sm:$0xff]   ;;  %s616_s10 = sshrl.u32 %s4305_s15, 16  ;;  %p615_p13 = scmp.ne.f32.partialorder %s4305_s15, %s4305_s15 }
  0x4a   : > { %3425 = vmatpush3.bf16.msra.mxu0 %v3721_v10  ;;  %3413 = vmatmul.mubr.bf16.gmra.mxu1 %v4204_v45  ;;  %v849_v4 = vor.u32 %v848_v59, %v844_v52  ;;  %v1189_v10 = vsel %vm1186_vm4, %v1187_v63, %v1188_v1  ;;  %v4289_v32 = vsel %vm1186_vm4, %v1196_v26, %v1197_v28  ;;  %v3152_v51 = vunpack.c.l.bf16 %v3151_v37  ;;  %s617_s21 = sand.u32 1, %s616_s10 }
  0x4b   : > { %3426 = vmatprep.subr.bf16.mxu0 %v3723_v33  ;;  %3461 = vmatpush3.bf16.msra.mxu1 %v3724_v20  ;;  %v1194_v20 = vrot.slane %v4033_v27, 1  ;;  %v570_v23 = vpack.c.bf16 %v562_v18, %v561_v15  ;;  %v3153_v52 = vunpack.c.h.bf16 %v3151_v37  ;;  %v4303_v53 = vsel %vm1186_vm4, %v1199_v35, %v1200_v36  ;;  %s618_s25 = sadd.s32 32767, %s617_s21  ;;  %v3750_v35 = vld [vmem:[%s4668_s5 + $0x1e0] sm:$0xff]  }
  0x4c   : > { %3380 = vmatprep.mubr.bf16.mxu0 %v4210_v56  ;;  %3462 = vmatprep.subr.bf16.mxu1 %v3726_v44  ;;  %v4239_v46 = vsel %vm758_vm3, %v849_v4, %v853_v60  ;;  %v1202_v55 = vrot.slane %v4152_v8, 1  ;;  %v604_v58 = vmul.f32 %v3152_v51, %v3947_v13  ;;  %v3737_v60 = vld [vmem:[%s4668_s5 + $0x118] sm:$0xff]   ;;  %v1205_v63 = vrot.slane %v4174_v24, 1  ;;  %s619_s18 = sadd.s32 %s618_s25, %s4305_s15  ;;  %v3751_v37 = vld [vmem:[%s4668_s5 + $0x1a0] sm:$0xff]  }
  0x4d   : > { %3464 = vmatprep.mubr.bf16.mxu1 %v4026_v12  ;;  %v4259_v12 = vsel %vm1186_vm4, %v1190_v14, %v1191_v9  ;;  %v4270_v27 = vsel %vm1186_vm4, %v1193_v19, %v1194_v20  ;;  %v686_v31 = vshrl.u32 %v570_v23, 16  ;;  %v689_v42 = vshll.u32 %v570_v23, 16  ;;  %s620_s13 = sand.u32 4294901760, %s619_s18  ;;  %v3744_v14 = vld [vmem:[%s4668_s5 + $0x1f8] sm:$0xff]   ;;  %v3746_v19 = vld [vmem:[%s4668_s5 + $0x1f0] sm:$0xff]   ;;  %s4582_s18 = scalar_lea.vmem %s4669_s6, %s4680_s19 }
  0x4e   : > { %3427 = vmatpush3.bf16.msra.mxu0 %v3723_v33  ;;  %v3736_v33 = vld [vmem:[%s4668_s5 + $0x158] sm:$0xff]   ;;  %v605_v59 = vmul.f32 %v3153_v52, %v3947_v13  ;;  %v606_v62 = vadd.f32 %v3955_v17, %v604_v58  ;;  %v1206_v1 = vrot.slane %v4169_v21, 1  ;;  %v3742_v21 = vld [vmem:[%s4668_s5 + $0x140] sm:$0xff]   ;;  %s4709_s13 = smov (%p615_p13, %s620_s13), 2143289344  ;;  %v1209_v9 = vrot.slane %v4191_v41, 1 }
  0x4f   : > { %3428 = vmatprep.subr.bf16.mxu0 %v3725_v57  ;;  %3463 = vmatpush3.bf16.msra.mxu1 %v3726_v44  ;;  %v4294_v44 = vrot.slane %v686_v31, 7  ;;  %s623_s9 = sshrl.u32 %s4709_s13, 16  ;;  %v3745_v23 = vld [vmem:[%s4668_s5 + $0x1b8] sm:$0xff]   ;;  %s467_s13 = scalar_lea.vmem %s4670_s7, %s2869_s8 }
  0x50   : > { %3512 = vmatprep.subr.bf16.mxu1 %v3728_v61  ;;  %v607_v13 = vadd.f32 %v3955_v17, %v605_v59  ;;  %v608_v4 = vmax.f32 %v606_v62, 0.0  ;;  %v4347_v7 = vsel %vm1186_vm4, %v1205_v63, %v1206_v1  ;;  %s624_s15 = sshll.u32 %s623_s9, 16  ;;  %v3758_v62 = vld [vmem:[%s4668_s5 + $0x1c0] sm:$0xff]   ;;  %v3757_v1 = vld [vmem:[%s4668_s5 + $0x188] sm:$0xff]  }
  0x51   : > { %3381 = vmatmul.mubr.bf16.gmra.mxu0 %v4239_v46  ;;  %s625_s23 = sor.u32 %s624_s15, %s623_s9  ;;  %v740_v51 = vsel %vm4011_vm2, %v4294_v44, 0 }
  0x52   : > { %3429 = vmatpush3.bf16.msra.mxu0 %v3725_v57  ;;  %3465 = vmatmul.mubr.bf16.vlgmr.msra.gmra.mxu1 %v4043_v34  ;;  %v1203_v57 = vrot.slane %v4143_v3, 1  ;;  %v3740_v3 = vld [vmem:[%s4668_s5 + $0x148] sm:$0xff]   ;;  %v609_v6 = vmax.f32 %v607_v13, 0.0  ;;  %v626_v41 = vstv %s625_s23  ;;  %v1769_v58 = vrot.slane %v740_v51, 1 }
  0x53   : > { %3430 = vmatprep.subr.bf16.mxu0 %v3727_v47  ;;  %3513 = vmatpush3.bf16.msra.mxu1 %v3728_v61  ;;  %v691_v61 = vor.u32 %v689_v42, %v4294_v44  ;;  %v3752_v42 = vld [vmem:[%s4668_s5 + $0x1d8] sm:$0xff]  }
  0x54   : > { %3432 = vmatprep.mubr.bf16.mxu0 %v1189_v10  ;;  %3514 = vmatprep.subr.bf16.mxu1 %v3730_v38  ;;  %v4329_v2 = vsel %vm1186_vm4, %v1202_v55, %v1203_v57  ;;  %v610_v10 = vpack.c.bf16 %v609_v6, %v608_v4  ;;  %v3753_v55 = vld [vmem:[%s4668_s5 + $0x198] sm:$0xff]  }
  0x55   : > { %3468 = vmatprep.mubr.bf16.mxu1 %v4056_v40  ;;  %v4334_v17 = vsel %vm4011_vm2, 0, %v691_v61  ;;  %v3760_v4 = vld [vmem:[%s4668_s5 + $0x238] sm:$0xff]  }
  0x56   : > { %3431 = vmatpush3.bf16.msra.mxu0 %v3727_v47  ;;  %v3739_v47 = vld [vmem:[%s4668_s5 + $0x110] sm:$0xff]   ;;  %v628_v18 = vmul.bf16 %v626_v41, %v610_v10  ;;  %v1578_v52 = vshll.u32 %v4334_v17, 16  ;;  %v1768_v57 = vrot.slane %v4334_v17, 1  ;;  %v1576_v44 = vshrl.u32 %v4334_v17, 16  ;;  %v3766_v10 = vld [vmem:[%s4668_s5 + $0x208] sm:$0xff]  }
  0x57   : > { %3480 = vmatprep.subr.bf16.mxu0 %v3729_v11  ;;  %3515 = vmatpush3.bf16.msra.mxu1 %v3730_v38  ;;  %v1208_v38 = vrot.slane %v4204_v45, 1 }
  0x58   : > { %3516 = vmatprep.subr.bf16.mxu1 %v3732_v5  ;;  %v693_v20 = vshrl.u32 %v628_v18, 16  ;;  %v1580_v59 = vrot.slane %v1578_v52, 1  ;;  %v4431_v61 = vsel %vm1186_vm4, %v1768_v57, %v1769_v58 }
  0x59   : > { %3433 = vmatmul.mubr.bf16.vlgmr.msra.gmra.mxu0 %v4259_v12  ;;  %v4361_v15 = vsel %vm1186_vm4, %v1208_v38, %v1209_v9  ;;  %v3763_v38 = vld [vmem:[%s4668_s5 + $0x220] sm:$0xff]  }
  0x5a   : > { %3481 = vmatpush3.bf16.msra.mxu0 %v3729_v11  ;;  %3469 = vmatmul.mubr.bf16.gmra.mxu1 %v4125_v50  ;;  %v3741_v11 = vld [vmem:[%s4668_s5 + $0x108] sm:$0xff]   ;;  %v1581_v13 = vor.u32 %v1580_v59, %v1576_v44 }
  0x5b   : > { %3482 = vmatprep.subr.bf16.mxu0 %v3731_v22  ;;  %3517 = vmatpush3.bf16.msra.mxu1 %v3732_v5  ;;  %v3743_v5 = vld [vmem:[%s4668_s5 + $0x100] sm:$0xff]  }
  0x5c   : > { %3436 = vmatprep.mubr.bf16.mxu0 %v4270_v27  ;;  %3518 = vmatprep.subr.bf16.mxu1 %v3734_v25 }
  0x5d   : > { %3472 = vmatprep.mubr.bf16.mxu1 %v4152_v8 }
  0x5e   : > { %3483 = vmatpush3.bf16.msra.mxu0 %v3731_v22  ;;  %v696_v22 = vshll.u32 %v628_v18, 16 }
  0x5f   : > { %3484 = vmatprep.subr.bf16.mxu0 %v3733_v29  ;;  %3519 = vmatpush3.bf16.msra.mxu1 %v3734_v25  ;;  %v3748_v25 = vld [vmem:[%s4668_s5 + $0x1e8] sm:$0xff]  }
  0x60   : > { %3520 = vmatprep.subr.bf16.mxu1 %v3736_v33 }
  0x61   : > { %3437 = vmatmul.mubr.bf16.gmra.mxu0 %v4289_v32 }
  0x62   : > { %3485 = vmatpush3.bf16.msra.mxu0 %v3733_v29  ;;  %3473 = vmatmul.mubr.bf16.gmra.mxu1 %v4174_v24 }
  0x63   : > { %3486 = vmatprep.subr.bf16.mxu0 %v3735_v39  ;;  %3521 = vmatpush3.bf16.msra.mxu1 %v3736_v33 }
  0x64   : > { %3440 = vmatprep.mubr.bf16.mxu0 %v4303_v53  ;;  %3522 = vmatprep.subr.bf16.mxu1 %v3738_v49 }
  0x65   : > { %3476 = vmatprep.mubr.bf16.mxu1 %v4204_v45 }
  0x66   : > { %3487 = vmatpush3.bf16.msra.mxu0 %v3735_v39  ;;  %v3749_v39 = vld [vmem:[%s4668_s5 + $0x1a8] sm:$0xff]  }
  0x67   : > { %3488 = vmatprep.subr.bf16.mxu0 %v3737_v60  ;;  %3523 = vmatpush3.bf16.msra.mxu1 %v3738_v49  ;;  %v3754_v49 = vld [vmem:[%s4668_s5 + $0x1d0] sm:$0xff]  }
  0x68   : > { %3524 = vmatprep.subr.bf16.mxu1 %v3740_v3 }
  0x69   : > { %3441 = vmatmul.mubr.bf16.gmra.mxu0 %v4329_v2 }
  0x6a   : > { %3489 = vmatpush3.bf16.msra.mxu0 %v3737_v60  ;;  %3477 = vmatmul.mubr.bf16.gmra.mxu1 %v4334_v17  ;;  %v1583_v60 = vshll.u32 %v740_v51, 16 }
  0x6b   : > { %3490 = vmatprep.subr.bf16.mxu0 %v3739_v47  ;;  %3525 = vmatpush3.bf16.msra.mxu1 %v3740_v3  ;;  %v3755_v3 = vld [vmem:[%s4668_s5 + $0x190] sm:$0xff]  }
  0x6c   : > { %3444 = vmatprep.mubr.bf16.mxu0 %v4347_v7  ;;  %3526 = vmatprep.subr.bf16.mxu1 %v3742_v21  ;;  %v1585_v63 = vrot.slane %v1583_v60, 1 }
  0x6d   : > { %3528 = vmatprep.mubr.bf16.mxu1 %v4259_v12  ;;  %v695_v12 = vrot.slane %v693_v20, 7 }
  0x6e   : > { %3491 = vmatpush3.bf16.msra.mxu0 %v3739_v47  ;;  %v1586_v6 = vsel %vm758_vm3, %v1581_v13, %v1585_v63  ;;  %v3759_v47 = vld [vmem:[%s4668_s5 + $0x180] sm:$0xff]  }
  0x6f   : > { %3492 = vmatprep.subr.bf16.mxu0 %v3741_v11  ;;  %3527 = vmatpush3.bf16.msra.mxu1 %v3742_v21  ;;  %v698_v26 = vor.u32 %v696_v22, %v695_v12  ;;  %v4380_v28 = vsel %vm4011_vm2, %v695_v12, 0  ;;  %v3761_v21 = vld [vmem:[%s4668_s5 + $0x230] sm:$0xff]  }
  0x70   : > { %3576 = vmatprep.subr.bf16.mxu1 %v3744_v14  ;;  %v2322_v29 = vrot.slane %v4380_v28, 1 }
  0x71   : > { %3445 = vmatmul.mubr.bf16.gmra.mxu0 %v4361_v15  ;;  %v4386_v31 = vsel %vm4011_vm2, 0, %v698_v26 }
  0x72   : > { %3493 = vmatpush3.bf16.msra.mxu0 %v3741_v11  ;;  %3529 = vmatmul.mubr.bf16.vlgmr.msra.gmra.mxu1 %v4270_v27  ;;  %v2321_v33 = vrot.slane %v4386_v31, 1 }
  0x73   : > { %3494 = vmatprep.subr.bf16.mxu0 %v3743_v5  ;;  %3577 = vmatpush3.bf16.msra.mxu1 %v3744_v14 }
  0x74   : > { %3496 = vmatprep.mubr.bf16.mxu0 %v4068_v48  ;;  %3578 = vmatprep.subr.bf16.mxu1 %v3746_v19  ;;  %v3747_v48 = vld [vmem:[%s4668_s5 + $0x1b0] sm:$0xff]   ;;  %v4397_v36 = vsel %vm1186_vm4, %v2321_v33, %v2322_v29 }
  0x75   : > { %3532 = vmatprep.mubr.bf16.mxu1 %v4289_v32 }
  0x76   : > { %3495 = vmatpush3.bf16.msra.mxu0 %v3743_v5 }
  0x77   : > { %3544 = vmatprep.subr.bf16.mxu0 %v3745_v23  ;;  %3579 = vmatpush3.bf16.msra.mxu1 %v3746_v19 }
  0x78   : > { %3580 = vmatprep.subr.bf16.mxu1 %v3748_v25 }
  0x79   : > { %3497 = vmatmul.mubr.bf16.vlgmr.msra.gmra.mxu0 %v4108_v30 }
  0x7a   : > { %3545 = vmatpush3.bf16.msra.mxu0 %v3745_v23  ;;  %3533 = vmatmul.mubr.bf16.gmra.mxu1 %v4303_v53 }
  0x7b   : > { %3546 = vmatprep.subr.bf16.mxu0 %v3747_v48  ;;  %3581 = vmatpush3.bf16.msra.mxu1 %v3748_v25 }
  0x7c   : > { %3500 = vmatprep.mubr.bf16.mxu0 %v4133_v54  ;;  %3582 = vmatprep.subr.bf16.mxu1 %v3750_v35 }
  0x7d   : > { %3536 = vmatprep.mubr.bf16.mxu1 %v4329_v2 }
  0x7e   : > { %3547 = vmatpush3.bf16.msra.mxu0 %v3747_v48 }
  0x7f   : > { %3548 = vmatprep.subr.bf16.mxu0 %v3749_v39  ;;  %3583 = vmatpush3.bf16.msra.mxu1 %v3750_v35 }
  0x80   : > { %3584 = vmatprep.subr.bf16.mxu1 %v3752_v42 }
  0x81   : > { %3501 = vmatmul.mubr.bf16.gmra.mxu0 %v4162_v16 }
  0x82   : > { %3549 = vmatpush3.bf16.msra.mxu0 %v3749_v39  ;;  %3537 = vmatmul.mubr.bf16.gmra.mxu1 %v4347_v7 }
  0x83   : > { %3550 = vmatprep.subr.bf16.mxu0 %v3751_v37  ;;  %3585 = vmatpush3.bf16.msra.mxu1 %v3752_v42 }
  0x84   : > { %3504 = vmatprep.mubr.bf16.mxu0 %v4195_v43  ;;  %3586 = vmatprep.subr.bf16.mxu1 %v3754_v49 }
  0x85   : > { %3540 = vmatprep.mubr.bf16.mxu1 %v4361_v15 }
  0x86   : > { %3551 = vmatpush3.bf16.msra.mxu0 %v3751_v37 }
  0x87   : > { %3552 = vmatprep.subr.bf16.mxu0 %v3753_v55  ;;  %3587 = vmatpush3.bf16.msra.mxu1 %v3754_v49 }
  0x88   : > { %3588 = vmatprep.subr.bf16.mxu1 %v3756_v0 }
  0x89   : > { %3505 = vmatmul.mubr.bf16.gmra.mxu0 %v4210_v56 }
  0x8a   : > { %3553 = vmatpush3.bf16.msra.mxu0 %v3753_v55  ;;  %3541 = vmatmul.mubr.bf16.gmra.mxu1 %v4431_v61 }
  0x8b   : > { %3554 = vmatprep.subr.bf16.mxu0 %v3755_v3  ;;  %3589 = vmatpush3.bf16.msra.mxu1 %v3756_v0 }
  0x8c   : > { %3508 = vmatprep.mubr.bf16.mxu0 %v4239_v46  ;;  %3590 = vmatprep.subr.bf16.mxu1 %v3758_v62 }
  0x8d   : > { %3592 = vmatprep.mubr.bf16.mxu1 %v4108_v30  ;;  %v3762_v30 = vld [vmem:[%s4668_s5 + $0x228] sm:$0xff]  }
  0x8e   : > { %3555 = vmatpush3.bf16.msra.mxu0 %v3755_v3 }
  0x8f   : > { %3556 = vmatprep.subr.bf16.mxu0 %v3757_v1  ;;  %3591 = vmatpush3.bf16.msra.mxu1 %v3758_v62 }
  0x90   : > { %3640 = vmatprep.subr.bf16.mxu1 %v3760_v4 }
  0x91   : > { %3509 = vmatmul.mubr.bf16.gmra.mxu0 %v1586_v6 }
  0x92   : > { %3557 = vmatpush3.bf16.msra.mxu0 %v3757_v1  ;;  %3593 = vmatmul.mubr.bf16.vlgmr.msra.gmra.mxu1 %v4133_v54  ;;  %v3764_v54 = vld [vmem:[%s4668_s5 + $0x218] sm:$0xff]  }
  0x93   : > { %3558 = vmatprep.subr.bf16.mxu0 %v3759_v47  ;;  %3648 = vmatpush3.bf16.msra.mxu1 %v3760_v4 }
  0x94   : > { %3560 = vmatprep.mubr.bf16.mxu0 %v4043_v34  ;;  %3641 = vmatprep.subr.bf16.mxu1 %v3761_v21  ;;  %v2131_v34 = vshll.u32 %v4386_v31, 16 }
  0x95   : > { %3596 = vmatprep.mubr.bf16.mxu1 %v4162_v16 }
  0x96   : > { %3559 = vmatpush3.bf16.msra.mxu0 %v3759_v47  ;;  %v2133_v16 = vrot.slane %v2131_v34, 1 }
  0x97   : > { %3608 = vmatprep.subr.bf16.mxu0 %v3760_v4  ;;  %3649 = vmatpush3.bf16.msra.mxu1 %v3761_v21 }
  0x98   : > { %3642 = vmatprep.subr.bf16.mxu1 %v3762_v30 }
  0x99   : > { %3561 = vmatmul.mubr.bf16.vlgmr.msra.gmra.mxu0 %v4056_v40  ;;  %v2129_v40 = vshrl.u32 %v4386_v31, 16 }
  0x9a   : > { %3609 = vmatpush3.bf16.msra.mxu0 %v3760_v4  ;;  %3597 = vmatmul.mubr.bf16.gmra.mxu1 %v4195_v43  ;;  %v2136_v43 = vshll.u32 %v4380_v28, 16 }
  0x9b   : > { %3610 = vmatprep.subr.bf16.mxu0 %v3761_v21  ;;  %3650 = vmatpush3.bf16.msra.mxu1 %v3762_v30 }
  0x9c   : > { %3564 = vmatprep.mubr.bf16.mxu0 %v4125_v50  ;;  %3643 = vmatprep.subr.bf16.mxu1 %v3763_v38  ;;  %v3765_v50 = vld [vmem:[%s4668_s5 + $0x210] sm:$0xff]   ;;  %v2138_v9 = vrot.slane %v2136_v43, 1 }
  0x9d   : > { %3600 = vmatprep.mubr.bf16.mxu1 %v4210_v56  ;;  %v2134_v56 = vor.u32 %v2133_v16, %v2129_v40 }
  0x9e   : > { %3611 = vmatpush3.bf16.msra.mxu0 %v3761_v21 }
  0x9f   : > { %3612 = vmatprep.subr.bf16.mxu0 %v3762_v30  ;;  %3651 = vmatpush3.bf16.msra.mxu1 %v3763_v38 }
  0xa0   : > { %3644 = vmatprep.subr.bf16.mxu1 %v3764_v54 }
  0xa1   : > { %3565 = vmatmul.mubr.bf16.gmra.mxu0 %v4152_v8  ;;  %v2139_v8 = vsel %vm758_vm3, %v2134_v56, %v2138_v9 }
  0xa2   : > { %3613 = vmatpush3.bf16.msra.mxu0 %v3762_v30  ;;  %3601 = vmatmul.mubr.bf16.gmra.mxu1 %v4239_v46  ;;  %v3767_v46 = vld [vmem:[%s4668_s5 + $0x200] sm:$0xff]  }
  0xa3   : > { %3614 = vmatprep.subr.bf16.mxu0 %v3763_v38  ;;  %3652 = vmatpush3.bf16.msra.mxu1 %v3764_v54 }
  0xa4   : > { %3568 = vmatprep.mubr.bf16.mxu0 %v4174_v24  ;;  %3645 = vmatprep.subr.bf16.mxu1 %v3765_v50 }
  0xa5   : > { %3604 = vmatprep.mubr.bf16.mxu1 %v1586_v6 }
  0xa6   : > { %3615 = vmatpush3.bf16.msra.mxu0 %v3763_v38 }
  0xa7   : > { %3616 = vmatprep.subr.bf16.mxu0 %v3764_v54  ;;  %3653 = vmatpush3.bf16.msra.mxu1 %v3765_v50 }
  0xa8   : > { %3646 = vmatprep.subr.bf16.mxu1 %v3766_v10 }
  0xa9   : > { %3569 = vmatmul.mubr.bf16.gmra.mxu0 %v4204_v45 }
  0xaa   : > { %3617 = vmatpush3.bf16.msra.mxu0 %v3764_v54  ;;  %3605 = vmatmul.mubr.bf16.gmra.mxu1 %v2139_v8 }
  0xab   : > { %3618 = vmatprep.subr.bf16.mxu0 %v3765_v50  ;;  %3654 = vmatpush3.bf16.msra.mxu1 %v3766_v10 }
  0xac   : > { %3572 = vmatprep.mubr.bf16.mxu0 %v4334_v17  ;;  %3647 = vmatprep.subr.bf16.mxu1 %v3767_v46 }
  0xad   : > { %3632 = vmatprep.mubr.bf16.mxu1 %v4347_v7 }
  0xae   : > { %3619 = vmatpush3.bf16.msra.mxu0 %v3765_v50 }
  0xaf   : > { %3620 = vmatprep.subr.bf16.mxu0 %v3766_v10  ;;  %3655 = vmatpush3.bf16.msra.mxu1 %v3767_v46 }
  0xb1   : > { %3573 = vmatmul.mubr.bf16.gmra.mxu0 %v4386_v31 }
  0xb2   : > { %3621 = vmatpush3.bf16.msra.mxu0 %v3766_v10  ;;  %3633 = vmatmul.mubr.bf16.vlgmr.msra.gmra.mxu1 %v4361_v15 }
  0xb3   : > { %3622 = vmatprep.subr.bf16.mxu0 %v3767_v46  ;;  %3624 = vmatprep.mubr.bf16.mxu0 %v4270_v27 }
  0xb4   : > { %3636 = vmatprep.mubr.bf16.mxu1 %v4431_v61 }
  0xb6   : > { %3623 = vmatpush3.bf16.msra.mxu0 %v3767_v46 }
  0xb9   : > { %3625 = vmatmul.mubr.bf16.vlgmr.msra.gmra.mxu0 %v4289_v32 }
  0xba   : > { %3637 = vmatmul.mubr.bf16.gmra.mxu1 %v4397_v36  ;;  %3628 = vmatprep.mubr.bf16.mxu0 %v4303_v53 }
  0xc1   : > { %3629 = vmatmul.mubr.bf16.gmra.mxu0 %v4329_v2 }
  0xf2   : > { %v3402_v24 = vpop.f32.mrf.mxu1 }
  0xf4   : > { %v1107_v45 = vpop.f32.mrf.mxu1 }
  0xf6   : > { %v3403_v17 = vpop.f32.mrf.mxu1 }
  0xf8   : > { %v1110_v7 = vpop.f32.mrf.mxu1 }
  0xf9   : > { %v3370_v11 = vpop.f32.mrf.mxu0 }
  0xfa   : > { %v1116_v14 = vadd.f32 %v3402_v24, %v3370_v11  ;;  %v3406_v41 = vpop.f32.mrf.mxu1 }
  0xfb   : > { %v962_v15 = vpop.f32.mrf.mxu0 }
  0xfc   : > { %v1108_v27 = vadd.f32 %v1107_v45, %v962_v15  ;;  %v1123_v18 = vpop.f32.mrf.mxu1 }
  0xfd   : > { %v3371_v5 = vpop.f32.mrf.mxu0 }
  0xfe   : > { %v1119_v19 = vadd.f32 %v3403_v17, %v3371_v5  ;;  %v3407_v20 = vpop.f32.mrf.mxu1 }
  0xff   : > { %v965_v32 = vpop.f32.mrf.mxu0 }
 0x100   : > { %v1111_v22 = vadd.f32 %v1110_v7, %v965_v32  ;;  %v1126_v12 = vpop.f32.mrf.mxu1 }
 0x101   : > { %v3374_v23 = vpop.f32.mrf.mxu0 }
 0x102   : > { %v1132_v53 = vadd.f32 %v3406_v41, %v3374_v23  ;;  %v3410_v25 = vpop.f32.mrf.mxu1 }
 0x103   : > { %v978_v2 = vpop.f32.mrf.mxu0 }
 0x104   : > { %v1124_v26 = vadd.f32 %v1123_v18, %v978_v2  ;;  %v1139_v28 = vpop.f32.mrf.mxu1 }
 0x105   : > { %v3375_v29 = vpop.f32.mrf.mxu0 }
 0x106   : > { %v1135_v31 = vadd.f32 %v3407_v20, %v3375_v29  ;;  %v3411_v48 = vpop.f32.mrf.mxu1 }
 0x107   : > { %v981_v33 = vpop.f32.mrf.mxu0 }
 0x108   : > { %v1127_v35 = vadd.f32 %v1126_v12, %v981_v33  ;;  %v1142_v36 = vpop.f32.mrf.mxu1 }
 0x109   : > { %v3378_v39 = vpop.f32.mrf.mxu0 }
 0x10a   : > { %v1148_v42 = vadd.f32 %v3410_v25, %v3378_v39  ;;  %v3414_v37 = vpop.f32.mrf.mxu1 }
 0x10b   : > { %v994_v49 = vpop.f32.mrf.mxu0 }
 0x10c   : > { %v1140_v51 = vadd.f32 %v1139_v28, %v994_v49  ;;  %v1155_v52 = vpop.f32.mrf.mxu1 }
 0x10d   : > { %v3379_v55 = vpop.f32.mrf.mxu0 }
 0x10e   : > { %v1151_v57 = vadd.f32 %v3411_v48, %v3379_v55  ;;  %v3415_v58 = vpop.f32.mrf.mxu1 }
 0x10f   : > { %v997_v0 = vpop.f32.mrf.mxu0 }
 0x110   : > { %v1143_v44 = vadd.f32 %v1142_v36, %v997_v0  ;;  %v1158_v59 = vpop.f32.mrf.mxu1 }
 0x111   : > { %v3382_v60 = vpop.f32.mrf.mxu0 }
 0x112   : > { %v1164_v61 = vadd.f32 %v3414_v37, %v3382_v60  ;;  %v3466_v3 = vpop.f32.mrf.mxu1 }
 0x113   : > { %v1010_v62 = vpop.f32.mrf.mxu0 }
 0x114   : > { %v1156_v13 = vadd.f32 %v1155_v52, %v1010_v62  ;;  %v1496_v63 = vpop.f32.mrf.mxu1 }
 0x115   : > { %v3383_v1 = vpop.f32.mrf.mxu0 }
 0x116   : > { %v1167_v4 = vadd.f32 %v3415_v58, %v3383_v1  ;;  %v3467_v6 = vpop.f32.mrf.mxu1 }
 0x117   : > { %v1013_v47 = vpop.f32.mrf.mxu0 }
 0x118   : > { %v1159_v21 = vadd.f32 %v1158_v59, %v1013_v47  ;;  %v1499_v30 = vpop.f32.mrf.mxu1 }
 0x119   : > { %v3434_v38 = vpop.f32.mrf.mxu0 }
 0x11a   : > { %v1383_v34 = vadd.f32 %v3434_v38, %v1116_v14  ;;  %v3470_v54 = vpop.f32.mrf.mxu1 }
 0x11b   : > { %v1318_v40 = vpop.f32.mrf.mxu0 }
 0x11c   : > { %v1381_v16 = vadd.f32 %v1318_v40, %v1108_v27  ;;  %v1512_v43 = vpop.f32.mrf.mxu1  ;;  %v1561_v50 = vadd.f32 %v3466_v3, %v1383_v34 }
 0x11d   : > { %v3435_v56 = vpop.f32.mrf.mxu0 }
 0x11e   : > { %v1384_v9 = vadd.f32 %v3435_v56, %v1119_v19  ;;  %v3471_v10 = vpop.f32.mrf.mxu1  ;;  %v1559_v8 = vadd.f32 %v1496_v63, %v1381_v16 }
 0x11f   : > { %v1321_v46 = vpop.f32.mrf.mxu0 }
 0x120   : > { %v1382_v24 = vadd.f32 %v1321_v46, %v1111_v22  ;;  %v1515_v45 = vpop.f32.mrf.mxu1  ;;  %v1562_v17 = vadd.f32 %v3467_v6, %v1384_v9 }
 0x121   : > { %v3438_v7 = vpop.f32.mrf.mxu0 }
 0x122   : > { %v1387_v11 = vadd.f32 %v3438_v7, %v1132_v53  ;;  %v3474_v41 = vpop.f32.mrf.mxu1  ;;  %v1560_v15 = vadd.f32 %v1499_v30, %v1382_v24 }
 0x123   : > { %v1334_v18 = vpop.f32.mrf.mxu0 }
 0x124   : > { %v1385_v5 = vadd.f32 %v1334_v18, %v1124_v26  ;;  %v1528_v14 = vpop.f32.mrf.mxu1  ;;  %v1565_v20 = vadd.f32 %v3470_v54, %v1387_v11 }
 0x125   : > { %v3439_v32 = vpop.f32.mrf.mxu0 }
 0x126   : > { %v1388_v27 = vadd.f32 %v3439_v32, %v1135_v31  ;;  %v3475_v12 = vpop.f32.mrf.mxu1  ;;  %v1563_v23 = vadd.f32 %v1512_v43, %v1385_v5 }
 0x127   : > { %v1337_v25 = vpop.f32.mrf.mxu0 }
 0x128   : > { %v1386_v19 = vadd.f32 %v1337_v25, %v1127_v35  ;;  %v1531_v2 = vpop.f32.mrf.mxu1  ;;  %v1566_v28 = vadd.f32 %v3471_v10, %v1388_v27 }
 0x129   : > { %v3442_v29 = vpop.f32.mrf.mxu0 }
 0x12a   : > { %v1391_v22 = vadd.f32 %v3442_v29, %v1148_v42  ;;  %v3478_v48 = vpop.f32.mrf.mxu1  ;;  %v1564_v33 = vadd.f32 %v1515_v45, %v1386_v19 }
 0x12b   : > { %v1350_v36 = vpop.f32.mrf.mxu0 }
 0x12c   : > { %v1389_v53 = vadd.f32 %v1350_v36, %v1140_v51  ;;  %v1544_v39 = vpop.f32.mrf.mxu1  ;;  %v4499_v37 = vadd.f32 %v3474_v41, %v1391_v22 }
 0x12d   : > { %v3443_v26 = vpop.f32.mrf.mxu0 }
 0x12e   : > { %v1392_v49 = vadd.f32 %v3443_v26, %v1151_v57  ;;  %v3479_v52 = vpop.f32.mrf.mxu1  ;;  %v4501_v55 = vadd.f32 %v1528_v14, %v1389_v53 }
 0x12f   : > { %v1353_v31 = vpop.f32.mrf.mxu0 }
 0x130   : > { %v1390_v58 = vadd.f32 %v1353_v31, %v1143_v44  ;;  %v1547_v0 = vpop.f32.mrf.mxu1  ;;  %v4503_v35 = vadd.f32 %v3475_v12, %v1392_v49 }
 0x131   : > { %v3446_v59 = vpop.f32.mrf.mxu0 }
 0x132   : > { %v1395_v60 = vadd.f32 %v3446_v59, %v1164_v61  ;;  %v3530_v42 = vpop.f32.mrf.mxu1  ;;  %v4505_v3 = vadd.f32 %v1531_v2, %v1390_v58 }
 0x133   : > { %v1366_v62 = vpop.f32.mrf.mxu0 }
 0x134   : > { %v1393_v51 = vadd.f32 %v1366_v62, %v1156_v13  ;;  %v1871_v63 = vpop.f32.mrf.mxu1  ;;  %v4507_v1 = vadd.f32 %v3478_v48, %v1395_v60 }
 0x135   : > { %v3447_v6 = vpop.f32.mrf.mxu0 }
 0x136   : > { %v1396_v57 = vadd.f32 %v3447_v6, %v1167_v4  ;;  %v3531_v47 = vpop.f32.mrf.mxu1  ;;  %v4509_v30 = vadd.f32 %v1544_v39, %v1393_v51 }
 0x137   : > { %v1369_v38 = vpop.f32.mrf.mxu0 }
 0x138   : > { %v1394_v44 = vadd.f32 %v1369_v38, %v1159_v21  ;;  %v1874_v34 = vpop.f32.mrf.mxu1  ;;  %v4511_v54 = vadd.f32 %v3479_v52, %v1396_v57 }
 0x139   : > { %v3498_v40 = vpop.f32.mrf.mxu0 }
 0x13a   : > { %v1752_v61 = vadd.f32 %v3498_v40, %v1561_v50  ;;  %v3534_v16 = vpop.f32.mrf.mxu1  ;;  %v4513_v43 = vadd.f32 %v1547_v0, %v1394_v44 }
 0x13b   : > { %v1687_v56 = vpop.f32.mrf.mxu0 }
 0x13c   : > { %v1750_v13 = vadd.f32 %v1687_v56, %v1559_v8  ;;  %v1887_v9 = vpop.f32.mrf.mxu1  ;;  %v4515_v10 = vadd.f32 %v3530_v42, %v1752_v61 }
 0x13d   : > { %v3499_v46 = vpop.f32.mrf.mxu0 }
 0x13e   : > { %v1753_v4 = vadd.f32 %v3499_v46, %v1562_v17  ;;  %v3535_v24 = vpop.f32.mrf.mxu1  ;;  %v4517_v45 = vadd.f32 %v1871_v63, %v1750_v13 }
 0x13f   : > { %v1690_v7 = vpop.f32.mrf.mxu0 }
 0x140   : > { %v1751_v21 = vadd.f32 %v1690_v7, %v1560_v15  ;;  %v1890_v11 = vpop.f32.mrf.mxu1  ;;  %v4519_v41 = vadd.f32 %v3531_v47, %v1753_v4 }
 0x141   : > { %v3502_v18 = vpop.f32.mrf.mxu0 }
 0x142   : > { %v1756_v50 = vadd.f32 %v3502_v18, %v1565_v20  ;;  %v3538_v5 = vpop.f32.mrf.mxu1  ;;  %v4521_v14 = vadd.f32 %v1874_v34, %v1751_v21 }
 0x143   : > { %v1703_v32 = vpop.f32.mrf.mxu0 }
 0x144   : > { %v1754_v8 = vadd.f32 %v1703_v32, %v1563_v23  ;;  %v1903_v27 = vpop.f32.mrf.mxu1  ;;  %v4523_v12 = vadd.f32 %v3534_v16, %v1756_v50 }
 0x145   : > { %v3503_v25 = vpop.f32.mrf.mxu0 }
 0x146   : > { %v1757_v17 = vadd.f32 %v3503_v25, %v1566_v28  ;;  %v3539_v19 = vpop.f32.mrf.mxu1  ;;  %v4525_v2 = vadd.f32 %v1887_v9, %v1754_v8 }
 0x147   : > { %v1706_v29 = vpop.f32.mrf.mxu0 }
 0x148   : > { %v1755_v15 = vadd.f32 %v1706_v29, %v1564_v33  ;;  %v1906_v22 = vpop.f32.mrf.mxu1  ;;  %v4527_v48 = vadd.f32 %v3535_v24, %v1757_v17 }
 0x149   : > { %v3506_v36 = vpop.f32.mrf.mxu0 }
 0x14a   : > { %v3542_v20 = vpop.f32.mrf.mxu1  ;;  %v4529_v53 = vadd.f32 %v1890_v11, %v1755_v15  ;;  %v1760_v21 = vadd.f32 %v3506_v36, %v4499_v37 }
 0x14b   : > { %v1719_v39 = vpop.f32.mrf.mxu0 }
 0x14c   : > { %4675 = vst [vmem:[#allocation2_spill] sm:$0xff] %v4529_v53  ;;  %v1919_v26 = vpop.f32.mrf.mxu1  ;;  %v1758_v50 = vadd.f32 %v1719_v39, %v4501_v55  ;;  %v1944_v29 = vadd.f32 %v3538_v5, %v1760_v21 }
 0x14d   : > { %v3507_v23 = vpop.f32.mrf.mxu0 }
 0x14e   : > { %v3543_v49 = vpop.f32.mrf.mxu1  ;;  %v1761_v11 = vadd.f32 %v3507_v23, %v4503_v35 }
 0x14f   : > { %v1722_v52 = vpop.f32.mrf.mxu0 }
 0x150   : > { %v1922_v31 = vpop.f32.mrf.mxu1  ;;  %v1759_v8 = vadd.f32 %v1722_v52, %v4505_v3  ;;  %v1945_v15 = vadd.f32 %v3539_v19, %v1761_v11 }
 0x151   : > { %v3510_v58 = vpop.f32.mrf.mxu0 }
 0x152   : > { %v4531_v28 = vpop.f32.mrf.mxu1  ;;  %v1943_v35 = vadd.f32 %v1906_v22, %v1759_v8 }
 0x153   : > { %v1735_v0 = vpop.f32.mrf.mxu0 }
 0x154   : > { %v4533_v59 = vpop.f32.mrf.mxu1  ;;  %v1762_v55 = vadd.f32 %v1735_v0, %v4509_v30 }
 0x155   : > { %v3511_v33 = vpop.f32.mrf.mxu0 }
 0x156   : > { %v4535_v60 = vpop.f32.mrf.mxu1  ;;  %v1765_v39 = vadd.f32 %v3511_v33, %v4511_v54  ;;  %v1946_v22 = vadd.f32 %v1919_v26, %v1762_v55 }
 0x157   : > { %v1738_v42 = vpop.f32.mrf.mxu0 }
 0x158   : > { %v4537_v62 = vpop.f32.mrf.mxu1  ;;  %v1763_v3 = vadd.f32 %v1738_v42, %v4513_v43 }
 0x159   : > { %v3562_v51 = vpop.f32.mrf.mxu0 }
 0x15a   : > { %v4539_v63 = vpop.f32.mrf.mxu1  ;;  %v1947_v8 = vadd.f32 %v1922_v31, %v1763_v3 }
 0x15b   : > { %4676 = vst [vmem:[#allocation3_spill] sm:$0xff] %v4539_v63  ;;  %v2049_v6 = vpop.f32.mrf.mxu0 }
 0x15c   : > { %v4541_v57 = vpop.f32.mrf.mxu1 }
 0x15d   : > { %v3563_v47 = vpop.f32.mrf.mxu0 }
 0x15e   : > { %v4543_v38 = vpop.f32.mrf.mxu1 }
 0x15f   : > { %4677 = vst [vmem:[#allocation4_spill] sm:$0xff] %v4543_v38  ;;  %v2052_v44 = vpop.f32.mrf.mxu0  ;;  %v1942_v38 = vadd.f32 %v1903_v27, %v1758_v50 }
 0x160   : > { %v4545_v34 = vpop.f32.mrf.mxu1 }
 0x161   : > { %4678 = vst [vmem:[#allocation5_spill] sm:$0xff] %v4545_v34  ;;  %v4547_v40 = vpop.f32.mrf.mxu0 }
 0x162   : > { %v3602_v61 = vpop.f32.mrf.mxu1 }
 0x163   : > { %v4549_v16 = vpop.f32.mrf.mxu0 }
 0x164   : > { %v2272_v56 = vpop.f32.mrf.mxu1 }
 0x165   : > { %v4551_v13 = vpop.f32.mrf.mxu0 }
 0x166   : > { %v3603_v9 = vpop.f32.mrf.mxu1 }
 0x167   : > { %v4553_v46 = vpop.f32.mrf.mxu0 }
 0x168   : > { %4679 = vst [vmem:[#allocation6_spill] sm:$0xff] %v4553_v46  ;;  %v2275_v4 = vpop.f32.mrf.mxu1  ;;  %v1764_v46 = vadd.f32 %v3510_v58, %v4507_v1  ;;  %v2114_v58 = vadd.f32 %v3562_v51, %v4515_v10 }
 0x169   : > { %v3570_v24 = vpop.f32.mrf.mxu0 }
 0x16a   : > { %v4555_v7 = vpop.f32.mrf.mxu1  ;;  %v2122_v37 = vadd.f32 %v3570_v24, %v1944_v29  ;;  %v1948_v27 = vadd.f32 %v3542_v20, %v1764_v46  ;;  %v1949_v24 = vadd.f32 %v3543_v49, %v1765_v39  ;;  %v2115_v20 = vadd.f32 %v3563_v47, %v4519_v41 }
 0x16b   : > { %v2081_v18 = vpop.f32.mrf.mxu0 }
 0x16c   : > { %v4560_v32 = vpop.f32.mrf.mxu1  ;;  %v2120_v53 = vadd.f32 %v2081_v18, %v1942_v38  ;;  %v2313_v11 = vadd.f32 %v3602_v61, %v2122_v37  ;;  %v2112_v38 = vadd.f32 %v2049_v6, %v4517_v45  ;;  %v2306_v46 = vadd.f32 %v4535_v60, %v2115_v20 }
 0x16d   : > { %v3571_v25 = vpop.f32.mrf.mxu0  ;;  %v2116_v18 = vadd.f32 %v4549_v16, %v4525_v2 }
 0x16e   : > { %v3607_v17 = vpop.f32.mrf.mxu1  ;;  %v2123_v36 = vadd.f32 %v3571_v25, %v1945_v15  ;;  %v2311_v54 = vadd.f32 %v2272_v56, %v2120_v53  ;;  %v2305_v56 = vadd.f32 %v4531_v28, %v2114_v58 }
 0x16f   : > { %v2084_v34 = vpop.f32.mrf.mxu0  ;;  %v2307_v3 = vadd.f32 %v4541_v57, %v2116_v18 }
 0x170   : > { %v4563_v63 = vpop.f32.mrf.mxu1  ;;  %v2121_v5 = vadd.f32 %v2084_v34, %v1943_v35  ;;  %v2314_v1 = vadd.f32 %v3603_v9, %v2123_v36  ;;  %v2113_v34 = vadd.f32 %v2052_v44, %v4521_v14  ;;  %v2118_v44 = vadd.f32 %v4547_v40, %v4523_v12 }
 0x171   : > { %v3574_v23 = vpop.f32.mrf.mxu0  ;;  %v2303_v9 = vadd.f32 %v4533_v59, %v2112_v38  ;;  %v2119_v12 = vadd.f32 %v4551_v13, %v4527_v48 }
 0x172   : > { %v3634_v52 = vpop.f32.mrf.mxu1  ;;  %v2312_v42 = vadd.f32 %v2275_v4, %v2121_v5  ;;  %v2126_v61 = vadd.f32 %v3574_v23, %v1948_v27  ;;  %v2304_v15 = vadd.f32 %v4537_v62, %v2113_v34 }
 0x173   : > { %v2097_v19 = vpop.f32.mrf.mxu0  ;;  %v4570_v0 = vadd.f32 %v3634_v52, %v2313_v11  ;;  %v4683_v11 = vld [vmem:[#allocation3_spill] sm:$0xff] }
 0x174   : > { %v2456_v21 = vpop.f32.mrf.mxu1  ;;  %v2124_v31 = vadd.f32 %v2097_v19, %v1946_v22  ;;  %v2317_v25 = vadd.f32 %v4555_v7, %v2126_v61  ;;  %v4684_v22 = vld [vmem:[#allocation4_spill] sm:$0xff] }
 0x175   : > { %v3575_v50 = vpop.f32.mrf.mxu0  ;;  %v4584_v26 = vadd.f32 %v2456_v21, %v2311_v54  ;;  %v4681_v21 = vld [vmem:[#allocation2_spill] sm:$0xff] }
 0x176   : > { %v3635_v30 = vpop.f32.mrf.mxu1  ;;  %v2127_v53 = vadd.f32 %v3575_v50, %v1949_v24  ;;  %v2315_v35 = vadd.f32 %v4560_v32, %v2124_v31  ;;  %v2309_v50 = vadd.f32 %v4683_v11, %v2118_v44  ;;  %v2310_v24 = vadd.f32 %v4684_v22, %v2119_v12 }
 0x177   : > { %v2100_v43 = vpop.f32.mrf.mxu0  ;;  %v4572_v33 = vadd.f32 %v3635_v30, %v2314_v1 }
 0x178   : > { %v2459_v10 = vpop.f32.mrf.mxu1  ;;  %v2125_v51 = vadd.f32 %v2100_v43, %v1947_v8  ;;  %v2318_v37 = vadd.f32 %v3607_v17, %v2127_v53 }
 0x179   : > { %v3182_v45 = vpack.c.bf16 %v4572_v33, %v4570_v0  ;;  %v3626_v49 = vpop.f32.mrf.mxu0  ;;  %v4588_v41 = vadd.f32 %v2459_v10, %v2312_v42  ;;  %v4685_v10 = vld [vmem:[#allocation5_spill] sm:$0xff] }
 0x17a   : > { %v3638_v14 = vpop.f32.mrf.mxu1  ;;  %v2489_v40 = vadd.f32 %v3626_v49, %v2305_v56  ;;  %v2316_v7 = vadd.f32 %v4563_v63, %v2125_v51  ;;  %v4682_v63 = vld [vmem:[#allocation6_spill] sm:$0xff] }
 0x17b   : > { %3205 = vst [vmem:[%s4582_s18 + $0x28] sm:$0xff] %v3182_v45   ;;  %v3177_v6 = vpack.c.bf16 %v4588_v41, %v4584_v26  ;;  %v2424_v47 = vpop.f32.mrf.mxu0  ;;  %v4605_v60 = vadd.f32 %v3638_v14, %v2317_v25  ;;  %v2117_v27 = vadd.f32 %v4682_v63, %v4681_v21 }
 0x17c   : > { %v2472_v4 = vpop.f32.mrf.mxu1  ;;  %v2487_v28 = vadd.f32 %v2424_v47, %v2303_v9  ;;  %v2606_v8 = vmul.f32 %v2489_v40, %v2489_v40 }
 0x17d   : > { %3204 = vst [vmem:[%s4582_s18 + $0x20] sm:$0xff] %v3177_v6   ;;  %v3627_v29 = vpop.f32.mrf.mxu0  ;;  %v2499_v55 = vadd.f32 %v2472_v4, %v2315_v35  ;;  %v2308_v53 = vadd.f32 %v4685_v10, %v2117_v27  ;;  %v2614_v35 = vmul.f32 %v4570_v0, %v4570_v0 }
 0x17e   : > { %v2490_v36 = vadd.f32 %v3627_v29, %v2306_v46  ;;  %v3639_v59 = vpop.f32.mrf.mxu1  ;;  %v2604_v52 = vmul.f32 %v2487_v28, %v2487_v28 }
 0x17f   : > { %v2427_v2 = vpop.f32.mrf.mxu0  ;;  %v4608_v16 = vadd.f32 %v3639_v59, %v2318_v37  ;;  %v2612_v37 = vmul.f32 %v4584_v26, %v4584_v26 }
 0x180   : > { %v3162_v62 = vpack.c.bf16 %v2490_v36, %v2489_v40  ;;  %v2488_v17 = vadd.f32 %v2427_v2, %v2304_v15  ;;  %v2475_v23 = vpop.f32.mrf.mxu1  ;;  %v2607_v43 = vmul.f32 %v2490_v36, %v2490_v36 }
 0x181   : > { %v3192_v48 = vpack.c.bf16 %v4608_v16, %v4605_v60  ;;  %v3630_v13 = vpop.f32.mrf.mxu0  ;;  %v2500_v39 = vadd.f32 %v2475_v23, %v2316_v7 }
 0x182   : > { %3201 = vst [vmem:[%s4582_s18 + $0x8] sm:$0xff] %v3162_v62   ;;  %v3157_v32 = vpack.c.bf16 %v2488_v17, %v2487_v28  ;;  %v2583_v5 = vadd.f32 %v2488_v17, %v2487_v28  ;;  %v2605_v19 = vmul.f32 %v2488_v17, %v2488_v17  ;;  %v2493_v20 = vadd.f32 %v3630_v13, %v2309_v50 }
 0x183   : > { %3207 = vst [vmem:[%s4582_s18 + $0x38] sm:$0xff] %v3192_v48   ;;  %v3187_v1 = vpack.c.bf16 %v2500_v39, %v2499_v55  ;;  %v2440_v58 = vpop.f32.mrf.mxu0  ;;  %v2613_v28 = vmul.f32 %v4588_v41, %v4588_v41  ;;  %v2615_v62 = vmul.f32 %v4572_v33, %v4572_v33 }
 0x184   : > { %3158 = vst [vmem:[%s4582_s18] sm:$0xff] %v3157_v32   ;;  %v2584_v30 = vadd.f32 %v2583_v5, %v2489_v40  ;;  %v2620_v57 = vadd.f32 %v2605_v19, %v2604_v52  ;;  %v2491_v54 = vadd.f32 %v2440_v58, %v2307_v3  ;;  %v2610_v46 = vmul.f32 %v2493_v20, %v2493_v20 }
 0x185   : > { %3206 = vst [vmem:[%s4582_s18 + $0x30] sm:$0xff] %v3187_v1   ;;  %v3631_v42 = vpop.f32.mrf.mxu0  ;;  %v2617_v3 = vmul.f32 %v2500_v39, %v2500_v39  ;;  %v2619_v19 = vmul.f32 %v4608_v16, %v4608_v16 }
 0x186   : > { %v2621_v38 = vadd.f32 %v2620_v57, %v2606_v8  ;;  %v2585_v34 = vadd.f32 %v2584_v30, %v2490_v36  ;;  %v2494_v61 = vadd.f32 %v3631_v42, %v2310_v24  ;;  %v2608_v14 = vmul.f32 %v2491_v54, %v2491_v54 }
 0x187   : > { %v2443_v45 = vpop.f32.mrf.mxu0 }
 0x188   : > { %v2586_v49 = vadd.f32 %v2585_v34, %v2491_v54  ;;  %v2622_v31 = vadd.f32 %v2621_v38, %v2607_v43  ;;  %v3172_v51 = vpack.c.bf16 %v2494_v61, %v2493_v20  ;;  %v2492_v6 = vadd.f32 %v2443_v45, %v2308_v53 }
 0x189   : > { %v2611_v25 = vmul.f32 %v2494_v61, %v2494_v61 }
 0x18a   : > { %v2623_v47 = vadd.f32 %v2622_v31, %v2608_v14  ;;  %3203 = vst [vmem:[%s4582_s18 + $0x18] sm:$0xff] %v3172_v51   ;;  %v3167_v44 = vpack.c.bf16 %v2492_v6, %v2491_v54  ;;  %v2587_v56 = vadd.f32 %v2586_v49, %v2492_v6  ;;  %v2609_v9 = vmul.f32 %v2492_v6, %v2492_v6 }
 0x18c   : > { %3202 = vst [vmem:[%s4582_s18 + $0x10] sm:$0xff] %v3167_v44   ;;  %v2588_v4 = vadd.f32 %v2587_v56, %v2493_v20  ;;  %v2624_v18 = vadd.f32 %v2623_v47, %v2609_v9 }
 0x18e   : > { %v2589_v29 = vadd.f32 %v2588_v4, %v2494_v61  ;;  %v2625_v15 = vadd.f32 %v2624_v18, %v2610_v46 }
 0x190   : > { %v2590_v12 = vadd.f32 %v2589_v29, %v4584_v26  ;;  %v2626_v40 = vadd.f32 %v2625_v15, %v2611_v25  ;;  %v2616_v26 = vmul.f32 %v2499_v55, %v2499_v55 }
 0x192   : > { %v2591_v36 = vadd.f32 %v2590_v12, %v4588_v41  ;;  %v2627_v59 = vadd.f32 %v2626_v40, %v2612_v37  ;;  %v2618_v41 = vmul.f32 %v4605_v60, %v4605_v60 }
 0x194   : > { %v2592_v2 = vadd.f32 %v2591_v36, %v4570_v0  ;;  %v2628_v7 = vadd.f32 %v2627_v59, %v2613_v28 }
 0x196   : > { %v2593_v17 = vadd.f32 %v2592_v2, %v4572_v33  ;;  %v2629_v23 = vadd.f32 %v2628_v7, %v2614_v35 }
 0x198   : > { %v2594_v48 = vadd.f32 %v2593_v17, %v2499_v55  ;;  %v2630_v13 = vadd.f32 %v2629_v23, %v2615_v62 }
 0x19a   : > { %v2595_v52 = vadd.f32 %v2594_v48, %v2500_v39  ;;  %v2631_v32 = vadd.f32 %v2630_v13, %v2616_v26 }
 0x19c   : > { %v2596_v5 = vadd.f32 %v2595_v52, %v4605_v60  ;;  %v2632_v0 = vadd.f32 %v2631_v32, %v2617_v3 }
 0x19e   : > { %v2597_v21 = vadd.f32 %v2596_v5, %v4608_v16  ;;  %v2633_v33 = vadd.f32 %v2632_v0, %v2618_v41 }
 0x1a0   : > { %v2598_v63 = vrot.slane %v2597_v21, 4  ;;  %v2634_v27 = vadd.f32 %v2633_v33, %v2619_v19 }
 0x1a2   : > { %v2599_v55 = vadd.f32 %v2598_v63, %v2597_v21  ;;  %v2635_v11 = vrot.slane %v2634_v27, 4 }
 0x1a4   : > { %v2600_v50 = vrot.slane %v2599_v55, 2  ;;  %v2636_v39 = vadd.f32 %v2635_v11, %v2634_v27 }
 0x1a6   : > { %v2601_v1 = vadd.f32 %v2600_v50, %v2599_v55  ;;  %v2637_v58 = vrot.slane %v2636_v39, 2 }
 0x1a8   : > { %v2602_v22 = vrot.slane %v2601_v1, 1  ;;  %v2638_v24 = vadd.f32 %v2637_v58, %v2636_v39 }
 0x1aa   : > { %v2639_v8 = vrot.slane %v2638_v24, 1  ;;  %v2603_v60 = vadd.f32 %v2602_v22, %v2601_v1 }
 0x1ac   : > { %v2640_v30 = vadd.f32 %v2639_v8, %v2638_v24 }
 0x1ae   : > { %v2642_v16 = vsel %vm719_vm0, %v2603_v60, %v2640_v30 }
 0x1af   : > { %2643 = vst [vmem:[%s467_s13] sm:$0x3] %v2642_v16 }
 0x1b0 PF: > { %s18_s28 = sadd.s32 1, %s3806_s28   ;;  %s4686_s24 = smov %s3798_s26 }
 0x1b1   : > { %p15_p0 = scmp.ge.s32.totalorder %s18_s28, 6   ;;  %s4687_s25 = smov %s3802_s27 }
 0x1b2   : > { %s4688_s26 = smov %s4691_s29  ;;  %s4689_s27 = smov %s4695_s30 }
 0x1b3   :  { %17 = sbr.rel (!%p15_p0) target bundleno = 3 (0x3), region = 100 }

</bundles_post_ra>
